<compile_context>
chip_gen: v6e
topology: v6e:2x2x1
jax: 0.10.0
libtpu: 0.0.40
codegen_flags: <defaults>
</compile_context>

<pallas_src>
import functools

import numpy as np
import jax
import jax.numpy as jnp
from jax.experimental import pallas as pl
from jax.experimental.pallas import tpu as pltpu


def _siren_kernel(x_ref, w_ref, b_ref, out_ref, *, dims_in, dims_out, omega_0):
    """Fused SIREN forward for one batch tile (TB lanes on the last axis).

    x_ref  : (dim_in, TB)           input features
    w_ref  : (sum din*dout, TB)     weights; row (off_l + i*dout + o) = W_l[o, i]
    b_ref  : (sum dout, TB)         biases (f32)
    out_ref: (dim_out, TB)
    """
    h = x_ref[...]
    if h.dtype != jnp.float32:
        h = h.astype(jnp.float32)

    n_layers = len(dims_in)
    w_off = 0
    b_off = 0
    for l, (din, dout) in enumerate(zip(dims_in, dims_out)):
        # y[o, :] = sum_i W[o, i, :] * h[i, :]  -- unrolled FMA over din (<= 32).
        # Each step reads one contiguous (dout, TB) slab straight from the ref
        # (leading-axis static slice -> plain vld; live set = one slab + acc + h).
        acc = None
        for i in range(din):
            w_i = w_ref[pl.ds(w_off + i * dout, dout), :]
            if w_i.dtype != jnp.float32:
                w_i = w_i.astype(jnp.float32)          # per-chunk upcast, stays hidden under DMA
            term = w_i * h[i:i + 1, :]
            acc = term if acc is None else acc + term

        b = b_ref[pl.ds(b_off, dout), :]
        if b.dtype != jnp.float32:
            b = b.astype(jnp.float32)

        h = omega_0 * acc + b                          # (dout, TB)
        if l != n_layers - 1:
            h = jnp.sin(h)                             # VPU range-reduction poly; hidden under weight DMA

        w_off += din * dout
        b_off += dout

    out_ref[...] = h.astype(out_ref.dtype)


def _default_vmem_limit_bytes():
    try:
        cap = pltpu.get_tpu_info().vmem_capacity_bytes
    except Exception:
        cap = 128 << 20
    # Leave headroom for compiler scratch: 3/4 of physical, never above 64 MiB.
    # (v7x: 64 MiB physical -> 48 MiB; v5e/v6e: 128 MiB -> 64 MiB.)
    return int(min(64 << 20, (cap * 3) // 4))


def siren_parametrized_forward(
    x,
    out_hnet,
    *,
    dim_in,
    dim_out,
    layers,
    omega_0=30.0,
    weights_dtype=None,      # e.g. jnp.bfloat16 to halve weight HBM traffic (biases stay f32)
    block_b=None,            # batch tile on the lane axis (multiple of 128); auto if None
    vmem_limit_bytes=None,
):
    B = out_hnet.shape[0]
    dims_in = [dim_in] + list(layers)
    dims_out = list(layers) + [dim_out]
    n_params = sum(di * do + do for di, do in zip(dims_in, dims_out))
    assert out_hnet.shape[1] == n_params, (out_hnet.shape, n_params)
    assert x.shape == (B, dim_in), (x.shape, (B, dim_in))

    w_rows = sum(di * do for di, do in zip(dims_in, dims_out))
    b_rows = sum(dims_out)
    w_bytes = jnp.dtype(weights_dtype).itemsize if weights_dtype is not None else 4

    if vmem_limit_bytes is None:
        vmem_limit_bytes = _default_vmem_limit_bytes()

    # --- batch tile: kernel is HBM-bound, so 256-512 lanes already reaches roofline.
    #     Keep double-buffered blobs inside VMEM, never exceed the padded batch, and
    #     leave >= 2 tiles so both v7x TensorCores get work. ---
    if block_b is None:
        budget = max(int(vmem_limit_bytes * 0.6), 4 << 20)
        per_lane = 2 * (dim_in * 4 + w_rows * w_bytes + b_rows * 4 + dim_out * 4)
        tb = budget // max(per_lane, 1)
        tb = max(128, (tb // 128) * 128)
        tb = min(tb, 512)                                              # cap (review)
        tb = min(tb, ((B + 127) // 128) * 128)                         # <= padded batch
        tb = min(tb, max(128, (((B + 1) // 2 + 127) // 128) * 128))    # >= 2 tiles if possible
        block_b = max(128, tb)
    assert block_b % 128 == 0

    # --- pad batch to a multiple of the tile (padded samples are all-zero, harmless) ---
    Bp = ((B + block_b - 1) // block_b) * block_b
    pad = Bp - B
    x_p = jnp.pad(x, ((0, pad), (0, 0))) if pad else x
    h_p = jnp.pad(out_hnet, ((0, pad), (0, 0))) if pad else out_hnet

    # --- one-shot re-layout of the hypernet output (single fused gather+transpose pass):
    #     weight rows go i-major within each layer so the kernel reads (dout, TB) slabs. ---
    w_perm, b_perm = [], []
    cpt = 0
    for din, dout in zip(dims_in, dims_out):
        # new row (i*dout + o) within the layer chunk <- old column (cpt + o*din + i)
        w_perm.append(cpt + np.arange(dout * din).reshape(dout, din).T.reshape(-1))
        cpt += din * dout
        b_perm.append(np.arange(cpt, cpt + dout))
        cpt += dout
    w_perm = jnp.asarray(np.concatenate(w_perm))
    b_perm = jnp.asarray(np.concatenate(b_perm))

    w_cols = jnp.take(h_p, w_perm, axis=1)                              # (Bp, w_rows)
    if weights_dtype is not None:
        w_cols = w_cols.astype(weights_dtype)                           # cast before transpose write
    w_blob = jnp.transpose(w_cols, (1, 0))                              # (w_rows, Bp)
    b_blob = jnp.transpose(jnp.take(h_p, b_perm, axis=1), (1, 0))       # (b_rows, Bp), f32 always
    x_t = jnp.transpose(x_p, (1, 0))                                    # (dim_in, Bp)

    kernel = functools.partial(
        _siren_kernel,
        dims_in=tuple(dims_in),
        dims_out=tuple(dims_out),
        omega_0=float(omega_0),
    )

    out_t = pl.pallas_call(
        kernel,
        grid=(Bp // block_b,),
        in_specs=[
            pl.BlockSpec((dim_in, block_b), lambda g: (0, g)),
            pl.BlockSpec((w_rows, block_b), lambda g: (0, g)),
            pl.BlockSpec((b_rows, block_b), lambda g: (0, g)),
        ],
        out_specs=pl.BlockSpec((dim_out, block_b), lambda g: (0, g)),
        out_shape=jax.ShapeDtypeStruct((dim_out, Bp), x.dtype),
        compiler_params=pltpu.CompilerParams(
            dimension_semantics=("parallel",),   # shards batch tiles across TCs on v7x
            vmem_limit_bytes=vmem_limit_bytes,
        ),
    )(x_t, w_blob, b_blob)

    # back to the PyTorch layout (B, dim_out), dropping batch padding
    return jnp.transpose(out_t, (1, 0))[:B]


if __name__ == "__main__":
    B = 200          # not a multiple of the tile -> exercises padding + 2-tile grid
    DIN = 4
    DOUT = 4
    LAYERS = [32, 32]
    OMEGA = 30.0

    dims_in = [DIN] + LAYERS
    dims_out = LAYERS + [DOUT]
    n_params = sum(di * do + do for di, do in zip(dims_in, dims_out))

    key = jax.random.PRNGKey(0)
    kx, kh = jax.random.split(key)
    x = jax.random.normal(kx, (B, DIN), dtype=jnp.float32)
    out_hnet = 0.05 * jax.random.normal(kh, (B, n_params), dtype=jnp.float32)

    y = siren_parametrized_forward(
        x, out_hnet, dim_in=DIN, dim_out=DOUT, layers=LAYERS, omega_0=OMEGA,
    )
    y = jax.block_until_ready(y)

    # Pure-JAX reference reproducing the PyTorch forward exactly.
    def ref_forward(x, out_hnet):
        cpt = 0
        h = x
        for idx, (di, do) in enumerate(zip(dims_in, dims_out)):
            W = out_hnet[:, cpt:cpt + di * do].reshape(B, do, di)
            cpt += di * do
            bb = out_hnet[:, cpt:cpt + do]
            cpt += do
            h = OMEGA * jnp.einsum("bi,bji->bj", h, W) + bb
            if idx != len(LAYERS):
                h = jnp.sin(h)
        return h

    y_ref = jax.block_until_ready(ref_forward(x, out_hnet))
    assert y.shape == (B, DOUT)
    err = float(jnp.max(jnp.abs(y - y_ref)))
    assert jnp.allclose(y, y_ref, atol=1e-3, rtol=1e-3), err
    print("KERNEL_OK")
</pallas_src>

<mosaic_0001>
module attributes {stable_mosaic.version = 11 : i64} {
  func.func @_siren_kernel(%arg0: i32, %arg1: memref<4x128xf32, #tpu.memory_space<vmem>>, %arg2: memref<1280x128xf32, #tpu.memory_space<vmem>>, %arg3: memref<68x128xf32, #tpu.memory_space<vmem>>, %arg4: memref<4x128xf32, #tpu.memory_space<vmem>>) attributes {dimension_semantics = [#tpu.dimension_semantics<parallel>], iteration_bounds = array<i64: 2>, scalar_prefetch = 0 : i64, scratch_operands = 0 : i64, tpu.core_type = #tpu.core_type<tc>, window_params = [{transform_indices = @transform_0, window_bounds = array<i64: 4, 128>}, {transform_indices = @transform_1, window_bounds = array<i64: 1280, 128>}, {transform_indices = @transform_2, window_bounds = array<i64: 68, 128>}, {transform_indices = @transform_3, window_bounds = array<i64: 4, 128>}]} {
    %c0 = arith.constant 0 : index
    %c0_0 = arith.constant 0 : index
    %0 = vector.load %arg1[%c0, %c0_0] : memref<4x128xf32, #tpu.memory_space<vmem>>, vector<4x128xf32>
    %c0_1 = arith.constant 0 : index
    %c0_2 = arith.constant 0 : index
    %1 = vector.load %arg2[%c0_1, %c0_2] : memref<1280x128xf32, #tpu.memory_space<vmem>>, vector<32x128xf32>
    %2 = vector.extract_strided_slice %0 {offsets = [0, 0], sizes = [1, 128], strides = [1, 1]} : vector<4x128xf32> to vector<1x128xf32>
    %3 = vector.broadcast %2 : vector<1x128xf32> to vector<32x128xf32>
    %4 = arith.mulf %1, %3 : vector<32x128xf32>
    %c32 = arith.constant 32 : index
    %c0_3 = arith.constant 0 : index
    %5 = vector.load %arg2[%c32, %c0_3] : memref<1280x128xf32, #tpu.memory_space<vmem>>, vector<32x128xf32>
    %6 = vector.extract_strided_slice %0 {offsets = [1, 0], sizes = [1, 128], strides = [1, 1]} : vector<4x128xf32> to vector<1x128xf32>
    %7 = vector.broadcast %6 : vector<1x128xf32> to vector<32x128xf32>
    %8 = arith.mulf %5, %7 : vector<32x128xf32>
    %9 = arith.addf %4, %8 : vector<32x128xf32>
    %c64 = arith.constant 64 : index
    %c0_4 = arith.constant 0 : index
    %10 = vector.load %arg2[%c64, %c0_4] : memref<1280x128xf32, #tpu.memory_space<vmem>>, vector<32x128xf32>
    %11 = vector.extract_strided_slice %0 {offsets = [2, 0], sizes = [1, 128], strides = [1, 1]} : vector<4x128xf32> to vector<1x128xf32>
    %12 = vector.broadcast %11 : vector<1x128xf32> to vector<32x128xf32>
    %13 = arith.mulf %10, %12 : vector<32x128xf32>
    %14 = arith.addf %9, %13 : vector<32x128xf32>
    %c96 = arith.constant 96 : index
    %c0_5 = arith.constant 0 : index
    %15 = vector.load %arg2[%c96, %c0_5] : memref<1280x128xf32, #tpu.memory_space<vmem>>, vector<32x128xf32>
    %16 = vector.extract_strided_slice %0 {offsets = [3, 0], sizes = [1, 128], strides = [1, 1]} : vector<4x128xf32> to vector<1x128xf32>
    %17 = vector.broadcast %16 : vector<1x128xf32> to vector<32x128xf32>
    %18 = arith.mulf %15, %17 : vector<32x128xf32>
    %19 = arith.addf %14, %18 : vector<32x128xf32>
    %c0_6 = arith.constant 0 : index
    %c0_7 = arith.constant 0 : index
    %20 = vector.load %arg3[%c0_6, %c0_7] : memref<68x128xf32, #tpu.memory_space<vmem>>, vector<32x128xf32>
    %cst = arith.constant 3.000000e+01 : f32
    %21 = vector.broadcast %cst : f32 to vector<32x128xf32>
    %22 = arith.mulf %21, %19 : vector<32x128xf32>
    %23 = arith.addf %22, %20 : vector<32x128xf32>
    %24 = math.sin %23 : vector<32x128xf32>
    %c128 = arith.constant 128 : index
    %c0_8 = arith.constant 0 : index
    %25 = vector.load %arg2[%c128, %c0_8] : memref<1280x128xf32, #tpu.memory_space<vmem>>, vector<32x128xf32>
    %26 = vector.extract_strided_slice %24 {offsets = [0, 0], sizes = [1, 128], strides = [1, 1]} : vector<32x128xf32> to vector<1x128xf32>
    %27 = vector.broadcast %26 : vector<1x128xf32> to vector<32x128xf32>
    %28 = arith.mulf %25, %27 : vector<32x128xf32>
    %c160 = arith.constant 160 : index
    %c0_9 = arith.constant 0 : index
    %29 = vector.load %arg2[%c160, %c0_9] : memref<1280x128xf32, #tpu.memory_space<vmem>>, vector<32x128xf32>
    %30 = vector.extract_strided_slice %24 {offsets = [1, 0], sizes = [1, 128], strides = [1, 1]} : vector<32x128xf32> to vector<1x128xf32>
    %31 = vector.broadcast %30 : vector<1x128xf32> to vector<32x128xf32>
    %32 = arith.mulf %29, %31 : vector<32x128xf32>
    %33 = arith.addf %28, %32 : vector<32x128xf32>
    %c192 = arith.constant 192 : index
    %c0_10 = arith.constant 0 : index
    %34 = vector.load %arg2[%c192, %c0_10] : memref<1280x128xf32, #tpu.memory_space<vmem>>, vector<32x128xf32>
    %35 = vector.extract_strided_slice %24 {offsets = [2, 0], sizes = [1, 128], strides = [1, 1]} : vector<32x128xf32> to vector<1x128xf32>
    %36 = vector.broadcast %35 : vector<1x128xf32> to vector<32x128xf32>
    %37 = arith.mulf %34, %36 : vector<32x128xf32>
    %38 = arith.addf %33, %37 : vector<32x128xf32>
    %c224 = arith.constant 224 : index
    %c0_11 = arith.constant 0 : index
    %39 = vector.load %arg2[%c224, %c0_11] : memref<1280x128xf32, #tpu.memory_space<vmem>>, vector<32x128xf32>
    %40 = vector.extract_strided_slice %24 {offsets = [3, 0], sizes = [1, 128], strides = [1, 1]} : vector<32x128xf32> to vector<1x128xf32>
    %41 = vector.broadcast %40 : vector<1x128xf32> to vector<32x128xf32>
    %42 = arith.mulf %39, %41 : vector<32x128xf32>
    %43 = arith.addf %38, %42 : vector<32x128xf32>
    %c256 = arith.constant 256 : index
    %c0_12 = arith.constant 0 : index
    %44 = vector.load %arg2[%c256, %c0_12] : memref<1280x128xf32, #tpu.memory_space<vmem>>, vector<32x128xf32>
    %45 = vector.extract_strided_slice %24 {offsets = [4, 0], sizes = [1, 128], strides = [1, 1]} : vector<32x128xf32> to vector<1x128xf32>
    %46 = vector.broadcast %45 : vector<1x128xf32> to vector<32x128xf32>
    %47 = arith.mulf %44, %46 : vector<32x128xf32>
    %48 = arith.addf %43, %47 : vector<32x128xf32>
    %c288 = arith.constant 288 : index
    %c0_13 = arith.constant 0 : index
    %49 = vector.load %arg2[%c288, %c0_13] : memref<1280x128xf32, #tpu.memory_space<vmem>>, vector<32x128xf32>
    %50 = vector.extract_strided_slice %24 {offsets = [5, 0], sizes = [1, 128], strides = [1, 1]} : vector<32x128xf32> to vector<1x128xf32>
    %51 = vector.broadcast %50 : vector<1x128xf32> to vector<32x128xf32>
    %52 = arith.mulf %49, %51 : vector<32x128xf32>
    %53 = arith.addf %48, %52 : vector<32x128xf32>
    %c320 = arith.constant 320 : index
    %c0_14 = arith.constant 0 : index
    %54 = vector.load %arg2[%c320, %c0_14] : memref<1280x128xf32, #tpu.memory_space<vmem>>, vector<32x128xf32>
    %55 = vector.extract_strided_slice %24 {offsets = [6, 0], sizes = [1, 128], strides = [1, 1]} : vector<32x128xf32> to vector<1x128xf32>
    %56 = vector.broadcast %55 : vector<1x128xf32> to vector<32x128xf32>
    %57 = arith.mulf %54, %56 : vector<32x128xf32>
    %58 = arith.addf %53, %57 : vector<32x128xf32>
    %c352 = arith.constant 352 : index
    %c0_15 = arith.constant 0 : index
    %59 = vector.load %arg2[%c352, %c0_15] : memref<1280x128xf32, #tpu.memory_space<vmem>>, vector<32x128xf32>
    %60 = vector.extract_strided_slice %24 {offsets = [7, 0], sizes = [1, 128], strides = [1, 1]} : vector<32x128xf32> to vector<1x128xf32>
    %61 = vector.broadcast %60 : vector<1x128xf32> to vector<32x128xf32>
    %62 = arith.mulf %59, %61 : vector<32x128xf32>
    %63 = arith.addf %58, %62 : vector<32x128xf32>
    %c384 = arith.constant 384 : index
    %c0_16 = arith.constant 0 : index
    %64 = vector.load %arg2[%c384, %c0_16] : memref<1280x128xf32, #tpu.memory_space<vmem>>, vector<32x128xf32>
    %65 = vector.extract_strided_slice %24 {offsets = [8, 0], sizes = [1, 128], strides = [1, 1]} : vector<32x128xf32> to vector<1x128xf32>
    %66 = vector.broadcast %65 : vector<1x128xf32> to vector<32x128xf32>
    %67 = arith.mulf %64, %66 : vector<32x128xf32>
    %68 = arith.addf %63, %67 : vector<32x128xf32>
    %c416 = arith.constant 416 : index
    %c0_17 = arith.constant 0 : index
    %69 = vector.load %arg2[%c416, %c0_17] : memref<1280x128xf32, #tpu.memory_space<vmem>>, vector<32x128xf32>
    %70 = vector.extract_strided_slice %24 {offsets = [9, 0], sizes = [1, 128], strides = [1, 1]} : vector<32x128xf32> to vector<1x128xf32>
    %71 = vector.broadcast %70 : vector<1x128xf32> to vector<32x128xf32>
    %72 = arith.mulf %69, %71 : vector<32x128xf32>
    %73 = arith.addf %68, %72 : vector<32x128xf32>
    %c448 = arith.constant 448 : index
    %c0_18 = arith.constant 0 : index
    %74 = vector.load %arg2[%c448, %c0_18] : memref<1280x128xf32, #tpu.memory_space<vmem>>, vector<32x128xf32>
    %75 = vector.extract_strided_slice %24 {offsets = [10, 0], sizes = [1, 128], strides = [1, 1]} : vector<32x128xf32> to vector<1x128xf32>
    %76 = vector.broadcast %75 : vector<1x128xf32> to vector<32x128xf32>
    %77 = arith.mulf %74, %76 : vector<32x128xf32>
    %78 = arith.addf %73, %77 : vector<32x128xf32>
    %c480 = arith.constant 480 : index
    %c0_19 = arith.constant 0 : index
    %79 = vector.load %arg2[%c480, %c0_19] : memref<1280x128xf32, #tpu.memory_space<vmem>>, vector<32x128xf32>
    %80 = vector.extract_strided_slice %24 {offsets = [11, 0], sizes = [1, 128], strides = [1, 1]} : vector<32x128xf32> to vector<1x128xf32>
    %81 = vector.broadcast %80 : vector<1x128xf32> to vector<32x128xf32>
    %82 = arith.mulf %79, %81 : vector<32x128xf32>
    %83 = arith.addf %78, %82 : vector<32x128xf32>
    %c512 = arith.constant 512 : index
    %c0_20 = arith.constant 0 : index
    %84 = vector.load %arg2[%c512, %c0_20] : memref<1280x128xf32, #tpu.memory_space<vmem>>, vector<32x128xf32>
    %85 = vector.extract_strided_slice %24 {offsets = [12, 0], sizes = [1, 128], strides = [1, 1]} : vector<32x128xf32> to vector<1x128xf32>
    %86 = vector.broadcast %85 : vector<1x128xf32> to vector<32x128xf32>
    %87 = arith.mulf %84, %86 : vector<32x128xf32>
    %88 = arith.addf %83, %87 : vector<32x128xf32>
    %c544 = arith.constant 544 : index
    %c0_21 = arith.constant 0 : index
    %89 = vector.load %arg2[%c544, %c0_21] : memref<1280x128xf32, #tpu.memory_space<vmem>>, vector<32x128xf32>
    %90 = vector.extract_strided_slice %24 {offsets = [13, 0], sizes = [1, 128], strides = [1, 1]} : vector<32x128xf32> to vector<1x128xf32>
    %91 = vector.broadcast %90 : vector<1x128xf32> to vector<32x128xf32>
    %92 = arith.mulf %89, %91 : vector<32x128xf32>
    %93 = arith.addf %88, %92 : vector<32x128xf32>
    %c576 = arith.constant 576 : index
    %c0_22 = arith.constant 0 : index
    %94 = vector.load %arg2[%c576, %c0_22] : memref<1280x128xf32, #tpu.memory_space<vmem>>, vector<32x128xf32>
    %95 = vector.extract_strided_slice %24 {offsets = [14, 0], sizes = [1, 128], strides = [1, 1]} : vector<32x128xf32> to vector<1x128xf32>
    %96 = vector.broadcast %95 : vector<1x128xf32> to vector<32x128xf32>
    %97 = arith.mulf %94, %96 : vector<32x128xf32>
    %98 = arith.addf %93, %97 : vector<32x128xf32>
    %c608 = arith.constant 608 : index
    %c0_23 = arith.constant 0 : index
    %99 = vector.load %arg2[%c608, %c0_23] : memref<1280x128xf32, #tpu.memory_space<vmem>>, vector<32x128xf32>
    %100 = vector.extract_strided_slice %24 {offsets = [15, 0], sizes = [1, 128], strides = [1, 1]} : vector<32x128xf32> to vector<1x128xf32>
    %101 = vector.broadcast %100 : vector<1x128xf32> to vector<32x128xf32>
    %102 = arith.mulf %99, %101 : vector<32x128xf32>
    %103 = arith.addf %98, %102 : vector<32x128xf32>
    %c640 = arith.constant 640 : index
    %c0_24 = arith.constant 0 : index
    %104 = vector.load %arg2[%c640, %c0_24] : memref<1280x128xf32, #tpu.memory_space<vmem>>, vector<32x128xf32>
    %105 = vector.extract_strided_slice %24 {offsets = [16, 0], sizes = [1, 128], strides = [1, 1]} : vector<32x128xf32> to vector<1x128xf32>
    %106 = vector.broadcast %105 : vector<1x128xf32> to vector<32x128xf32>
    %107 = arith.mulf %104, %106 : vector<32x128xf32>
    %108 = arith.addf %103, %107 : vector<32x128xf32>
    %c672 = arith.constant 672 : index
    %c0_25 = arith.constant 0 : index
    %109 = vector.load %arg2[%c672, %c0_25] : memref<1280x128xf32, #tpu.memory_space<vmem>>, vector<32x128xf32>
    %110 = vector.extract_strided_slice %24 {offsets = [17, 0], sizes = [1, 128], strides = [1, 1]} : vector<32x128xf32> to vector<1x128xf32>
    %111 = vector.broadcast %110 : vector<1x128xf32> to vector<32x128xf32>
    %112 = arith.mulf %109, %111 : vector<32x128xf32>
    %113 = arith.addf %108, %112 : vector<32x128xf32>
    %c704 = arith.constant 704 : index
    %c0_26 = arith.constant 0 : index
    %114 = vector.load %arg2[%c704, %c0_26] : memref<1280x128xf32, #tpu.memory_space<vmem>>, vector<32x128xf32>
    %115 = vector.extract_strided_slice %24 {offsets = [18, 0], sizes = [1, 128], strides = [1, 1]} : vector<32x128xf32> to vector<1x128xf32>
    %116 = vector.broadcast %115 : vector<1x128xf32> to vector<32x128xf32>
    %117 = arith.mulf %114, %116 : vector<32x128xf32>
    %118 = arith.addf %113, %117 : vector<32x128xf32>
    %c736 = arith.constant 736 : index
    %c0_27 = arith.constant 0 : index
    %119 = vector.load %arg2[%c736, %c0_27] : memref<1280x128xf32, #tpu.memory_space<vmem>>, vector<32x128xf32>
    %120 = vector.extract_strided_slice %24 {offsets = [19, 0], sizes = [1, 128], strides = [1, 1]} : vector<32x128xf32> to vector<1x128xf32>
    %121 = vector.broadcast %120 : vector<1x128xf32> to vector<32x128xf32>
    %122 = arith.mulf %119, %121 : vector<32x128xf32>
    %123 = arith.addf %118, %122 : vector<32x128xf32>
    %c768 = arith.constant 768 : index
    %c0_28 = arith.constant 0 : index
    %124 = vector.load %arg2[%c768, %c0_28] : memref<1280x128xf32, #tpu.memory_space<vmem>>, vector<32x128xf32>
    %125 = vector.extract_strided_slice %24 {offsets = [20, 0], sizes = [1, 128], strides = [1, 1]} : vector<32x128xf32> to vector<1x128xf32>
    %126 = vector.broadcast %125 : vector<1x128xf32> to vector<32x128xf32>
    %127 = arith.mulf %124, %126 : vector<32x128xf32>
    %128 = arith.addf %123, %127 : vector<32x128xf32>
    %c800 = arith.constant 800 : index
    %c0_29 = arith.constant 0 : index
    %129 = vector.load %arg2[%c800, %c0_29] : memref<1280x128xf32, #tpu.memory_space<vmem>>, vector<32x128xf32>
    %130 = vector.extract_strided_slice %24 {offsets = [21, 0], sizes = [1, 128], strides = [1, 1]} : vector<32x128xf32> to vector<1x128xf32>
    %131 = vector.broadcast %130 : vector<1x128xf32> to vector<32x128xf32>
    %132 = arith.mulf %129, %131 : vector<32x128xf32>
    %133 = arith.addf %128, %132 : vector<32x128xf32>
    %c832 = arith.constant 832 : index
    %c0_30 = arith.constant 0 : index
    %134 = vector.load %arg2[%c832, %c0_30] : memref<1280x128xf32, #tpu.memory_space<vmem>>, vector<32x128xf32>
    %135 = vector.extract_strided_slice %24 {offsets = [22, 0], sizes = [1, 128], strides = [1, 1]} : vector<32x128xf32> to vector<1x128xf32>
    %136 = vector.broadcast %135 : vector<1x128xf32> to vector<32x128xf32>
    %137 = arith.mulf %134, %136 : vector<32x128xf32>
    %138 = arith.addf %133, %137 : vector<32x128xf32>
    %c864 = arith.constant 864 : index
    %c0_31 = arith.constant 0 : index
    %139 = vector.load %arg2[%c864, %c0_31] : memref<1280x128xf32, #tpu.memory_space<vmem>>, vector<32x128xf32>
    %140 = vector.extract_strided_slice %24 {offsets = [23, 0], sizes = [1, 128], strides = [1, 1]} : vector<32x128xf32> to vector<1x128xf32>
    %141 = vector.broadcast %140 : vector<1x128xf32> to vector<32x128xf32>
    %142 = arith.mulf %139, %141 : vector<32x128xf32>
    %143 = arith.addf %138, %142 : vector<32x128xf32>
    %c896 = arith.constant 896 : index
    %c0_32 = arith.constant 0 : index
    %144 = vector.load %arg2[%c896, %c0_32] : memref<1280x128xf32, #tpu.memory_space<vmem>>, vector<32x128xf32>
    %145 = vector.extract_strided_slice %24 {offsets = [24, 0], sizes = [1, 128], strides = [1, 1]} : vector<32x128xf32> to vector<1x128xf32>
    %146 = vector.broadcast %145 : vector<1x128xf32> to vector<32x128xf32>
    %147 = arith.mulf %144, %146 : vector<32x128xf32>
    %148 = arith.addf %143, %147 : vector<32x128xf32>
    %c928 = arith.constant 928 : index
    %c0_33 = arith.constant 0 : index
    %149 = vector.load %arg2[%c928, %c0_33] : memref<1280x128xf32, #tpu.memory_space<vmem>>, vector<32x128xf32>
    %150 = vector.extract_strided_slice %24 {offsets = [25, 0], sizes = [1, 128], strides = [1, 1]} : vector<32x128xf32> to vector<1x128xf32>
    %151 = vector.broadcast %150 : vector<1x128xf32> to vector<32x128xf32>
    %152 = arith.mulf %149, %151 : vector<32x128xf32>
    %153 = arith.addf %148, %152 : vector<32x128xf32>
    %c960 = arith.constant 960 : index
    %c0_34 = arith.constant 0 : index
    %154 = vector.load %arg2[%c960, %c0_34] : memref<1280x128xf32, #tpu.memory_space<vmem>>, vector<32x128xf32>
    %155 = vector.extract_strided_slice %24 {offsets = [26, 0], sizes = [1, 128], strides = [1, 1]} : vector<32x128xf32> to vector<1x128xf32>
    %156 = vector.broadcast %155 : vector<1x128xf32> to vector<32x128xf32>
    %157 = arith.mulf %154, %156 : vector<32x128xf32>
    %158 = arith.addf %153, %157 : vector<32x128xf32>
    %c992 = arith.constant 992 : index
    %c0_35 = arith.constant 0 : index
    %159 = vector.load %arg2[%c992, %c0_35] : memref<1280x128xf32, #tpu.memory_space<vmem>>, vector<32x128xf32>
    %160 = vector.extract_strided_slice %24 {offsets = [27, 0], sizes = [1, 128], strides = [1, 1]} : vector<32x128xf32> to vector<1x128xf32>
    %161 = vector.broadcast %160 : vector<1x128xf32> to vector<32x128xf32>
    %162 = arith.mulf %159, %161 : vector<32x128xf32>
    %163 = arith.addf %158, %162 : vector<32x128xf32>
    %c1024 = arith.constant 1024 : index
    %c0_36 = arith.constant 0 : index
    %164 = vector.load %arg2[%c1024, %c0_36] : memref<1280x128xf32, #tpu.memory_space<vmem>>, vector<32x128xf32>
    %165 = vector.extract_strided_slice %24 {offsets = [28, 0], sizes = [1, 128], strides = [1, 1]} : vector<32x128xf32> to vector<1x128xf32>
    %166 = vector.broadcast %165 : vector<1x128xf32> to vector<32x128xf32>
    %167 = arith.mulf %164, %166 : vector<32x128xf32>
    %168 = arith.addf %163, %167 : vector<32x128xf32>
    %c1056 = arith.constant 1056 : index
    %c0_37 = arith.constant 0 : index
    %169 = vector.load %arg2[%c1056, %c0_37] : memref<1280x128xf32, #tpu.memory_space<vmem>>, vector<32x128xf32>
    %170 = vector.extract_strided_slice %24 {offsets = [29, 0], sizes = [1, 128], strides = [1, 1]} : vector<32x128xf32> to vector<1x128xf32>
    %171 = vector.broadcast %170 : vector<1x128xf32> to vector<32x128xf32>
    %172 = arith.mulf %169, %171 : vector<32x128xf32>
    %173 = arith.addf %168, %172 : vector<32x128xf32>
    %c1088 = arith.constant 1088 : index
    %c0_38 = arith.constant 0 : index
    %174 = vector.load %arg2[%c1088, %c0_38] : memref<1280x128xf32, #tpu.memory_space<vmem>>, vector<32x128xf32>
    %175 = vector.extract_strided_slice %24 {offsets = [30, 0], sizes = [1, 128], strides = [1, 1]} : vector<32x128xf32> to vector<1x128xf32>
    %176 = vector.broadcast %175 : vector<1x128xf32> to vector<32x128xf32>
    %177 = arith.mulf %174, %176 : vector<32x128xf32>
    %178 = arith.addf %173, %177 : vector<32x128xf32>
    %c1120 = arith.constant 1120 : index
    %c0_39 = arith.constant 0 : index
    %179 = vector.load %arg2[%c1120, %c0_39] : memref<1280x128xf32, #tpu.memory_space<vmem>>, vector<32x128xf32>
    %180 = vector.extract_strided_slice %24 {offsets = [31, 0], sizes = [1, 128], strides = [1, 1]} : vector<32x128xf32> to vector<1x128xf32>
    %181 = vector.broadcast %180 : vector<1x128xf32> to vector<32x128xf32>
    %182 = arith.mulf %179, %181 : vector<32x128xf32>
    %183 = arith.addf %178, %182 : vector<32x128xf32>
    %c32_40 = arith.constant 32 : index
    %c0_41 = arith.constant 0 : index
    %184 = vector.load %arg3[%c32_40, %c0_41] : memref<68x128xf32, #tpu.memory_space<vmem>>, vector<32x128xf32>
    %cst_42 = arith.constant 3.000000e+01 : f32
    %185 = vector.broadcast %cst_42 : f32 to vector<32x128xf32>
    %186 = arith.mulf %185, %183 : vector<32x128xf32>
    %187 = arith.addf %186, %184 : vector<32x128xf32>
    %188 = math.sin %187 : vector<32x128xf32>
    %c1152 = arith.constant 1152 : index
    %c0_43 = arith.constant 0 : index
    %189 = vector.load %arg2[%c1152, %c0_43] : memref<1280x128xf32, #tpu.memory_space<vmem>>, vector<4x128xf32>
    %190 = vector.extract_strided_slice %188 {offsets = [0, 0], sizes = [1, 128], strides = [1, 1]} : vector<32x128xf32> to vector<1x128xf32>
    %191 = vector.broadcast %190 : vector<1x128xf32> to vector<4x128xf32>
    %192 = arith.mulf %189, %191 : vector<4x128xf32>
    %c1156 = arith.constant 1156 : index
    %c0_44 = arith.constant 0 : index
    %193 = vector.load %arg2[%c1156, %c0_44] : memref<1280x128xf32, #tpu.memory_space<vmem>>, vector<4x128xf32>
    %194 = vector.extract_strided_slice %188 {offsets = [1, 0], sizes = [1, 128], strides = [1, 1]} : vector<32x128xf32> to vector<1x128xf32>
    %195 = vector.broadcast %194 : vector<1x128xf32> to vector<4x128xf32>
    %196 = arith.mulf %193, %195 : vector<4x128xf32>
    %197 = arith.addf %192, %196 : vector<4x128xf32>
    %c1160 = arith.constant 1160 : index
    %c0_45 = arith.constant 0 : index
    %198 = vector.load %arg2[%c1160, %c0_45] : memref<1280x128xf32, #tpu.memory_space<vmem>>, vector<4x128xf32>
    %199 = vector.extract_strided_slice %188 {offsets = [2, 0], sizes = [1, 128], strides = [1, 1]} : vector<32x128xf32> to vector<1x128xf32>
    %200 = vector.broadcast %199 : vector<1x128xf32> to vector<4x128xf32>
    %201 = arith.mulf %198, %200 : vector<4x128xf32>
    %202 = arith.addf %197, %201 : vector<4x128xf32>
    %c1164 = arith.constant 1164 : index
    %c0_46 = arith.constant 0 : index
    %203 = vector.load %arg2[%c1164, %c0_46] : memref<1280x128xf32, #tpu.memory_space<vmem>>, vector<4x128xf32>
    %204 = vector.extract_strided_slice %188 {offsets = [3, 0], sizes = [1, 128], strides = [1, 1]} : vector<32x128xf32> to vector<1x128xf32>
    %205 = vector.broadcast %204 : vector<1x128xf32> to vector<4x128xf32>
    %206 = arith.mulf %203, %205 : vector<4x128xf32>
    %207 = arith.addf %202, %206 : vector<4x128xf32>
    %c1168 = arith.constant 1168 : index
    %c0_47 = arith.constant 0 : index
    %208 = vector.load %arg2[%c1168, %c0_47] : memref<1280x128xf32, #tpu.memory_space<vmem>>, vector<4x128xf32>
    %209 = vector.extract_strided_slice %188 {offsets = [4, 0], sizes = [1, 128], strides = [1, 1]} : vector<32x128xf32> to vector<1x128xf32>
    %210 = vector.broadcast %209 : vector<1x128xf32> to vector<4x128xf32>
    %211 = arith.mulf %208, %210 : vector<4x128xf32>
    %212 = arith.addf %207, %211 : vector<4x128xf32>
    %c1172 = arith.constant 1172 : index
    %c0_48 = arith.constant 0 : index
    %213 = vector.load %arg2[%c1172, %c0_48] : memref<1280x128xf32, #tpu.memory_space<vmem>>, vector<4x128xf32>
    %214 = vector.extract_strided_slice %188 {offsets = [5, 0], sizes = [1, 128], strides = [1, 1]} : vector<32x128xf32> to vector<1x128xf32>
    %215 = vector.broadcast %214 : vector<1x128xf32> to vector<4x128xf32>
    %216 = arith.mulf %213, %215 : vector<4x128xf32>
    %217 = arith.addf %212, %216 : vector<4x128xf32>
    %c1176 = arith.constant 1176 : index
    %c0_49 = arith.constant 0 : index
    %218 = vector.load %arg2[%c1176, %c0_49] : memref<1280x128xf32, #tpu.memory_space<vmem>>, vector<4x128xf32>
    %219 = vector.extract_strided_slice %188 {offsets = [6, 0], sizes = [1, 128], strides = [1, 1]} : vector<32x128xf32> to vector<1x128xf32>
    %220 = vector.broadcast %219 : vector<1x128xf32> to vector<4x128xf32>
    %221 = arith.mulf %218, %220 : vector<4x128xf32>
    %222 = arith.addf %217, %221 : vector<4x128xf32>
    %c1180 = arith.constant 1180 : index
    %c0_50 = arith.constant 0 : index
    %223 = vector.load %arg2[%c1180, %c0_50] : memref<1280x128xf32, #tpu.memory_space<vmem>>, vector<4x128xf32>
    %224 = vector.extract_strided_slice %188 {offsets = [7, 0], sizes = [1, 128], strides = [1, 1]} : vector<32x128xf32> to vector<1x128xf32>
    %225 = vector.broadcast %224 : vector<1x128xf32> to vector<4x128xf32>
    %226 = arith.mulf %223, %225 : vector<4x128xf32>
    %227 = arith.addf %222, %226 : vector<4x128xf32>
    %c1184 = arith.constant 1184 : index
    %c0_51 = arith.constant 0 : index
    %228 = vector.load %arg2[%c1184, %c0_51] : memref<1280x128xf32, #tpu.memory_space<vmem>>, vector<4x128xf32>
    %229 = vector.extract_strided_slice %188 {offsets = [8, 0], sizes = [1, 128], strides = [1, 1]} : vector<32x128xf32> to vector<1x128xf32>
    %230 = vector.broadcast %229 : vector<1x128xf32> to vector<4x128xf32>
    %231 = arith.mulf %228, %230 : vector<4x128xf32>
    %232 = arith.addf %227, %231 : vector<4x128xf32>
    %c1188 = arith.constant 1188 : index
    %c0_52 = arith.constant 0 : index
    %233 = vector.load %arg2[%c1188, %c0_52] : memref<1280x128xf32, #tpu.memory_space<vmem>>, vector<4x128xf32>
    %234 = vector.extract_strided_slice %188 {offsets = [9, 0], sizes = [1, 128], strides = [1, 1]} : vector<32x128xf32> to vector<1x128xf32>
    %235 = vector.broadcast %234 : vector<1x128xf32> to vector<4x128xf32>
    %236 = arith.mulf %233, %235 : vector<4x128xf32>
    %237 = arith.addf %232, %236 : vector<4x128xf32>
    %c1192 = arith.constant 1192 : index
    %c0_53 = arith.constant 0 : index
    %238 = vector.load %arg2[%c1192, %c0_53] : memref<1280x128xf32, #tpu.memory_space<vmem>>, vector<4x128xf32>
    %239 = vector.extract_strided_slice %188 {offsets = [10, 0], sizes = [1, 128], strides = [1, 1]} : vector<32x128xf32> to vector<1x128xf32>
    %240 = vector.broadcast %239 : vector<1x128xf32> to vector<4x128xf32>
    %241 = arith.mulf %238, %240 : vector<4x128xf32>
    %242 = arith.addf %237, %241 : vector<4x128xf32>
    %c1196 = arith.constant 1196 : index
    %c0_54 = arith.constant 0 : index
    %243 = vector.load %arg2[%c1196, %c0_54] : memref<1280x128xf32, #tpu.memory_space<vmem>>, vector<4x128xf32>
    %244 = vector.extract_strided_slice %188 {offsets = [11, 0], sizes = [1, 128], strides = [1, 1]} : vector<32x128xf32> to vector<1x128xf32>
    %245 = vector.broadcast %244 : vector<1x128xf32> to vector<4x128xf32>
    %246 = arith.mulf %243, %245 : vector<4x128xf32>
    %247 = arith.addf %242, %246 : vector<4x128xf32>
    %c1200 = arith.constant 1200 : index
    %c0_55 = arith.constant 0 : index
    %248 = vector.load %arg2[%c1200, %c0_55] : memref<1280x128xf32, #tpu.memory_space<vmem>>, vector<4x128xf32>
    %249 = vector.extract_strided_slice %188 {offsets = [12, 0], sizes = [1, 128], strides = [1, 1]} : vector<32x128xf32> to vector<1x128xf32>
    %250 = vector.broadcast %249 : vector<1x128xf32> to vector<4x128xf32>
    %251 = arith.mulf %248, %250 : vector<4x128xf32>
    %252 = arith.addf %247, %251 : vector<4x128xf32>
    %c1204 = arith.constant 1204 : index
    %c0_56 = arith.constant 0 : index
    %253 = vector.load %arg2[%c1204, %c0_56] : memref<1280x128xf32, #tpu.memory_space<vmem>>, vector<4x128xf32>
    %254 = vector.extract_strided_slice %188 {offsets = [13, 0], sizes = [1, 128], strides = [1, 1]} : vector<32x128xf32> to vector<1x128xf32>
    %255 = vector.broadcast %254 : vector<1x128xf32> to vector<4x128xf32>
    %256 = arith.mulf %253, %255 : vector<4x128xf32>
    %257 = arith.addf %252, %256 : vector<4x128xf32>
    %c1208 = arith.constant 1208 : index
    %c0_57 = arith.constant 0 : index
    %258 = vector.load %arg2[%c1208, %c0_57] : memref<1280x128xf32, #tpu.memory_space<vmem>>, vector<4x128xf32>
    %259 = vector.extract_strided_slice %188 {offsets = [14, 0], sizes = [1, 128], strides = [1, 1]} : vector<32x128xf32> to vector<1x128xf32>
    %260 = vector.broadcast %259 : vector<1x128xf32> to vector<4x128xf32>
    %261 = arith.mulf %258, %260 : vector<4x128xf32>
    %262 = arith.addf %257, %261 : vector<4x128xf32>
    %c1212 = arith.constant 1212 : index
    %c0_58 = arith.constant 0 : index
    %263 = vector.load %arg2[%c1212, %c0_58] : memref<1280x128xf32, #tpu.memory_space<vmem>>, vector<4x128xf32>
    %264 = vector.extract_strided_slice %188 {offsets = [15, 0], sizes = [1, 128], strides = [1, 1]} : vector<32x128xf32> to vector<1x128xf32>
    %265 = vector.broadcast %264 : vector<1x128xf32> to vector<4x128xf32>
    %266 = arith.mulf %263, %265 : vector<4x128xf32>
    %267 = arith.addf %262, %266 : vector<4x128xf32>
    %c1216 = arith.constant 1216 : index
    %c0_59 = arith.constant 0 : index
    %268 = vector.load %arg2[%c1216, %c0_59] : memref<1280x128xf32, #tpu.memory_space<vmem>>, vector<4x128xf32>
    %269 = vector.extract_strided_slice %188 {offsets = [16, 0], sizes = [1, 128], strides = [1, 1]} : vector<32x128xf32> to vector<1x128xf32>
    %270 = vector.broadcast %269 : vector<1x128xf32> to vector<4x128xf32>
    %271 = arith.mulf %268, %270 : vector<4x128xf32>
    %272 = arith.addf %267, %271 : vector<4x128xf32>
    %c1220 = arith.constant 1220 : index
    %c0_60 = arith.constant 0 : index
    %273 = vector.load %arg2[%c1220, %c0_60] : memref<1280x128xf32, #tpu.memory_space<vmem>>, vector<4x128xf32>
    %274 = vector.extract_strided_slice %188 {offsets = [17, 0], sizes = [1, 128], strides = [1, 1]} : vector<32x128xf32> to vector<1x128xf32>
    %275 = vector.broadcast %274 : vector<1x128xf32> to vector<4x128xf32>
    %276 = arith.mulf %273, %275 : vector<4x128xf32>
    %277 = arith.addf %272, %276 : vector<4x128xf32>
    %c1224 = arith.constant 1224 : index
    %c0_61 = arith.constant 0 : index
    %278 = vector.load %arg2[%c1224, %c0_61] : memref<1280x128xf32, #tpu.memory_space<vmem>>, vector<4x128xf32>
    %279 = vector.extract_strided_slice %188 {offsets = [18, 0], sizes = [1, 128], strides = [1, 1]} : vector<32x128xf32> to vector<1x128xf32>
    %280 = vector.broadcast %279 : vector<1x128xf32> to vector<4x128xf32>
    %281 = arith.mulf %278, %280 : vector<4x128xf32>
    %282 = arith.addf %277, %281 : vector<4x128xf32>
    %c1228 = arith.constant 1228 : index
    %c0_62 = arith.constant 0 : index
    %283 = vector.load %arg2[%c1228, %c0_62] : memref<1280x128xf32, #tpu.memory_space<vmem>>, vector<4x128xf32>
    %284 = vector.extract_strided_slice %188 {offsets = [19, 0], sizes = [1, 128], strides = [1, 1]} : vector<32x128xf32> to vector<1x128xf32>
    %285 = vector.broadcast %284 : vector<1x128xf32> to vector<4x128xf32>
    %286 = arith.mulf %283, %285 : vector<4x128xf32>
    %287 = arith.addf %282, %286 : vector<4x128xf32>
    %c1232 = arith.constant 1232 : index
    %c0_63 = arith.constant 0 : index
    %288 = vector.load %arg2[%c1232, %c0_63] : memref<1280x128xf32, #tpu.memory_space<vmem>>, vector<4x128xf32>
    %289 = vector.extract_strided_slice %188 {offsets = [20, 0], sizes = [1, 128], strides = [1, 1]} : vector<32x128xf32> to vector<1x128xf32>
    %290 = vector.broadcast %289 : vector<1x128xf32> to vector<4x128xf32>
    %291 = arith.mulf %288, %290 : vector<4x128xf32>
    %292 = arith.addf %287, %291 : vector<4x128xf32>
    %c1236 = arith.constant 1236 : index
    %c0_64 = arith.constant 0 : index
    %293 = vector.load %arg2[%c1236, %c0_64] : memref<1280x128xf32, #tpu.memory_space<vmem>>, vector<4x128xf32>
    %294 = vector.extract_strided_slice %188 {offsets = [21, 0], sizes = [1, 128], strides = [1, 1]} : vector<32x128xf32> to vector<1x128xf32>
    %295 = vector.broadcast %294 : vector<1x128xf32> to vector<4x128xf32>
    %296 = arith.mulf %293, %295 : vector<4x128xf32>
    %297 = arith.addf %292, %296 : vector<4x128xf32>
    %c1240 = arith.constant 1240 : index
    %c0_65 = arith.constant 0 : index
    %298 = vector.load %arg2[%c1240, %c0_65] : memref<1280x128xf32, #tpu.memory_space<vmem>>, vector<4x128xf32>
    %299 = vector.extract_strided_slice %188 {offsets = [22, 0], sizes = [1, 128], strides = [1, 1]} : vector<32x128xf32> to vector<1x128xf32>
    %300 = vector.broadcast %299 : vector<1x128xf32> to vector<4x128xf32>
    %301 = arith.mulf %298, %300 : vector<4x128xf32>
    %302 = arith.addf %297, %301 : vector<4x128xf32>
    %c1244 = arith.constant 1244 : index
    %c0_66 = arith.constant 0 : index
    %303 = vector.load %arg2[%c1244, %c0_66] : memref<1280x128xf32, #tpu.memory_space<vmem>>, vector<4x128xf32>
    %304 = vector.extract_strided_slice %188 {offsets = [23, 0], sizes = [1, 128], strides = [1, 1]} : vector<32x128xf32> to vector<1x128xf32>
    %305 = vector.broadcast %304 : vector<1x128xf32> to vector<4x128xf32>
    %306 = arith.mulf %303, %305 : vector<4x128xf32>
    %307 = arith.addf %302, %306 : vector<4x128xf32>
    %c1248 = arith.constant 1248 : index
    %c0_67 = arith.constant 0 : index
    %308 = vector.load %arg2[%c1248, %c0_67] : memref<1280x128xf32, #tpu.memory_space<vmem>>, vector<4x128xf32>
    %309 = vector.extract_strided_slice %188 {offsets = [24, 0], sizes = [1, 128], strides = [1, 1]} : vector<32x128xf32> to vector<1x128xf32>
    %310 = vector.broadcast %309 : vector<1x128xf32> to vector<4x128xf32>
    %311 = arith.mulf %308, %310 : vector<4x128xf32>
    %312 = arith.addf %307, %311 : vector<4x128xf32>
    %c1252 = arith.constant 1252 : index
    %c0_68 = arith.constant 0 : index
    %313 = vector.load %arg2[%c1252, %c0_68] : memref<1280x128xf32, #tpu.memory_space<vmem>>, vector<4x128xf32>
    %314 = vector.extract_strided_slice %188 {offsets = [25, 0], sizes = [1, 128], strides = [1, 1]} : vector<32x128xf32> to vector<1x128xf32>
    %315 = vector.broadcast %314 : vector<1x128xf32> to vector<4x128xf32>
    %316 = arith.mulf %313, %315 : vector<4x128xf32>
    %317 = arith.addf %312, %316 : vector<4x128xf32>
    %c1256 = arith.constant 1256 : index
    %c0_69 = arith.constant 0 : index
    %318 = vector.load %arg2[%c1256, %c0_69] : memref<1280x128xf32, #tpu.memory_space<vmem>>, vector<4x128xf32>
    %319 = vector.extract_strided_slice %188 {offsets = [26, 0], sizes = [1, 128], strides = [1, 1]} : vector<32x128xf32> to vector<1x128xf32>
    %320 = vector.broadcast %319 : vector<1x128xf32> to vector<4x128xf32>
    %321 = arith.mulf %318, %320 : vector<4x128xf32>
    %322 = arith.addf %317, %321 : vector<4x128xf32>
    %c1260 = arith.constant 1260 : index
    %c0_70 = arith.constant 0 : index
    %323 = vector.load %arg2[%c1260, %c0_70] : memref<1280x128xf32, #tpu.memory_space<vmem>>, vector<4x128xf32>
    %324 = vector.extract_strided_slice %188 {offsets = [27, 0], sizes = [1, 128], strides = [1, 1]} : vector<32x128xf32> to vector<1x128xf32>
    %325 = vector.broadcast %324 : vector<1x128xf32> to vector<4x128xf32>
    %326 = arith.mulf %323, %325 : vector<4x128xf32>
    %327 = arith.addf %322, %326 : vector<4x128xf32>
    %c1264 = arith.constant 1264 : index
    %c0_71 = arith.constant 0 : index
    %328 = vector.load %arg2[%c1264, %c0_71] : memref<1280x128xf32, #tpu.memory_space<vmem>>, vector<4x128xf32>
    %329 = vector.extract_strided_slice %188 {offsets = [28, 0], sizes = [1, 128], strides = [1, 1]} : vector<32x128xf32> to vector<1x128xf32>
    %330 = vector.broadcast %329 : vector<1x128xf32> to vector<4x128xf32>
    %331 = arith.mulf %328, %330 : vector<4x128xf32>
    %332 = arith.addf %327, %331 : vector<4x128xf32>
    %c1268 = arith.constant 1268 : index
    %c0_72 = arith.constant 0 : index
    %333 = vector.load %arg2[%c1268, %c0_72] : memref<1280x128xf32, #tpu.memory_space<vmem>>, vector<4x128xf32>
    %334 = vector.extract_strided_slice %188 {offsets = [29, 0], sizes = [1, 128], strides = [1, 1]} : vector<32x128xf32> to vector<1x128xf32>
    %335 = vector.broadcast %334 : vector<1x128xf32> to vector<4x128xf32>
    %336 = arith.mulf %333, %335 : vector<4x128xf32>
    %337 = arith.addf %332, %336 : vector<4x128xf32>
    %c1272 = arith.constant 1272 : index
    %c0_73 = arith.constant 0 : index
    %338 = vector.load %arg2[%c1272, %c0_73] : memref<1280x128xf32, #tpu.memory_space<vmem>>, vector<4x128xf32>
    %339 = vector.extract_strided_slice %188 {offsets = [30, 0], sizes = [1, 128], strides = [1, 1]} : vector<32x128xf32> to vector<1x128xf32>
    %340 = vector.broadcast %339 : vector<1x128xf32> to vector<4x128xf32>
    %341 = arith.mulf %338, %340 : vector<4x128xf32>
    %342 = arith.addf %337, %341 : vector<4x128xf32>
    %c1276 = arith.constant 1276 : index
    %c0_74 = arith.constant 0 : index
    %343 = vector.load %arg2[%c1276, %c0_74] : memref<1280x128xf32, #tpu.memory_space<vmem>>, vector<4x128xf32>
    %344 = vector.extract_strided_slice %188 {offsets = [31, 0], sizes = [1, 128], strides = [1, 1]} : vector<32x128xf32> to vector<1x128xf32>
    %345 = vector.broadcast %344 : vector<1x128xf32> to vector<4x128xf32>
    %346 = arith.mulf %343, %345 : vector<4x128xf32>
    %347 = arith.addf %342, %346 : vector<4x128xf32>
    %c64_75 = arith.constant 64 : index
    %c0_76 = arith.constant 0 : index
    %348 = vector.load %arg3[%c64_75, %c0_76] : memref<68x128xf32, #tpu.memory_space<vmem>>, vector<4x128xf32>
    %cst_77 = arith.constant 3.000000e+01 : f32
    %349 = vector.broadcast %cst_77 : f32 to vector<4x128xf32>
    %350 = arith.mulf %349, %347 : vector<4x128xf32>
    %351 = arith.addf %350, %348 : vector<4x128xf32>
    %c0_78 = arith.constant 0 : index
    %c0_79 = arith.constant 0 : index
    %352 = vector.load %arg4[%c0_78, %c0_79] : memref<4x128xf32, #tpu.memory_space<vmem>>, vector<4x128xf32>
    tpu.vector_store %arg4[%c0_78, %c0_79], %351 {strides = array<i32>} : memref<4x128xf32, #tpu.memory_space<vmem>>, vector<4x128xf32>,
    return
  }
  func.func @transform_0(%arg0: i32) -> (i32, i32) {
    %c0_i32 = arith.constant 0 : i32
    %c0_i32_0 = arith.constant 0 : i32
    return %c0_i32, %arg0 : i32, i32
  }
  func.func @transform_1(%arg0: i32) -> (i32, i32) {
    %c0_i32 = arith.constant 0 : i32
    %c0_i32_0 = arith.constant 0 : i32
    return %c0_i32, %arg0 : i32, i32
  }
  func.func @transform_2(%arg0: i32) -> (i32, i32) {
    %c0_i32 = arith.constant 0 : i32
    %c0_i32_0 = arith.constant 0 : i32
    return %c0_i32, %arg0 : i32, i32
  }
  func.func @transform_3(%arg0: i32) -> (i32, i32) {
    %c0_i32 = arith.constant 0 : i32
    %c0_i32_0 = arith.constant 0 : i32
    return %c0_i32, %arg0 : i32, i32
  }
}

</mosaic_0001>

<bundles_post_ra>
// kernel: tpu_custom_call.1
= control target key start
LH: loop header
LB: loop body
LE: loop exit
PB: predicated region body
PF: predicated region fallthrough
CT: control target
= control target key end

     0   :  { %s3677_s0 = inlined_call_operand.hbm [shape: f32[4,256], index: 0, kind: input, shape index: {}]   ;;  %s3678_s1 = inlined_call_operand.hbm [shape: f32[1280,256], index: 1, kind: input, shape index: {}]   ;;  %s3679_s2 = inlined_call_operand.hbm [shape: f32[68,256], index: 2, kind: input, shape index: {}]   ;;  %s3680_s3 = inlined_call_operand.hbm [shape: f32[4,256], index: 3, kind: output, shape index: {}]  }
   0x1   :  { %3687 = sst [smem:[#allocation12_spill]] %s3678_s1 }
   0x2   :  { %8 = vsyncpa [#allocation3], 0 }
   0x3   :  { %10 = vsyncpa [#allocation3 + $0x1], 0 }
   0x4   :  { %11 = vsyncpa [#allocation6], 0 }
   0x5   :  { %13 = vsyncpa [#allocation6 + $0x1], 0 }
   0x6   :  { %14 = vsyncpa [#allocation4], 0 }
   0x7   :  { %16 = vsyncpa [#allocation4 + $0x1], 0  ;;  %s2406_s12 = smov 0   ;;  %s2408_s13 = smov 0  }
   0x8   :  { %s2410_s14 = smov 0   ;;  %s2412_s15 = smov 0  }
   0x9 LB: > { %s2427_s16 = sadd.s32 4294967295, %s2371_s15   ;;  %s2040_s17 = sadd.s32 4294967294, %s2371_s15   ;;  %s2371_s15 = sphi %s2412_s15, %s3723_s15   ;;  %s2367_s14 = sphi %s2410_s14, %s3722_s14   ;;  %s2363_s13 = sphi %s2408_s13, %s3721_s13   ;;  %s2359_s12 = sphi %s2406_s12, %s3720_s12  }
   0xa   : > { %s2431_s18 = sadd.s32 1, %s2371_s15   ;;  %s29_s19 = sadd.s32 1, %s2367_s14 }
   0xb   : > { %s26_s20 = ssub.s32 %s2371_s15, %s2431_s18  ;;  %p36_p0 = scmp.ne.s32.totalorder %s2367_s14, %s2363_s13 }
   0xc   : > { %p27_p1 = scmp.eq.s32.totalorder %s26_s20, 0  ;;  %p37_p2 = scmp.eq.s32.totalorder %s2371_s15, 0 }
   0xd   : > { %p42_p3 = scmp.ne.s32.totalorder %s2363_s13, %s2359_s12  ;;  %p43_p4 = scmp.eq.s32.totalorder %s2427_s16, 0 }
   0xe   : > { %s2443_s21 = scalar_select %p27_p1, %s2367_s14, %s29_s19  }
   0xf   : > { %p38_p5 = por %p37_p2, %p36_p0  ;;  %p2445_p6 = por %p43_p4, %p42_p3 }
  0x10   : > { %p118_p7 = scmp.eq.s32.totalorder %s2427_s16, 1  ;;  %p124_p8 = scmp.eq.s32.totalorder %s2040_s17, 1 }
  0x11   : > { %s3688_s22 = scalar_select %p2445_p6, 1, 0 }
  0x12   : > { %p2144_p10 = scmp.lt.s32.totalorder %s2371_s15, 2  ;;  %p2452_p11 = por %p118_p7, %p36_p0 }
  0x13   : > { %p2456_p12 = por %p124_p8, %p42_p3  ;;  %s2461_s25 = sand.u32 1, %s2367_s14  }
  0x14   : > { %s3689_s23 = scalar_select %p2452_p11, 1, 0 }
  0x15   : > { %s3690_s24 = scalar_select %p2456_p12, 1, 0 }
  0x16   : > { %p2463_p13 = pnand %p2144_p10, %p38_p5  ;;  %s162_s27 = sand.u32 1, %s2371_s15  }
  0x17   : > { %s2086_s28 = smul.u32 1280, %s2461_s25  ;;  %s3683_s29 = sshll.u32 %s2371_s15, 7 }
  0x18   : > { %s3692_s1 = sld [smem:[#allocation12_spill]]  ;;  %s2479_s8 = scalar_lea.sflag [#allocation6], %s162_s27 }
  0x19   : > { %s166_s6 = scalar_lea.vmem [#allocation5], %s2086_s28  ;;  %p2485_p1 = pneg %p2463_p13 }
  0x1a   : > { %s172_s7 = sshll.u32 %s166_s6, 4  ;;  %s2477_s7 = int_to_ptr.vmem [resolvable:$true] %s172_s7 }
  0x1e   : > { %s2475_s5 = scalar_lea.hbm %s3692_s1, %s3683_s29  ;;  %s2224_s19 = scalar_lea.hbm %s3692_s1, 40960 }
  0x1f   : > { %s2219_s9 = scalar_lea.hbm %s2475_s5, 20480  ;;  %p2225_p4 = scmp.lt.s32.totalorder %s2475_s5, %s3692_s1 }
  0x20   : > { %p2220_p0 = scmp.ne.s32.totalorder %s2475_s5, %s2219_s9  ;;  %p2226_p5 = scmp.lt.s32.totalorder %s2224_s19, %s2219_s9 }
  0x22   : > { %p2222_p2 = pnand %p2485_p1, %p2220_p0  ;;  %p2227_p7 = por %p2226_p5, %p2225_p4 }
  0x24   : > { %p2223_p3 = pneg %p2222_p2 }
  0x26   : > { %p2228_p8 = pnand %p2227_p7, %p2223_p3 }
  0x28   : > { %2231 = shalt.err (!%p2228_p8)
}
  0x29   : > { %s2232_s27 = scalar_lea.vmem %s2477_s7, 20480  ;;  %s2373_s30 = smov [#allocation5]  }
  0x2a   : > { %p2233_p10 = scmp.ne.s32.totalorder %s2477_s7, %s2232_s27  ;;  %s2237_s4 = sshll.u32 %s2373_s30, 4  ;;  %s2238_s4 = int_to_ptr.vmem [resolvable:$false] %s2237_s4 }
  0x2b   : > { %s2239_s6 = scalar_lea.vmem %s2238_s4, 40960  ;;  %p2240_p9 = scmp.lt.s32.totalorder %s2477_s7, %s2238_s4 }
  0x2c   : > { %p2235_p0 = pnand %p2233_p10, %p2485_p1  ;;  %p2241_p12 = scmp.lt.s32.totalorder %s2239_s6, %s2232_s27 }
  0x2e   : > { %p2236_p2 = pneg %p2235_p0  ;;  %p2242_p11 = por %p2241_p12, %p2240_p9 }
  0x30   : > { %p2243_p6 = pnand %p2242_p11, %p2236_p2 }
  0x32   : > { %2246 = shalt.err (!%p2243_p6)
}
  0x33   : > { %s3684_s9 = smov 256   ;;  %s3685_s11 = smov 128  }
  0x34   : > { %s3686_s17 = smov 8   ;;  %p2047_p6 = scmp.ge.s32.totalorder %s2371_s15, 1 }
  0x35   : > { %2136 = dma.hbm_to_vmem [thread:$0]  (!%p2463_p13), %s2475_s5, 20480, %s2477_s7, %s2479_s8, %s3684_s9, %s3685_s11, %s3686_s17  }
  0x36   : > { %p200_p9 = scmp.lt.s32.totalorder %s2371_s15, 3  ;;  %s2043_s19 = sshll.u32 %s2461_s25, 2 }
  0x37   : > { %s2044_s20 = sshll.u32 %s2371_s15, 6  ;;  %s148_s6 = scalar_lea.vmem [#allocation2], %s2043_s19 }
  0x38   : > { %p2515_p11 = pnand %p2047_p6, %p200_p9  ;;  %s2522_s4 = scalar_lea.hbm %s3677_s0, %s2044_s20 }
  0x39   : > { %s155_s29 = sshll.u32 %s148_s6, 4  ;;  %s2087_s5 = smul.u32 72, %s2461_s25  ;;  %s156_s29 = int_to_ptr.vmem [resolvable:$true] %s155_s29 }
  0x3a   : > { %s3694_s28 = scalar_select %p2515_p11, 1, 0 }
  0x3b   : > { %s145_s7 = scalar_lea.sflag [#allocation3], %s2461_s25  ;;  %s2247_s9 = scalar_lea.hbm %s2522_s4, 64 }
  0x3c   : > { %p2248_p12 = scmp.ne.s32.totalorder %s2522_s4, %s2247_s9  ;;  %s2252_s1 = scalar_lea.hbm %s3677_s0, 128 }
  0x3d   : > { %p2253_p5 = scmp.lt.s32.totalorder %s2522_s4, %s3677_s0  ;;  %p2254_p7 = scmp.lt.s32.totalorder %s2252_s1, %s2247_s9 }
  0x3e   : > { %p2250_p3 = pnand %p2248_p12, %p2485_p1 }
  0x3f   : > { %p2255_p8 = por %p2254_p7, %p2253_p5 }
  0x40   : > { %p2251_p4 = pneg %p2250_p3 }
  0x42   : > { %p2256_p10 = pnand %p2255_p8, %p2251_p4 }
  0x44   : > { %2259 = shalt.err (!%p2256_p10)
}
  0x45   : > { %s2260_s19 = scalar_lea.vmem %s156_s29, 64  ;;  %s2377_s25 = smov [#allocation2]  }
  0x46   : > { %p2261_p0 = scmp.ne.s32.totalorder %s156_s29, %s2260_s19  ;;  %s2265_s30 = sshll.u32 %s2377_s25, 4  ;;  %s2266_s30 = int_to_ptr.vmem [resolvable:$false] %s2265_s30 }
  0x47   : > { %s2267_s6 = scalar_lea.vmem %s2266_s30, 128  ;;  %p2268_p9 = scmp.lt.s32.totalorder %s156_s29, %s2266_s30 }
  0x48   : > { %p2263_p2 = pnand %p2261_p0, %p2485_p1  ;;  %p2269_p12 = scmp.lt.s32.totalorder %s2267_s6, %s2260_s19 }
  0x4a   : > { %p2264_p6 = pneg %p2263_p2  ;;  %p2270_p3 = por %p2269_p12, %p2268_p9 }
  0x4c   : > { %p2271_p11 = pnand %p2270_p3, %p2264_p6 }
  0x4e   : > { %2274 = shalt.err (!%p2271_p11)
}
  0x4f   : > { %2133 = dma.hbm_to_vmem [thread:$0]  (!%p2463_p13), %s2522_s4, 64, %s156_s29, %s145_s7  }
  0x50   : > { %s3695_s1 = sshll.u32 %s2371_s15, 7  ;;  %s186_s27 = scalar_lea.vmem [#allocation7], %s2087_s5 }
  0x51   : > { %s2547_s17 = scalar_lea.hbm %s3679_s2, %s3695_s1  ;;  %s192_s20 = sshll.u32 %s186_s27, 4  ;;  %s193_s20 = int_to_ptr.vmem [resolvable:$true] %s192_s20 }
  0x52   : > { %s2275_s19 = scalar_lea.hbm %s2547_s17, 1152  ;;  %s2280_s29 = scalar_lea.hbm %s3679_s2, 2304 }
  0x53   : > { %p2276_p11 = scmp.ne.s32.totalorder %s2547_s17, %s2275_s19  ;;  %p2281_p7 = scmp.lt.s32.totalorder %s2547_s17, %s3679_s2 }
  0x54   : > { %p2282_p8 = scmp.lt.s32.totalorder %s2280_s29, %s2275_s19 }
  0x55   : > { %p2278_p4 = pnand %p2276_p11, %p2485_p1 }
  0x56   : > { %p2283_p10 = por %p2282_p8, %p2281_p7 }
  0x57   : > { %p2279_p5 = pneg %p2278_p4 }
  0x59   : > { %p2284_p0 = pnand %p2283_p10, %p2279_p5 }
  0x5b   : > { %2287 = shalt.err (!%p2284_p0)
}
  0x5c   : > { %s2288_s5 = scalar_lea.vmem %s193_s20, 1152  ;;  %s2378_s6 = smov [#allocation7]  }
  0x5d   : > { %p2289_p2 = scmp.ne.s32.totalorder %s193_s20, %s2288_s5  ;;  %s2293_s1 = sshll.u32 %s2378_s6, 4  ;;  %s2294_s1 = int_to_ptr.vmem [resolvable:$false] %s2293_s1 }
  0x5e   : > { %s2295_s9 = scalar_lea.vmem %s2294_s1, 2304  ;;  %p2296_p12 = scmp.lt.s32.totalorder %s193_s20, %s2294_s1 }
  0x5f   : > { %p2291_p6 = pnand %p2289_p2, %p2485_p1  ;;  %p2297_p3 = scmp.lt.s32.totalorder %s2295_s9, %s2288_s5 }
  0x61   : > { %p2292_p9 = pneg %p2291_p6  ;;  %p2298_p11 = por %p2297_p3, %p2296_p12 }
  0x63   : > { %p2299_p4 = pnand %p2298_p11, %p2292_p9 }
  0x65   : > { %2302 = shalt.err (!%p2299_p4)
}
  0x66   : > { %s3696_s11 = smov 8   ;;  %s3697_s27 = smov 128  }
  0x67   : > { %s3698_s19 = smov 256   ;;  %p3699_p1 = scmp.ne.s32.totalorder %s3694_s28, 0 }
  0x68   : > { %2139 = dma.hbm_to_vmem [thread:$0]  (!%p2463_p13), %s2547_s17, 1152, %s193_s20, %s2479_s8, %s3698_s19, %s3697_s27, %s3696_s11  }
  0x69   : > { %204 = sbr.rel (%p3699_p1) target bundleno = 490 (0x1ea), region = 32  ;;  %s2572_s10 = sand.u32 (!%p3699_p1), 1, %s2363_s13  }
  0x6a   : > { %s2048_s25 = sshll.u32 (!%p3699_p1), %s2572_s10, 2  ;;  %s207_s30 = scalar_lea.sflag (!%p3699_p1), [#allocation3], %s2572_s10 }
  0x6b   : > { %s210_s26 = scalar_lea.vmem (!%p3699_p1), [#allocation2], %s2048_s25  ;;  %p3700_p5 = scmp.ne.s32.totalorder (!%p3699_p1), %s3688_s22, 0 }
  0x6e   : > { %2346 = dma.done.wait (%p3700_p5), %s207_s30, 64  }
  0x6f   : > { %2348 = vsyncadd (%p3700_p5), %s207_s30, 4294967232  ;;  %s215_s8 = sand.u32 1, %s2427_s16   ;;  %s2088_s28 = smul.u32 1280, %s2572_s10 }
  0x70   : > { %s216_s17 = scalar_lea.sflag [#allocation6], %s215_s8 }
  0x71   : > { %s2584_s20 = scalar_lea.vmem [#allocation5], %s2088_s28 }
  0x72   : > { %2350 = dma.done.wait (%p3700_p5), %s216_s17, 21632  }
  0x73   : > { %2352 = vsyncadd (%p3700_p5), %s216_s17, 4294945664  ;;  %v266_v0 = vlaneseq  ;;  %v261_v6 = vld [vmem:[%s210_s26] sm:$0xf]  ;;  %v262_v7 = vld [vmem:[%s2584_s20] sm:$0xff]  ;;  %s2089_s22 = smul.u32 72, %s2572_s10  ;;  %s2083_s4 = sshll.u32 %s2427_s16, 6 }
  0x74   : > { %v263_v8 = vld [vmem:[%s2584_s20 + $0x8] sm:$0xff]  ;;  %v264_v9 = vld [vmem:[%s2584_s20 + $0x10] sm:$0xff]  ;;  %v274_v11 = vld [vmem:[%s2584_s20 + $0x20] sm:$0xff]  ;;  %s260_s7 = scalar_lea.vmem [#allocation8], %s2048_s25  ;;  %s1925_s9 = scalar_lea.hbm %s3680_s3, %s2083_s4 }
  0x75   : > { %v2590_v1 = vshrl.u32 %v266_v0, 7  ;;  %v275_v14 = vld [vmem:[%s2584_s20 + $0x28] sm:$0xff]  ;;  %v276_v15 = vld [vmem:[%s2584_s20 + $0x30] sm:$0xff]  ;;  %v290_v19 = vld [vmem:[%s2584_s20 + $0x40] sm:$0xff]  ;;  %s2624_s29 = scalar_lea.vmem [#allocation7], %s2089_s22  ;;  %s1927_s5 = sshll.u32 %s260_s7, 4  ;;  %s1928_s5 = int_to_ptr.vmem [resolvable:$true] %s1927_s5 }
  0x76   : > { %v291_v20 = vld [vmem:[%s2584_s20 + $0x48] sm:$0xff]  ;;  %v292_v21 = vld [vmem:[%s2584_s20 + $0x50] sm:$0xff]  ;;  %v306_v26 = vld [vmem:[%s2584_s20 + $0x60] sm:$0xff]  ;;  %s1914_s11 = scalar_lea.sflag [#allocation4], %s2572_s10  ;;  %s2303_s27 = scalar_lea.vmem %s1928_s5, 64 }
  0x77   : > { %v2593_v2 = vsub.s32 0, %v2590_v1  ;;  %v2596_v3 = vsub.s32 1, %v2590_v1  ;;  %v2599_v4 = vsub.s32 2, %v2590_v1  ;;  %v2602_v5 = vsub.s32 3, %v2590_v1  ;;  %v307_v27 = vld [vmem:[%s2584_s20 + $0x68] sm:$0xff]  ;;  %v308_v31 = vld [vmem:[%s2584_s20 + $0x70] sm:$0xff]  ;;  %p2304_p13 = scmp.ne.s32.totalorder %s1928_s5, %s2303_s27 }
  0x78   : > { %v265_v32 = vld [vmem:[%s2584_s20 + $0x18] sm:$0xff]  ;;  %v322_v49 = vld [vmem:[%s2624_s29] sm:$0xff]  ;;  %v323_v50 = vld [vmem:[%s2624_s29 + $0x8] sm:$0xff]  ;;  %p3717_p7 = scmp.ne.s32.totalorder %s3689_s23, 0  ;;  %s2385_s19 = smov [#allocation8]  }
  0x79   : > { %v269_v10 = vrot.slane %v261_v6, %v2593_v2  ;;  %v281_v12 = vrot.slane %v261_v6, %v2596_v3  ;;  %v297_v13 = vrot.slane %v261_v6, %v2599_v4  ;;  %v313_v22 = vrot.slane %v261_v6, %v2602_v5  ;;  %v277_v33 = vld [vmem:[%s2584_s20 + $0x38] sm:$0xff]  ;;  %s2307_s30 = sshll.u32 %s2385_s19, 4  ;;  %s2308_s30 = int_to_ptr.vmem [resolvable:$false] %s2307_s30 }
  0x7a   : > { %v293_v45 = vld [vmem:[%s2584_s20 + $0x58] sm:$0xff]  ;;  %p2305_p8 = pnand %p2304_p13, %p3717_p7  ;;  %s2309_s16 = scalar_lea.vmem %s2308_s30, 128 }
  0x7b   : > { %v270_v16 = vmul.f32 %v269_v10, %v262_v7  ;;  %v271_v17 = vmul.f32 %v269_v10, %v263_v8  ;;  %v272_v18 = vmul.f32 %v269_v10, %v264_v9  ;;  %v282_v23 = vmul.f32 %v281_v12, %v274_v11  ;;  %v324_v51 = vld [vmem:[%s2624_s29 + $0x10] sm:$0xff]  ;;  %p2310_p0 = scmp.lt.s32.totalorder %s1928_s5, %s2308_s30  ;;  %p2311_p2 = scmp.lt.s32.totalorder %s2309_s16, %s2303_s27 }
  0x7c   : > { %v283_v24 = vmul.f32 %v281_v12, %v275_v14  ;;  %v284_v25 = vmul.f32 %v281_v12, %v276_v15  ;;  %v298_v28 = vmul.f32 %v297_v13, %v290_v19  ;;  %v299_v29 = vmul.f32 %v297_v13, %v291_v20  ;;  %v309_v57 = vld [vmem:[%s2584_s20 + $0x78] sm:$0xff]  ;;  %p2306_p10 = pneg %p2305_p8 }
  0x7d   : > { %v300_v30 = vmul.f32 %v297_v13, %v292_v21  ;;  %v286_v34 = vadd.f32 %v282_v23, %v270_v16  ;;  %v314_v37 = vmul.f32 %v313_v22, %v306_v26  ;;  %v315_v38 = vmul.f32 %v313_v22, %v307_v27  ;;  %p2312_p6 = por %p2311_p2, %p2310_p0 }
  0x7e   : > { %v287_v35 = vadd.f32 %v283_v24, %v271_v17  ;;  %v288_v36 = vadd.f32 %v284_v25, %v272_v18  ;;  %v316_v39 = vmul.f32 %v313_v22, %v308_v31  ;;  %v273_v43 = vmul.f32 %v269_v10, %v265_v32 }
  0x7f   : > { %v302_v40 = vadd.f32 %v298_v28, %v286_v34  ;;  %v285_v44 = vmul.f32 %v281_v12, %v277_v33  ;;  %v301_v56 = vmul.f32 %v297_v13, %v293_v45  ;;  %v317_v0 = vmul.f32 %v313_v22, %v309_v57  ;;  %p2313_p9 = pnand %p2312_p6, %p2306_p10 }
  0x80   : > { %v303_v41 = vadd.f32 %v299_v29, %v287_v35  ;;  %v304_v42 = vadd.f32 %v300_v30, %v288_v36  ;;  %v2379_v34 = vmov 683565275   ;;  %v2380_v36 = vmov 2475754826  }
  0x81   : > { %v318_v46 = vadd.f32 %v314_v37, %v302_v40  ;;  %v289_v55 = vadd.f32 %v285_v44, %v273_v43  ;;  %v2382_v40 = vmov 2102212464  }
  0x82   : > { %v319_v47 = vadd.f32 %v315_v38, %v303_v41  ;;  %v320_v48 = vadd.f32 %v316_v39, %v304_v42  ;;  %v2381_v38 = vmov 2131351028   ;;  %v2383_v42 = vmov 920167782  }
  0x83   : > { %v326_v52 = vmul.f32 30.0, %v318_v46  ;;  %v305_v63 = vadd.f32 %v301_v56, %v289_v55 }
  0x84   : > { %v327_v53 = vmul.f32 30.0, %v319_v47  ;;  %v328_v54 = vmul.f32 30.0, %v320_v48 }
  0x85   : > { %v2630_v58 = vadd.f32 %v326_v52, %v322_v49  ;;  %v321_v14 = vadd.f32 %v317_v0, %v305_v63 }
  0x86   : > { %v2632_v59 = vadd.f32 %v327_v53, %v323_v50  ;;  %v2634_v60 = vadd.f32 %v328_v54, %v324_v51  ;;  %v2384_v50 = vmov 1326507024  }
  0x87   : > { %v334_v61 = vand.u32 2147483647, %v2630_v58  ;;  %v337_v62 = vand.u32 2139095040, %v2630_v58  ;;  %v2646_v23 = vmul.f32 30.0, %v321_v14  ;;  %vm336_vm12 = vcmp.lt.s32.totalorder %v2630_v58, 0 }
  0x88   : > { %v438_v6 = vand.u32 2147483647, %v2632_v59  ;;  %v441_v7 = vand.u32 2139095040, %v2632_v59  ;;  %v545_v12 = vand.u32 2139095040, %v2634_v60  ;;  %v542_v21 = vand.u32 2147483647, %v2634_v60 }
  0x89   : > { %v338_v8 = vshrl.u32 %v337_v62, 23  ;;  %v341_v9 = vand.u32 8388607, %v334_v61  ;;  %vm2753_vm14 = vcmp.le.f32.partialorder %v334_v61, 0.7853982 }
  0x8a   : > { %v442_v10 = vshrl.u32 %v441_v7, 23  ;;  %v445_v11 = vand.u32 8388607, %v438_v6  ;;  %v546_v16 = vshrl.u32 %v545_v12, 23  ;;  %v2654_v31 = vand.u32 8388607, %v542_v21 }
  0x8b   : > { %v2050_v13 = vadd.s32 4294967169, %v338_v8  ;;  %v342_v17 = vor.u32 8388608, %v341_v9 }
  0x8c   : > { %v2054_v15 = vadd.s32 4294967169, %v442_v10  ;;  %v446_v19 = vor.u32 8388608, %v445_v11  ;;  %v2058_v22 = vadd.s32 4294967169, %v546_v16 }
  0x8d   : > { %v344_v18 = vadd.s32 1, %v2050_v13  ;;  %v2648_v27 = vshll.u32 %v342_v17, 8 }
  0x8e   : > { %v448_v20 = vadd.s32 1, %v2054_v15  ;;  %v2650_v30 = vshll.u32 %v446_v19, 8  ;;  %v2656_v32 = vadd.s32 1, %v2058_v22 }
  0x8f   : > { %vm345_vm0 = vcmp.gt.s32.totalorder %v344_v18, 0 }
  0x90   : > { %v346_v24 = vsel %vm345_vm0, %v344_v18, 0  ;;  %vm449_vm1 = vcmp.gt.s32.totalorder %v448_v20, 0  ;;  %vm553_vm6 = vcmp.gt.s32.totalorder %v2656_v32, 0 }
  0x91   : > { %v347_v25 = vshrl.u32 %v346_v24, 5  ;;  %v348_v26 = vand.u32 31, %v346_v24  ;;  %v450_v28 = vsel %vm449_vm1, %v448_v20, 0 }
  0x92   : > { %v452_v29 = vand.u32 31, %v450_v28  ;;  %v2663_v44 = vshrl.u32 %v450_v28, 5 }
  0x93   : > { %v349_v33 = vsub.s32 32, %v348_v26  ;;  %v351_v35 = vshll.u32 %v2379_v34, %v348_v26  ;;  %v354_v37 = vshll.u32 %v2380_v36, %v348_v26  ;;  %v357_v39 = vshll.u32 %v2381_v38, %v348_v26 }
  0x94   : > { %v360_v41 = vshll.u32 %v2382_v40, %v348_v26  ;;  %v363_v43 = vshll.u32 %v2383_v42, %v348_v26  ;;  %vm366_vm2 = vcmp.lt.s32.totalorder %v347_v25, 1  ;;  %vm367_vm3 = vcmp.lt.s32.totalorder %v347_v25, 2 }
  0x95   : > { %v350_v45 = vshrl.u32 %v2379_v34, %v349_v33  ;;  %v352_v46 = vshrl.u32 %v2380_v36, %v349_v33  ;;  %v355_v47 = vshrl.u32 %v2381_v38, %v349_v33  ;;  %v358_v48 = vshrl.u32 %v2382_v40, %v349_v33 }
  0x96   : > { %v361_v49 = vshrl.u32 %v2383_v42, %v349_v33  ;;  %v364_v51 = vshrl.u32 %v2384_v50, %v349_v33  ;;  %vm369_vm4 = vcmp.lt.s32.totalorder %v347_v25, 4  ;;  %v453_v55 = vsub.s32 32, %v452_v29 }
  0x97   : > { %v353_v52 = vor.u32 %v352_v46, %v351_v35  ;;  %v356_v53 = vor.u32 %v355_v47, %v354_v37  ;;  %v359_v54 = vor.u32 %v358_v48, %v357_v39  ;;  %vm368_vm5 = vcmp.lt.s32.totalorder %v347_v25, 3 }
  0x98   : > { %v362_v56 = vor.u32 %v361_v49, %v360_v41  ;;  %v365_v57 = vor.u32 %v364_v51, %v363_v43  ;;  %v455_v62 = vshll.u32 %v2379_v34, %v452_v29  ;;  %v458_v12 = vshll.u32 %v2380_v36, %v452_v29 }
  0x99   : > { %v370_v63 = vsel %vm366_vm2, %v350_v45, %v353_v52  ;;  %v371_v0 = vsel %vm369_vm4, %v359_v54, 2102212464  ;;  %v374_v7 = vsel %vm366_vm2, %v353_v52, %v356_v53  ;;  %v378_v8 = vsel %vm366_vm2, %v356_v53, %v359_v54 }
  0x9a   : > { %v372_v9 = vsel %vm368_vm5, %v356_v53, %v371_v0  ;;  %v375_v10 = vsel %vm369_vm4, %v362_v56, 920167782  ;;  %v379_v11 = vsel %vm369_vm4, %v365_v57, 1326507024  ;;  %v454_v15 = vshrl.u32 %v2379_v34, %v453_v55 }
  0x9b   : > { %v376_v13 = vsel %vm368_vm5, %v359_v54, %v375_v10  ;;  %v380_v14 = vsel %vm368_vm5, %v362_v56, %v379_v11  ;;  %v456_v16 = vshrl.u32 %v2380_v36, %v453_v55  ;;  %v373_v17 = vsel %vm367_vm3, %v370_v63, %v372_v9  ;;  %v325_v56 = vld [vmem:[%s2624_s29 + $0x18] sm:$0xff] }
  0x9c   : > { %v377_v18 = vsel %vm367_vm3, %v374_v7, %v376_v13  ;;  %v381_v19 = vsel %vm367_vm3, %v378_v8, %v380_v14  ;;  %v459_v20 = vshrl.u32 %v2381_v38, %v453_v55  ;;  %v461_v37 = vshll.u32 %v2381_v38, %v452_v29 }
  0x9d   : > { %v2684_v22 = vmul.u32.u64.low %v2648_v27, %v381_v19  ;;  %v2685_v24 = vmul.u32.u64.high %v2648_v27, %v381_v19, %v2684_v22  ;;  %v2688_v26 = vmul.u32.u64.low %v2648_v27, %v377_v18  ;;  %v2689_v28 = vmul.u32.u64.high %v2648_v27, %v377_v18, %v2688_v26 }
  0x9e   : > { %v457_v33 = vor.u32 %v456_v16, %v455_v62  ;;  %v460_v35 = vor.u32 %v459_v20, %v458_v12  ;;  %v462_v39 = vshrl.u32 %v2382_v40, %v453_v55  ;;  %v464_v25 = vshll.u32 %v2382_v40, %v452_v29 }
  0x9f   : > { %v465_v41 = vshrl.u32 %v2383_v42, %v453_v55  ;;  %v467_v43 = vshll.u32 %v2383_v42, %v452_v29  ;;  %v468_v45 = vshrl.u32 %v2384_v50, %v453_v55  ;;  %v389_v46 = vmul.u32 %v2648_v27, %v373_v17 }
  0xa0   : > { %v463_v47 = vor.u32 %v462_v39, %v461_v37  ;;  %vm470_vm7 = vcmp.lt.s32.totalorder %v2663_v44, 1  ;;  %vm471_vm8 = vcmp.lt.s32.totalorder %v2663_v44, 2  ;;  %vm391_vm9 = vc.u32 %v2685_v24, %v2688_v26 }
  0xa1   : > { %v392_v48 = vadd.s32 1, %v2689_v28  ;;  %v466_v49 = vor.u32 %v465_v41, %v464_v25  ;;  %vm472_vm10 = vcmp.lt.s32.totalorder %v2663_v44, 3  ;;  %v469_v51 = vor.u32 %v468_v45, %v467_v43 }
  0xa2   : > { %vm473_vm11 = vcmp.lt.s32.totalorder %v2663_v44, 4  ;;  %v474_v29 = vsel %vm470_vm7, %v454_v15, %v457_v33  ;;  %v478_v52 = vsel %vm470_vm7, %v457_v33, %v460_v35  ;;  %v482_v55 = vsel %vm470_vm7, %v460_v35, %v463_v47 }
  0xa3   : > { %v393_v27 = vsel %vm391_vm9, %v392_v48, %v2689_v28  ;;  %v475_v53 = vsel %vm473_vm11, %v463_v47, 2102212464  ;;  %v479_v54 = vsel %vm473_vm11, %v466_v49, 920167782  ;;  %v483_v0 = vsel %vm473_vm11, %v469_v51, 1326507024 }
  0xa4   : > { %v394_v57 = vadd.s32 %v393_v27, %v389_v46  ;;  %v476_v62 = vsel %vm472_vm10, %v460_v35, %v475_v53  ;;  %v480_v63 = vsel %vm472_vm10, %v463_v47, %v479_v54  ;;  %v484_v9 = vsel %vm472_vm10, %v466_v49, %v483_v0 }
  0xa5   : > { %v477_v7 = vsel %vm471_vm8, %v474_v29, %v476_v62  ;;  %v481_v8 = vsel %vm471_vm8, %v478_v52, %v480_v63  ;;  %v554_v10 = vsel %vm553_vm6, %v2656_v32, 0  ;;  %v485_v12 = vsel %vm471_vm8, %v482_v55, %v484_v9 }
  0xa6   : > { %v395_v11 = vadd.s32 536870912, %v394_v57  ;;  %v2724_v13 = vmul.u32.u64.low %v2650_v30, %v481_v8  ;;  %v2725_v14 = vmul.u32.u64.high %v2650_v30, %v481_v8, %v2724_v13  ;;  %v2729_v15 = vadd.f32 %v2646_v23, %v325_v56 }
  0xa7   : > { %v2732_v16 = vmul.u32.u64.low %v2650_v30, %v485_v12  ;;  %v2733_v17 = vmul.u32.u64.high %v2650_v30, %v485_v12, %v2732_v16  ;;  %v550_v18 = vor.u32 8388608, %v2654_v31  ;;  %v556_v32 = vand.u32 31, %v554_v10 }
  0xa8   : > { %v396_v19 = vshrl.u32 %v395_v11, 30  ;;  %v493_v20 = vmul.u32 %v2650_v30, %v477_v7  ;;  %v2738_v44 = vsub.s32 4, %v2590_v1  ;;  %v2741_v22 = vsub.s32 5, %v2590_v1 }
  0xa9   : > { %v496_v28 = vadd.s32 1, %v2725_v14  ;;  %v557_v33 = vsub.s32 32, %v556_v32  ;;  %vm495_vm13 = vc.u32 %v2733_v17, %v2724_v13  ;;  %v2747_v31 = vshll.u32 %v550_v18, 8 }
  0xaa   : > { %v397_v23 = vshll.u32 %v396_v19, 30  ;;  %v646_v35 = vand.u32 2147483647, %v2729_v15  ;;  %v649_v30 = vand.u32 2139095040, %v2729_v15  ;;  %v420_v25 = vsub.s32 4, %v396_v19 }
  0xab   : > { %v497_v41 = vsel %vm495_vm13, %v496_v28, %v2725_v14  ;;  %v555_v43 = vshrl.u32 %v554_v10, 5  ;;  %v559_v46 = vshll.u32 %v2379_v34, %v556_v32  ;;  %v560_v47 = vshrl.u32 %v2380_v36, %v557_v33 }
  0xac   : > { %v2757_v39 = vsub.s32 %v394_v57, %v397_v23  ;;  %v498_v45 = vadd.s32 %v497_v41, %v493_v20  ;;  %v562_v48 = vshll.u32 %v2380_v36, %v556_v32  ;;  %v563_v61 = vshrl.u32 %v2381_v38, %v557_v33 }
  0xad   : > { %v565_v51 = vshll.u32 %v2381_v38, %v556_v32  ;;  %v566_v29 = vshrl.u32 %v2382_v40, %v557_v33  ;;  %v390_v52 = vadd.s32 %v2688_v26, %v2685_v24  ;;  %v568_v53 = vshll.u32 %v2382_v40, %v556_v32 }
  0xae   : > { %v400_v49 = vsub.s32 0, %v2757_v39  ;;  %v499_v27 = vadd.s32 536870912, %v498_v45  ;;  %v650_v54 = vshrl.u32 %v649_v30, 23  ;;  %v421_v56 = vsel %vm336_vm12, %v420_v25, %v396_v19 }
  0xaf   : > { %v569_v57 = vshrl.u32 %v2383_v42, %v557_v33  ;;  %vm577_vm15 = vcmp.lt.s32.totalorder %v555_v43, 4  ;;  %v558_v63 = vshrl.u32 %v2379_v34, %v557_v33  ;;  %v571_v0 = vshll.u32 %v2383_v42, %v556_v32 }
  0xb0   : > { %v2051_v55 = vmin.u32 %v400_v49, %v2757_v39  ;;  %v2774_v62 = vshrl.u32 %v499_v27, 30  ;;  %v572_v24 = vshrl.u32 %v2384_v50, %v557_v33  ;;  %v561_v7 = vor.u32 %v560_v47, %v559_v46 }
  0xb1   : > { %v564_v8 = vor.u32 %v563_v61, %v562_v48  ;;  %v567_v9 = vor.u32 %v566_v29, %v565_v51  ;;  %v570_v11 = vor.u32 %v569_v57, %v568_v53  ;;  %vm574_vm0 = vcmp.lt.s32.totalorder %v555_v43, 1 }
  0xb2   : > { %v402_v26 = vclz %v2051_v55  ;;  %v501_v10 = vshll.u32 %v2774_v62, 30  ;;  %vm576_vm1 = vcmp.lt.s32.totalorder %v555_v43, 3  ;;  %v573_v14 = vor.u32 %v572_v24, %v571_v0 }
  0xb3   : > { %v579_v16 = vsel %vm577_vm15, %v567_v9, 2102212464  ;;  %v2062_v18 = vadd.s32 4294967169, %v650_v54  ;;  %v423_v19 = vsel %vm2753_vm14, 0, %v421_v56  ;;  %vm575_vm2 = vcmp.lt.s32.totalorder %v555_v43, 2 }
  0xb4   : > { %v2052_v12 = vadd.s32 4294967294, %v402_v26  ;;  %v2783_v32 = vsub.s32 %v498_v45, %v501_v10  ;;  %v583_v20 = vsel %vm577_vm15, %v570_v11, 920167782  ;;  %v578_v23 = vsel %vm574_vm0, %v558_v63, %v561_v7 }
  0xb5   : > { %v582_v28 = vsel %vm574_vm0, %v561_v7, %v564_v8  ;;  %v584_v33 = vsel %vm576_vm1, %v567_v9, %v583_v20  ;;  %v580_v41 = vsel %vm576_vm1, %v564_v8, %v579_v16  ;;  %v586_v46 = vsel %vm574_vm0, %v564_v8, %v567_v9 }
  0xb6   : > { %vm2053_vm3 = vcmp.lt.s32.totalorder %v2052_v12, 0  ;;  %v504_v25 = vsub.s32 0, %v2783_v32  ;;  %v587_v49 = vsel %vm577_vm15, %v573_v14, 1326507024  ;;  %v585_v51 = vsel %vm575_vm2, %v582_v28, %v584_v33 }
  0xb7   : > { %v405_v30 = vsel %vm2053_vm3, 0, %v2052_v12  ;;  %v588_v29 = vsel %vm576_vm1, %v570_v11, %v587_v49  ;;  %v2799_v27 = vand.u32 8388607, %v646_v35  ;;  %v656_v56 = vadd.s32 1, %v2062_v18 }
  0xb8   : > { %v406_v47 = vsub.s32 32, %v405_v30  ;;  %v407_v45 = vshll.u32 %v2757_v39, %v405_v30  ;;  %v410_v48 = vsub.s32 4294967266, %v405_v30  ;;  %v2055_v61 = vmin.u32 %v504_v25, %v2783_v32 }
  0xb9   : > { %v589_v55 = vsel %vm575_vm2, %v586_v46, %v588_v29  ;;  %v427_v57 = vadd.s32 3, %v423_v19  ;;  %v581_v63 = vsel %vm575_vm2, %v578_v23, %v580_v41  ;;  %v2804_v0 = vsub.s32 6, %v2590_v1 }
  0xba   : > { %v408_v53 = vshrl.u32 %v390_v52, %v406_v47  ;;  %v411_v54 = vadd.s32 127, %v410_v48  ;;  %v506_v39 = vclz %v2055_v61  ;;  %vm657_vm4 = vcmp.gt.s32.totalorder %v656_v56, 0 }
  0xbb   : > { %v2807_v7 = vmul.u32.u64.low %v2747_v31, %v589_v55  ;;  %v2808_v8 = vmul.u32.u64.high %v2747_v31, %v589_v55, %v2807_v7  ;;  %v2811_v52 = vmul.u32.u64.low %v2747_v31, %v585_v51  ;;  %v2812_v10 = vmul.u32.u64.high %v2747_v31, %v585_v51, %v2811_v52 }
  0xbc   : > { %v409_v24 = vor.u32 %v408_v53, %v407_v45  ;;  %v412_v26 = vshll.u32 %v411_v54, 23  ;;  %v2056_v9 = vadd.s32 4294967294, %v506_v39  ;;  %v654_v43 = vor.u32 8388608, %v2799_v27  ;;  %v810_v27 = vld [vmem:[%s2584_s20 + $0x100] sm:$0xff] }
  0xbd   : > { %v658_v14 = vsel %vm657_vm4, %v656_v56, 0  ;;  %v2816_v16 = vand.u32 3, %v427_v57  ;;  %v494_v18 = vadd.s32 %v2724_v13, %v2733_v17  ;;  %v597_v28 = vmul.u32 %v2747_v31, %v581_v63 }
  0xbe   : > { %v413_v11 = vor.u32 4788187, %v412_v26  ;;  %v416_v12 = vcvt.s32.f32 %v409_v24  ;;  %vm2057_vm5 = vcmp.lt.s32.totalorder %v2056_v9, 0  ;;  %v660_v19 = vand.u32 31, %v658_v14 }
  0xbf   : > { %v509_v23 = vsel %vm2057_vm5, 0, %v2056_v9  ;;  %vm599_vm6 = vc.u32 %v2808_v8, %v2811_v52  ;;  %vm440_vm7 = vcmp.lt.s32.totalorder %v2632_v59, 0  ;;  %v600_v41 = vadd.s32 1, %v2812_v10 }
  0xc0   : > { %v414_v20 = vand.u32 2147483647, %v413_v11  ;;  %v510_v33 = vsub.s32 32, %v509_v23  ;;  %v511_v30 = vshll.u32 %v2783_v32, %v509_v23  ;;  %v514_v25 = vsub.s32 4294967266, %v509_v23 }
  0xc1   : > { %v524_v13 = vsub.s32 4, %v2774_v62  ;;  %v2827_v17 = vshrl.u32 %v658_v14, 5  ;;  %v661_v47 = vsub.s32 32, %v660_v19  ;;  %v601_v31 = vsel %vm599_vm6, %v600_v41, %v2812_v10 }
  0xc2   : > { %v417_v46 = vmul.f32 %v416_v12, %v414_v20  ;;  %v512_v45 = vshrl.u32 %v494_v18, %v510_v33  ;;  %v515_v48 = vadd.s32 127, %v514_v25  ;;  %v663_v49 = vshll.u32 %v2379_v34, %v660_v19 }
  0xc3   : > { %v602_v51 = vadd.s32 %v601_v31, %v597_v28  ;;  %v664_v29 = vshrl.u32 %v2380_v36, %v661_v47  ;;  %v666_v32 = vshll.u32 %v2380_v36, %v660_v19  ;;  %vm2835_vm8 = vcmp.le.f32.partialorder %v438_v6, 0.7853982 }
  0xc4   : > { %v418_v61 = vxor.u32 2147483648, %v417_v46  ;;  %v513_v53 = vor.u32 %v512_v45, %v511_v30  ;;  %v516_v54 = vshll.u32 %v515_v48, 23  ;;  %v667_v55 = vshrl.u32 %v2381_v38, %v661_v47 }
  0xc5   : > { %v669_v56 = vshll.u32 %v2381_v38, %v660_v19  ;;  %v603_v39 = vadd.s32 536870912, %v602_v51  ;;  %v670_v63 = vshrl.u32 %v2382_v40, %v661_v47  ;;  %v672_v24 = vshll.u32 %v2382_v40, %v660_v19 }
  0xc6   : > { %v419_v57 = vsel %vm336_vm12, %v418_v61, %v417_v46  ;;  %v517_v26 = vor.u32 4788187, %v516_v54  ;;  %v520_v7 = vcvt.s32.f32 %v513_v53  ;;  %v665_v9 = vor.u32 %v664_v29, %v663_v49 }
  0xc7   : > { %v422_v6 = vsel %vm2753_vm14, %v2630_v58, %v419_v57  ;;  %v604_v10 = vshrl.u32 %v603_v39, 30  ;;  %v668_v11 = vor.u32 %v667_v55, %v666_v32  ;;  %v673_v12 = vshrl.u32 %v2383_v42, %v661_v47 }
  0xc8   : > { %2187 = vcosq.f32 %v422_v6  ;;  %v518_v14 = vand.u32 2147483647, %v517_v26  ;;  %v675_v18 = vshll.u32 %v2383_v42, %v660_v19  ;;  %v676_v20 = vshrl.u32 %v2384_v50, %v661_v47 }
  0xc9   : > { %2189 = vsinq.f32 %v422_v6  ;;  %v525_v23 = vsel %vm440_vm7, %v524_v13, %v2774_v62  ;;  %v605_v37 = vshll.u32 %v604_v10, 30  ;;  %v674_v28 = vor.u32 %v673_v12, %v672_v24 }
  0xca   : > { %vm678_vm9 = vcmp.lt.s32.totalorder %v2827_v17, 1  ;;  %v521_v33 = vmul.f32 %v520_v7, %v518_v14  ;;  %v662_v30 = vshrl.u32 %v2379_v34, %v661_v47  ;;  %v671_v25 = vor.u32 %v670_v63, %v669_v56 }
  0xcb   : > { %v2856_v41 = vshll.u32 %v654_v43, 8  ;;  %v2858_v46 = vsub.s32 %v602_v51, %v605_v37  ;;  %v677_v45 = vor.u32 %v676_v20, %v675_v18  ;;  %vm680_vm10 = vcmp.lt.s32.totalorder %v2827_v17, 3 }
  0xcc   : > { %vm681_vm11 = vcmp.lt.s32.totalorder %v2827_v17, 4  ;;  %v522_v19 = vxor.u32 2147483648, %v521_v33  ;;  %vm679_vm12 = vcmp.lt.s32.totalorder %v2827_v17, 2  ;;  %v686_v13 = vsel %vm678_vm9, %v665_v9, %v668_v11 }
  0xcd   : > { %v683_v62 = vsel %vm681_vm11, %v671_v25, 2102212464  ;;  %v527_v43 = vsel %vm2835_vm8, 0, %v525_v23  ;;  %v608_v47 = vsub.s32 0, %v2858_v46  ;;  %v628_v48 = vsub.s32 4, %v604_v10 }
  0xce   : > { %v687_v31 = vsel %vm681_vm11, %v674_v28, 920167782  ;;  %v523_v49 = vsel %vm440_vm7, %v522_v19, %v521_v33  ;;  %v682_v61 = vsel %vm678_vm9, %v662_v30, %v665_v9  ;;  %v684_v51 = vsel %vm680_vm10, %v668_v11, %v683_v62 }
  0xcf   : > { %v688_v29 = vsel %vm680_vm10, %v671_v25, %v687_v31  ;;  %vm426_vm13 = vweird.f32 %v2630_v58  ;;  %v526_v32 = vsel %vm2835_vm8, %v2632_v59, %v523_v49  ;;  %v2059_v53 = vmin.u32 %v608_v47, %v2858_v46  ;;  %v750_v31 = vld [vmem:[%s2584_s20 + $0x80] sm:$0xff]  ;;  %v751_v49 = vld [vmem:[%s2584_s20 + $0x88] sm:$0xff]  ;;  %v752_v58 = vld [vmem:[%s2584_s20 + $0x90] sm:$0xff] }
  0xd0   : > { %v689_v54 = vsel %vm679_vm12, %v686_v13, %v688_v29  ;;  %v690_v55 = vsel %vm678_vm9, %v668_v11, %v671_v25  ;;  %2191 = vcosq.f32 %v526_v32  ;;  %v691_v56 = vsel %vm681_vm11, %v677_v45, 1326507024  ;;  %v753_v29 = vld [vmem:[%s2584_s20 + $0x98] sm:$0xff] }
  0xd1   : > { %v2892_v57 = vmul.u32.u64.low %v2856_v41, %v689_v54  ;;  %v2893_v39 = vmul.u32.u64.high %v2856_v41, %v689_v54, %v2892_v57  ;;  %2193 = vsinq.f32 %v526_v32  ;;  %vm2898_vm14 = vcmp.le.f32.partialorder %v542_v21, 0.7853982 }
  0xd2   : > { %vm544_vm15 = vcmp.lt.s32.totalorder %v2634_v60, 0  ;;  %v610_v63 = vclz %v2059_v53  ;;  %vm429_vm0 = vcmp.lt.s32.totalorder %v2816_v16, 2  ;;  %v531_v24 = vadd.s32 3, %v527_v43 }
  0xd3   : > { %v629_v6 = vsel %vm544_vm15, %v628_v48, %v604_v10  ;;  %v692_v26 = vsel %vm680_vm10, %v674_v28, %v691_v56  ;;  %vm430_vm1 = vcmp.eq.s32.totalorder %v2816_v16, 0  ;;  %v685_v21 = vsel %vm679_vm12, %v682_v61, %v684_v51  ;;  %v763_v56 = vld [vmem:[%s2584_s20 + $0xa8] sm:$0xff] }
  0xd4   : > { %v2060_v7 = vadd.s32 4294967294, %v610_v63  ;;  %v693_v9 = vsel %vm679_vm12, %v690_v55, %v692_v26  ;;  %vm433_vm2 = vcmp.eq.s32.totalorder %v2816_v16, 2  ;;  %v598_v12 = vadd.s32 %v2811_v52, %v2808_v8  ;;  %v762_v55 = vld [vmem:[%s2584_s20 + $0xa0] sm:$0xff] }
  0xd5   : > { %v2188_v11 = vpop.eup %2187  ;;  %v2917_v10 = vmul.u32.u64.low %v2856_v41, %v693_v9  ;;  %v2918_v14 = vmul.u32.u64.high %v2856_v41, %v693_v9, %v2917_v10  ;;  %v631_v23 = vsel %vm2898_vm14, 0, %v629_v6  ;;  %v704_v37 = vadd.s32 1, %v2893_v39 }
  0xd6   : > { %v2190_v18 = vpop.eup %2189  ;;  %v434_v20 = vxor.u32 2147483648, %v2188_v11  ;;  %vm2061_vm3 = vcmp.lt.s32.totalorder %v2060_v7, 0  ;;  %v2923_v28 = vand.u32 3, %v531_v24  ;;  %v701_v30 = vmul.u32 %v2856_v41, %v685_v21  ;;  %v764_v21 = vld [vmem:[%s2584_s20 + $0xb0] sm:$0xff] }
  0xd7   : > { %v431_v17 = vxor.u32 2147483648, %v2190_v18  ;;  %v613_v33 = vsel %vm2061_vm3, 0, %v2060_v7  ;;  %v635_v62 = vadd.s32 3, %v631_v23  ;;  %vm703_vm4 = vc.u32 %v2918_v14, %v2892_v57 }
  0xd8   : > { %v435_v25 = vsel %vm433_vm2, %v434_v20, %v2190_v18  ;;  %v614_v8 = vsub.s32 32, %v613_v33  ;;  %v615_v52 = vshll.u32 %v2858_v46, %v613_v33  ;;  %v618_v45 = vsub.s32 4294967266, %v613_v33  ;;  %v765_v20 = vld [vmem:[%s2584_s20 + $0xb8] sm:$0xff] }
  0xd9   : > { %v432_v19 = vsel %vm430_vm1, %v2188_v11, %v431_v17  ;;  %v2932_v13 = vsub.s32 7, %v2590_v1  ;;  %vm648_vm5 = vcmp.lt.s32.totalorder %v2729_v15, 0  ;;  %v705_v47 = vsel %vm703_vm4, %v704_v37, %v2893_v39 }
  0xda   : > { %v436_v41 = vsel %vm429_vm0, %v432_v19, %v435_v25  ;;  %v616_v43 = vshrl.u32 %v598_v12, %v614_v8  ;;  %v619_v46 = vadd.s32 127, %v618_v45  ;;  %vm533_vm6 = vcmp.lt.s32.totalorder %v2923_v28, 2 }
  0xdb   : > { %v2940_v48 = vsel %vm426_vm13, nan, %v436_v41  ;;  %vm534_vm7 = vcmp.eq.s32.totalorder %v2923_v28, 0  ;;  %vm2946_vm8 = vcmp.le.f32.partialorder %v646_v35, 0.7853982  ;;  %v706_v16 = vadd.s32 %v705_v47, %v701_v30  ;;  %v778_v41 = vld [vmem:[%s2584_s20 + $0xc0] sm:$0xff] }
  0xdc   : > { %v617_v61 = vor.u32 %v616_v43, %v615_v52  ;;  %v620_v51 = vshll.u32 %v619_v46, 23  ;;  %v757_v32 = vrot.slane %v2940_v48, %v2593_v2  ;;  %v769_v53 = vrot.slane %v2940_v48, %v2596_v3 }
  0xdd   : > { %vm537_vm9 = vcmp.eq.s32.totalorder %v2923_v28, 2  ;;  %v2959_v35 = vand.u32 3, %v635_v62  ;;  %v707_v54 = vadd.s32 536870912, %v706_v16  ;;  %v785_v39 = vrot.slane %v2940_v48, %v2599_v4  ;;  %v2192_v63 = vpop.eup %2191 }
  0xde   : > { %vm530_vm10 = vweird.f32 %v2632_v59  ;;  %v621_v24 = vor.u32 4788187, %v620_v51  ;;  %v624_v6 = vcvt.s32.f32 %v617_v61  ;;  %v758_v26 = vmul.f32 %v757_v32, %v750_v31  ;;  %v2194_v9 = vpop.eup %2193  ;;  %v779_v61 = vld [vmem:[%s2584_s20 + $0xc8] sm:$0xff]  ;;  %v780_v51 = vld [vmem:[%s2584_s20 + $0xd0] sm:$0xff] }
  0xdf   : > { %v759_v7 = vmul.f32 %v757_v32, %v751_v49  ;;  %v538_v11 = vxor.u32 2147483648, %v2192_v63  ;;  %v708_v12 = vshrl.u32 %v707_v54, 30  ;;  %v760_v10 = vmul.f32 %v757_v32, %v752_v58  ;;  %v781_v58 = vld [vmem:[%s2584_s20 + $0xd8] sm:$0xff] }
  0xe0   : > { %v761_v18 = vmul.f32 %v757_v32, %v753_v29  ;;  %v535_v23 = vxor.u32 2147483648, %v2194_v9  ;;  %v622_v37 = vand.u32 2147483647, %v621_v24  ;;  %v770_v17 = vmul.f32 %v769_v53, %v762_v55 }
  0xe1   : > { %v771_v33 = vmul.f32 %v769_v53, %v763_v56  ;;  %v539_v30 = vsel %vm537_vm9, %v538_v11, %v2194_v9  ;;  %v709_v25 = vshll.u32 %v708_v12, 30  ;;  %v732_v8 = vsub.s32 4, %v708_v12  ;;  %v794_v11 = vld [vmem:[%s2584_s20 + $0xe0] sm:$0xff] }
  0xe2   : > { %v772_v52 = vmul.f32 %v769_v53, %v764_v21  ;;  %v536_v45 = vsel %vm534_vm7, %v2192_v63, %v535_v23  ;;  %v625_v19 = vmul.f32 %v624_v6, %v622_v37  ;;  %v773_v62 = vmul.f32 %v769_v53, %v765_v20  ;;  %v797_v37 = vld [vmem:[%s2584_s20 + $0xf8] sm:$0xff] }
  0xe3   : > { %v801_v43 = vrot.slane %v2940_v48, %v2602_v5  ;;  %v540_v46 = vsel %vm533_vm6, %v536_v45, %v539_v30  ;;  %v2977_v47 = vsub.s32 %v706_v16, %v709_v25  ;;  %v733_v31 = vsel %vm648_vm5, %v732_v8, %v708_v12  ;;  %v795_v12 = vld [vmem:[%s2584_s20 + $0xe8] sm:$0xff]  ;;  %v812_v30 = vld [vmem:[%s2584_s20 + $0x110] sm:$0xff] }
  0xe4   : > { %v774_v49 = vadd.f32 %v770_v17, %v758_v26  ;;  %v626_v29 = vxor.u32 2147483648, %v625_v19  ;;  %v735_v32 = vsel %vm2946_vm8, 0, %v733_v31  ;;  %v775_v53 = vadd.f32 %v771_v33, %v759_v7  ;;  %v811_v17 = vld [vmem:[%s2584_s20 + $0x108] sm:$0xff] }
  0xe5   : > { %v776_v54 = vadd.f32 %v772_v52, %v760_v10  ;;  %v712_v28 = vsub.s32 0, %v2977_v47  ;;  %v739_v16 = vadd.s32 3, %v735_v32  ;;  %v777_v55 = vadd.f32 %v773_v62, %v761_v18  ;;  %v796_v10 = vld [vmem:[%s2584_s20 + $0xf0] sm:$0xff] }
  0xe6   : > { %v786_v56 = vmul.f32 %v785_v39, %v778_v41  ;;  %v627_v63 = vsel %vm544_vm15, %v626_v29, %v625_v19  ;;  %v787_v24 = vmul.f32 %v785_v39, %v779_v61  ;;  %v788_v6 = vmul.f32 %v785_v39, %v780_v51  ;;  %v813_v19 = vld [vmem:[%s2584_s20 + $0x118] sm:$0xff] }
  0xe7   : > { %v789_v26 = vmul.f32 %v785_v39, %v781_v58  ;;  %v630_v21 = vsel %vm2898_vm14, %v2634_v60, %v627_v63  ;;  %v702_v7 = vadd.s32 %v2892_v57, %v2918_v14  ;;  %v2063_v9 = vmin.u32 %v712_v28, %v2977_v47  ;;  %v826_v58 = vld [vmem:[%s2584_s20 + $0x120] sm:$0xff]  ;;  %v829_v28 = vld [vmem:[%s2584_s20 + $0x138] sm:$0xff] }
  0xe8   : > { %v817_v18 = vrot.slane %v2940_v48, %v2738_v44  ;;  %2195 = vcosq.f32 %v630_v21  ;;  %v790_v20 = vadd.f32 %v786_v56, %v774_v49  ;;  %v791_v39 = vadd.f32 %v787_v24, %v775_v53  ;;  %v827_v53 = vld [vmem:[%s2584_s20 + $0x128] sm:$0xff] }
  0xe9   : > { %v792_v23 = vadd.f32 %v788_v6, %v776_v54  ;;  %v3005_v57 = vsel %vm530_vm10, nan, %v540_v46  ;;  %2197 = vsinq.f32 %v630_v21  ;;  %v714_v14 = vclz %v2063_v9  ;;  %v828_v54 = vld [vmem:[%s2584_s20 + $0x130] sm:$0xff] }
  0xea   : > { %v793_v33 = vadd.f32 %v789_v26, %v777_v55  ;;  %v3008_v25 = vand.u32 3, %v739_v16  ;;  %v802_v8 = vmul.f32 %v801_v43, %v794_v11  ;;  %v803_v52 = vmul.f32 %v801_v43, %v795_v12 }
  0xeb   : > { %v804_v45 = vmul.f32 %v801_v43, %v796_v10  ;;  %v2064_v62 = vadd.s32 4294967294, %v714_v14  ;;  %v805_v41 = vmul.f32 %v801_v43, %v797_v37  ;;  %v818_v31 = vmul.f32 %v817_v18, %v810_v27  ;;  %v844_v27 = vld [vmem:[%s2584_s20 + $0x150] sm:$0xff]  ;;  %v859_v14 = vld [vmem:[%s2584_s20 + $0x168] sm:$0xff] }
  0xec   : > { %v819_v59 = vmul.f32 %v817_v18, %v811_v17  ;;  %v806_v46 = vadd.f32 %v802_v8, %v790_v20  ;;  %v807_v49 = vadd.f32 %v803_v52, %v791_v39  ;;  %v820_v51 = vmul.f32 %v817_v18, %v812_v30  ;;  %v843_v20 = vld [vmem:[%s2584_s20 + $0x148] sm:$0xff]  ;;  %v858_v39 = vld [vmem:[%s2584_s20 + $0x160] sm:$0xff]  ;;  %v845_v17 = vld [vmem:[%s2584_s20 + $0x158] sm:$0xff] }
  0xed   : > { %v808_v61 = vadd.f32 %v804_v45, %v792_v23  ;;  %vm641_vm11 = vcmp.eq.s32.totalorder %v2959_v35, 2  ;;  %vm2065_vm12 = vcmp.lt.s32.totalorder %v2064_v62, 0  ;;  %v809_v29 = vadd.f32 %v805_v41, %v793_v33 }
  0xee   : > { %v821_v32 = vmul.f32 %v817_v18, %v813_v19  ;;  %v833_v16 = vrot.slane %v2940_v48, %v2741_v22  ;;  %vm638_vm13 = vcmp.eq.s32.totalorder %v2959_v35, 0  ;;  %v717_v43 = vsel %vm2065_vm12, 0, %v2064_v62  ;;  %v842_v18 = vld [vmem:[%s2584_s20 + $0x140] sm:$0xff] }
  0xef   : > { %v822_v55 = vadd.f32 %v818_v31, %v806_v46  ;;  %v823_v56 = vadd.f32 %v819_v59, %v807_v49  ;;  %v824_v63 = vadd.f32 %v820_v51, %v808_v61  ;;  %vm637_vm14 = vcmp.lt.s32.totalorder %v2959_v35, 2  ;;  %v861_v49 = vld [vmem:[%s2584_s20 + $0x178] sm:$0xff] }
  0xf0   : > { %v718_v24 = vsub.s32 32, %v717_v43  ;;  %v719_v6 = vshll.u32 %v2977_v47, %v717_v43  ;;  %v722_v26 = vsub.s32 4294967266, %v717_v43  ;;  %v825_v21 = vadd.f32 %v821_v32, %v809_v29 }
  0xf1   : > { %vm634_vm15 = vweird.f32 %v2634_v60  ;;  %v834_v9 = vmul.f32 %v833_v16, %v826_v58  ;;  %v835_v11 = vmul.f32 %v833_v16, %v827_v53  ;;  %v836_v12 = vmul.f32 %v833_v16, %v828_v54 }
  0xf2   : > { %v837_v10 = vmul.f32 %v833_v16, %v829_v28  ;;  %v720_v23 = vshrl.u32 %v702_v7, %v718_v24  ;;  %v723_v37 = vadd.s32 127, %v722_v26  ;;  %v849_v47 = vrot.slane %v2940_v48, %v2804_v0  ;;  %v860_v7 = vld [vmem:[%s2584_s20 + $0x170] sm:$0xff]  ;;  %v874_v26 = vld [vmem:[%s2584_s20 + $0x180] sm:$0xff] }
  0xf3   : > { %v865_v33 = vrot.slane %v2940_v48, %v2932_v13  ;;  %v838_v30 = vadd.f32 %v834_v9, %v822_v55  ;;  %v839_v8 = vadd.f32 %v835_v11, %v823_v56  ;;  %v840_v52 = vadd.f32 %v836_v12, %v824_v63  ;;  %v876_v9 = vld [vmem:[%s2584_s20 + $0x190] sm:$0xff] }
  0xf4   : > { %v841_v45 = vadd.f32 %v837_v10, %v825_v21  ;;  %v721_v19 = vor.u32 %v720_v23, %v719_v6  ;;  %v724_v62 = vshll.u32 %v723_v37, 23  ;;  %v850_v41 = vmul.f32 %v849_v47, %v842_v18  ;;  %v875_v21 = vld [vmem:[%s2584_s20 + $0x188] sm:$0xff]  ;;  %v877_v18 = vld [vmem:[%s2584_s20 + $0x198] sm:$0xff] }
  0xf5   : > { %v851_v31 = vmul.f32 %v849_v47, %v843_v20  ;;  %v852_v59 = vmul.f32 %v849_v47, %v844_v27  ;;  %v853_v46 = vmul.f32 %v849_v47, %v845_v17  ;;  %v866_v61 = vmul.f32 %v865_v33, %v858_v39  ;;  %v2196_v58 = vpop.eup %2195  ;;  %v890_v39 = vld [vmem:[%s2584_s20 + $0x1a0] sm:$0xff]  ;;  %v891_v17 = vld [vmem:[%s2584_s20 + $0x1a8] sm:$0xff] }
  0xf6   : > { %v867_v51 = vmul.f32 %v865_v33, %v859_v14  ;;  %v725_v29 = vor.u32 4788187, %v724_v62  ;;  %v728_v48 = vcvt.s32.f32 %v721_v19  ;;  %v854_v32 = vadd.f32 %v850_v41, %v838_v30  ;;  %v2198_v54 = vpop.eup %2197 }
  0xf7   : > { %v855_v53 = vadd.f32 %v851_v31, %v839_v8  ;;  %v642_v28 = vxor.u32 2147483648, %v2196_v58  ;;  %v856_v16 = vadd.f32 %v852_v59, %v840_v52  ;;  %v857_v43 = vadd.f32 %v853_v46, %v841_v45  ;;  %v892_v52 = vld [vmem:[%s2584_s20 + $0x1b0] sm:$0xff]  ;;  %v893_v45 = vld [vmem:[%s2584_s20 + $0x1b8] sm:$0xff] }
  0xf8   : > { %v868_v55 = vmul.f32 %v865_v33, %v860_v7  ;;  %v639_v56 = vxor.u32 2147483648, %v2198_v54  ;;  %v726_v63 = vand.u32 2147483647, %v725_v29  ;;  %v869_v24 = vmul.f32 %v865_v33, %v861_v49  ;;  %v906_v49 = vld [vmem:[%s2584_s20 + $0x1c0] sm:$0xff]  ;;  %v907_v29 = vld [vmem:[%s2584_s20 + $0x1c8] sm:$0xff] }
  0xf9   : > { %v870_v6 = vadd.f32 %v866_v61, %v854_v32  ;;  %v643_v11 = vsel %vm641_vm11, %v642_v28, %v2198_v54  ;;  %v871_v12 = vadd.f32 %v867_v51, %v855_v53  ;;  %v881_v20 = vrot.slane %v3005_v57, %v2593_v2  ;;  %v922_v32 = vld [vmem:[%s2584_s20 + $0x1e0] sm:$0xff] }
  0xfa   : > { %v872_v10 = vadd.f32 %v868_v55, %v856_v16  ;;  %v640_v23 = vsel %vm638_vm13, %v2196_v58, %v639_v56  ;;  %v729_v37 = vmul.f32 %v728_v48, %v726_v63  ;;  %v873_v27 = vadd.f32 %v869_v24, %v857_v43  ;;  %v908_v48 = vld [vmem:[%s2584_s20 + $0x1d0] sm:$0xff]  ;;  %v909_v16 = vld [vmem:[%s2584_s20 + $0x1d8] sm:$0xff]  ;;  %v923_v55 = vld [vmem:[%s2584_s20 + $0x1e8] sm:$0xff] }
  0xfb   : > { %v897_v47 = vrot.slane %v3005_v57, %v2596_v3  ;;  %v644_v14 = vsel %vm637_vm14, %v640_v23, %v643_v11  ;;  %v882_v33 = vmul.f32 %v881_v20, %v874_v26  ;;  %v883_v30 = vmul.f32 %v881_v20, %v875_v21  ;;  %v924_v56 = vld [vmem:[%s2584_s20 + $0x1f0] sm:$0xff] }
  0xfc   : > { %v884_v8 = vmul.f32 %v881_v20, %v876_v9  ;;  %v3054_v19 = vsel %vm634_vm15, nan, %v644_v14  ;;  %v730_v62 = vxor.u32 2147483648, %v729_v37  ;;  %v885_v41 = vmul.f32 %v881_v20, %v877_v18  ;;  %v938_v20 = vld [vmem:[%s2584_s20 + $0x200] sm:$0xff] }
  0xfd   : > { %v898_v31 = vmul.f32 %v897_v47, %v890_v39  ;;  %v886_v7 = vadd.f32 %v882_v33, %v870_v6  ;;  %v887_v59 = vadd.f32 %v883_v30, %v871_v12  ;;  %v899_v46 = vmul.f32 %v897_v47, %v891_v17  ;;  %v925_v6 = vld [vmem:[%s2584_s20 + $0x1f8] sm:$0xff]  ;;  %v939_v17 = vld [vmem:[%s2584_s20 + $0x208] sm:$0xff]  ;;  %v954_v14 = vld [vmem:[%s2584_s20 + $0x220] sm:$0xff] }
  0xfe   : > { %v888_v35 = vadd.f32 %v884_v8, %v872_v10  ;;  %v731_v61 = vsel %vm648_vm5, %v730_v62, %v729_v37  ;;  %v889_v51 = vadd.f32 %v885_v41, %v873_v27  ;;  %v900_v60 = vmul.f32 %v897_v47, %v892_v52  ;;  %v941_v30 = vld [vmem:[%s2584_s20 + $0x218] sm:$0xff]  ;;  %v955_v52 = vld [vmem:[%s2584_s20 + $0x228] sm:$0xff] }
  0xff   : > { %v901_v58 = vmul.f32 %v897_v47, %v893_v45  ;;  %v734_v53 = vsel %vm2946_vm8, %v2729_v15, %v731_v61  ;;  %v902_v54 = vadd.f32 %v898_v31, %v886_v7  ;;  %v903_v28 = vadd.f32 %v899_v46, %v887_v59  ;;  %v940_v47 = vld [vmem:[%s2584_s20 + $0x210] sm:$0xff] }
 0x100   : > { %v913_v43 = vrot.slane %v3005_v57, %v2599_v4  ;;  %2199 = vcosq.f32 %v734_v53  ;;  %v904_v63 = vadd.f32 %v900_v60, %v888_v35  ;;  %v929_v26 = vrot.slane %v3005_v57, %v2602_v5  ;;  %v956_v45 = vld [vmem:[%s2584_s20 + $0x230] sm:$0xff]  ;;  %v957_v35 = vld [vmem:[%s2584_s20 + $0x238] sm:$0xff] }
 0x101   : > { %v905_v24 = vadd.f32 %v901_v58, %v889_v51  ;;  %2201 = vsinq.f32 %v734_v53  ;;  %v945_v8 = vrot.slane %v3005_v57, %v2738_v44  ;;  %v961_v62 = vrot.slane %v3005_v57, %v2741_v22  ;;  %v970_v58 = vld [vmem:[%s2584_s20 + $0x240] sm:$0xff] }
 0x102   : > { %v914_v1 = vmul.f32 %v913_v43, %v906_v49  ;;  %v915_v21 = vmul.f32 %v913_v43, %v907_v29  ;;  %v916_v9 = vmul.f32 %v913_v43, %v908_v48  ;;  %v917_v11 = vmul.f32 %v913_v43, %v909_v16  ;;  %v971_v29 = vld [vmem:[%s2584_s20 + $0x248] sm:$0xff]  ;;  %v972_v48 = vld [vmem:[%s2584_s20 + $0x250] sm:$0xff] }
 0x103   : > { %v930_v12 = vmul.f32 %v929_v26, %v922_v32  ;;  %v931_v10 = vmul.f32 %v929_v26, %v923_v55  ;;  %v932_v18 = vmul.f32 %v929_v26, %v924_v56  ;;  %v933_v27 = vmul.f32 %v929_v26, %v925_v6  ;;  %v988_v6 = vld [vmem:[%s2584_s20 + $0x270] sm:$0xff] }
 0x104   : > { %v918_v39 = vadd.f32 %v914_v1, %v902_v54  ;;  %v919_v23 = vadd.f32 %v915_v21, %v903_v28  ;;  %v920_v37 = vadd.f32 %v916_v9, %v904_v63  ;;  %v921_v33 = vadd.f32 %v917_v11, %v905_v24  ;;  %v986_v63 = vld [vmem:[%s2584_s20 + $0x260] sm:$0xff]  ;;  %v987_v24 = vld [vmem:[%s2584_s20 + $0x268] sm:$0xff]  ;;  %v989_v11 = vld [vmem:[%s2584_s20 + $0x278] sm:$0xff] }
 0x105   : > { %v977_v41 = vrot.slane %v3005_v57, %v2804_v0  ;;  %vm745_vm0 = vcmp.eq.s32.totalorder %v3008_v25, 2  ;;  %v993_v46 = vrot.slane %v3005_v57, %v2932_v13  ;;  %vm742_vm1 = vcmp.eq.s32.totalorder %v3008_v25, 0  ;;  %v973_v57 = vld [vmem:[%s2584_s20 + $0x258] sm:$0xff] }
 0x106   : > { %v934_v31 = vadd.f32 %v930_v12, %v918_v39  ;;  %v935_v7 = vadd.f32 %v931_v10, %v919_v23  ;;  %v936_v59 = vadd.f32 %v932_v18, %v920_v37  ;;  %v937_v49 = vadd.f32 %v933_v27, %v921_v33 }
 0x107   : > { %v946_v61 = vmul.f32 %v945_v8, %v938_v20  ;;  %v947_v51 = vmul.f32 %v945_v8, %v939_v17  ;;  %v948_v60 = vmul.f32 %v945_v8, %v940_v47  ;;  %vm741_vm2 = vcmp.lt.s32.totalorder %v3008_v25, 2 }
 0x108   : > { %v949_v32 = vmul.f32 %v945_v8, %v941_v30  ;;  %v962_v53 = vmul.f32 %v961_v62, %v954_v14  ;;  %v963_v54 = vmul.f32 %v961_v62, %v955_v52  ;;  %v964_v28 = vmul.f32 %v961_v62, %v956_v45  ;;  %v1002_v30 = vld [vmem:[%s2584_s20 + $0x280] sm:$0xff]  ;;  %v1003_v8 = vld [vmem:[%s2584_s20 + $0x288] sm:$0xff] }
 0x109   : > { %vm738_vm3 = vweird.f32 %v2729_v15  ;;  %v950_v16 = vadd.f32 %v946_v61, %v934_v31  ;;  %v951_v43 = vadd.f32 %v947_v51, %v935_v7  ;;  %v952_v55 = vadd.f32 %v948_v60, %v936_v59  ;;  %v1005_v31 = vld [vmem:[%s2584_s20 + $0x298] sm:$0xff]  ;;  %v1018_v7 = vld [vmem:[%s2584_s20 + $0x2a0] sm:$0xff] }
 0x10a   : > { %v965_v56 = vmul.f32 %v961_v62, %v957_v35  ;;  %v953_v26 = vadd.f32 %v949_v32, %v937_v49  ;;  %v978_v1 = vmul.f32 %v977_v41, %v970_v58  ;;  %v979_v21 = vmul.f32 %v977_v41, %v971_v29  ;;  %v1004_v62 = vld [vmem:[%s2584_s20 + $0x290] sm:$0xff]  ;;  %v1019_v58 = vld [vmem:[%s2584_s20 + $0x2a8] sm:$0xff] }
 0x10b   : > { %v980_v9 = vmul.f32 %v977_v41, %v972_v48  ;;  %v966_v12 = vadd.f32 %v962_v53, %v950_v16  ;;  %v967_v10 = vadd.f32 %v963_v54, %v951_v43  ;;  %v968_v18 = vadd.f32 %v964_v28, %v952_v55  ;;  %v1020_v54 = vld [vmem:[%s2584_s20 + $0x2b0] sm:$0xff]  ;;  %v1021_v43 = vld [vmem:[%s2584_s20 + $0x2b8] sm:$0xff] }
 0x10c   : > { %v981_v20 = vmul.f32 %v977_v41, %v973_v57  ;;  %v969_v39 = vadd.f32 %v965_v56, %v953_v26  ;;  %v994_v23 = vmul.f32 %v993_v46, %v986_v63  ;;  %v995_v37 = vmul.f32 %v993_v46, %v987_v24  ;;  %v1034_v26 = vld [vmem:[%s2584_s20 + $0x2c0] sm:$0xff] }
 0x10d   : > { %v996_v27 = vmul.f32 %v993_v46, %v988_v6  ;;  %v982_v17 = vadd.f32 %v978_v1, %v966_v12  ;;  %v983_v47 = vadd.f32 %v979_v21, %v967_v10  ;;  %v984_v14 = vadd.f32 %v980_v9, %v968_v18  ;;  %v2200_v52 = vpop.eup %2199  ;;  %v1035_v1 = vld [vmem:[%s2584_s20 + $0x2c8] sm:$0xff]  ;;  %v1036_v21 = vld [vmem:[%s2584_s20 + $0x2d0] sm:$0xff]  ;;  %v1037_v18 = vld [vmem:[%s2584_s20 + $0x2d8] sm:$0xff] }
 0x10e   : > { %v997_v33 = vmul.f32 %v993_v46, %v989_v11  ;;  %v985_v45 = vadd.f32 %v981_v20, %v969_v39  ;;  %v1009_v41 = vrot.slane %v3054_v19, %v2593_v2  ;;  %v1025_v59 = vrot.slane %v3054_v19, %v2596_v3  ;;  %v2202_v46 = vpop.eup %2201 }
 0x10f   : > { %v1041_v35 = vrot.slane %v3054_v19, %v2599_v4  ;;  %v746_v49 = vxor.u32 2147483648, %v2200_v52  ;;  %v998_v61 = vadd.f32 %v994_v23, %v982_v17  ;;  %v999_v51 = vadd.f32 %v995_v37, %v983_v47 }
 0x110   : > { %v1000_v60 = vadd.f32 %v996_v27, %v984_v14  ;;  %v743_v29 = vxor.u32 2147483648, %v2202_v46  ;;  %v1001_v48 = vadd.f32 %v997_v33, %v985_v45  ;;  %v1010_v32 = vmul.f32 %v1009_v41, %v1002_v30  ;;  %v1050_v27 = vld [vmem:[%s2584_s20 + $0x2e0] sm:$0xff]  ;;  %v1051_v33 = vld [vmem:[%s2584_s20 + $0x2e8] sm:$0xff]  ;;  %v1052_v30 = vld [vmem:[%s2584_s20 + $0x2f0] sm:$0xff] }
 0x111   : > { %v1011_v53 = vmul.f32 %v1009_v41, %v1003_v8  ;;  %v747_v28 = vsel %vm745_vm0, %v746_v49, %v2202_v46  ;;  %v1012_v57 = vmul.f32 %v1009_v41, %v1004_v62  ;;  %v1013_v16 = vmul.f32 %v1009_v41, %v1005_v31  ;;  %v1053_v8 = vld [vmem:[%s2584_s20 + $0x2f8] sm:$0xff]  ;;  %v1066_v62 = vld [vmem:[%s2584_s20 + $0x300] sm:$0xff]  ;;  %v1067_v31 = vld [vmem:[%s2584_s20 + $0x308] sm:$0xff] }
 0x112   : > { %v1026_v55 = vmul.f32 %v1025_v59, %v1018_v7  ;;  %v744_v56 = vsel %vm742_vm1, %v2200_v52, %v743_v29  ;;  %v1014_v63 = vadd.f32 %v1010_v32, %v998_v61  ;;  %v1027_v6 = vmul.f32 %v1025_v59, %v1019_v58  ;;  %v1068_v41 = vld [vmem:[%s2584_s20 + $0x310] sm:$0xff]  ;;  %v1069_v61 = vld [vmem:[%s2584_s20 + $0x318] sm:$0xff]  ;;  %v1083_v32 = vld [vmem:[%s2584_s20 + $0x328] sm:$0xff] }
 0x113   : > { %v1015_v24 = vadd.f32 %v1011_v53, %v999_v51  ;;  %v748_v9 = vsel %vm741_vm2, %v744_v56, %v747_v28  ;;  %v1016_v11 = vadd.f32 %v1012_v57, %v1000_v60  ;;  %v1017_v12 = vadd.f32 %v1013_v16, %v1001_v48  ;;  %v1082_v48 = vld [vmem:[%s2584_s20 + $0x320] sm:$0xff]  ;;  %v1084_v53 = vld [vmem:[%s2584_s20 + $0x330] sm:$0xff] }
 0x114   : > { %v1028_v10 = vmul.f32 %v1025_v59, %v1020_v54  ;;  %v3127_v20 = vsel %vm738_vm3, nan, %v748_v9  ;;  %v1029_v39 = vmul.f32 %v1025_v59, %v1021_v43  ;;  %v1030_v23 = vadd.f32 %v1026_v55, %v1014_v63  ;;  %v1085_v43 = vld [vmem:[%s2584_s20 + $0x338] sm:$0xff]  ;;  %v1098_v9 = vld [vmem:[%s2584_s20 + $0x340] sm:$0xff] }
 0x115   : > { %v1031_v37 = vadd.f32 %v1027_v6, %v1015_v24  ;;  %v1042_v25 = vmul.f32 %v1041_v35, %v1034_v26  ;;  %v1043_v47 = vmul.f32 %v1041_v35, %v1035_v1  ;;  %v1044_v14 = vmul.f32 %v1041_v35, %v1036_v21 }
 0x116   : > { %v1032_v17 = vadd.f32 %v1028_v10, %v1016_v11  ;;  %v1033_v52 = vadd.f32 %v1029_v39, %v1017_v12  ;;  %v1045_v15 = vmul.f32 %v1041_v35, %v1037_v18  ;;  %v1057_v45 = vrot.slane %v3054_v19, %v2602_v5  ;;  %v1099_v39 = vld [vmem:[%s2584_s20 + $0x348] sm:$0xff] }
 0x117   : > { %v1073_v7 = vrot.slane %v3054_v19, %v2738_v44  ;;  %v1046_v59 = vadd.f32 %v1042_v25, %v1030_v23  ;;  %v1047_v46 = vadd.f32 %v1043_v47, %v1031_v37  ;;  %v1089_v51 = vrot.slane %v3054_v19, %v2741_v22  ;;  %v1100_v23 = vld [vmem:[%s2584_s20 + $0x350] sm:$0xff]  ;;  %v1101_v37 = vld [vmem:[%s2584_s20 + $0x358] sm:$0xff]  ;;  %v1114_v25 = vld [vmem:[%s2584_s20 + $0x360] sm:$0xff] }
 0x118   : > { %v1048_v49 = vadd.f32 %v1044_v14, %v1032_v17  ;;  %v1049_v35 = vadd.f32 %v1045_v15, %v1033_v52  ;;  %v1058_v60 = vmul.f32 %v1057_v45, %v1050_v27  ;;  %v1059_v58 = vmul.f32 %v1057_v45, %v1051_v33  ;;  %v1115_v47 = vld [vmem:[%s2584_s20 + $0x368] sm:$0xff]  ;;  %v1116_v14 = vld [vmem:[%s2584_s20 + $0x370] sm:$0xff] }
 0x119   : > { %v1060_v29 = vmul.f32 %v1057_v45, %v1052_v30  ;;  %v1061_v54 = vmul.f32 %v1057_v45, %v1053_v8  ;;  %v1074_v28 = vmul.f32 %v1073_v7, %v1066_v62  ;;  %v1075_v57 = vmul.f32 %v1073_v7, %v1067_v31  ;;  %v1117_v45 = vld [vmem:[%s2584_s20 + $0x378] sm:$0xff] }
 0x11a   : > { %v1076_v16 = vmul.f32 %v1073_v7, %v1068_v41  ;;  %v1062_v55 = vadd.f32 %v1058_v60, %v1046_v59  ;;  %v1063_v56 = vadd.f32 %v1059_v58, %v1047_v46  ;;  %v1077_v24 = vmul.f32 %v1073_v7, %v1069_v61  ;;  %v1130_v46 = vld [vmem:[%s2584_s20 + $0x380] sm:$0xff]  ;;  %v1133_v58 = vld [vmem:[%s2584_s20 + $0x398] sm:$0xff] }
 0x11b   : > { %v1064_v63 = vadd.f32 %v1060_v29, %v1048_v49  ;;  %v1065_v6 = vadd.f32 %v1061_v54, %v1049_v35  ;;  %v1090_v26 = vmul.f32 %v1089_v51, %v1082_v48  ;;  %v1091_v1 = vmul.f32 %v1089_v51, %v1083_v32  ;;  %v1132_v49 = vld [vmem:[%s2584_s20 + $0x390] sm:$0xff]  ;;  %v1146_v54 = vld [vmem:[%s2584_s20 + $0x3a0] sm:$0xff] }
 0x11c   : > { %v1092_v21 = vmul.f32 %v1089_v51, %v1084_v53  ;;  %v1078_v11 = vadd.f32 %v1074_v28, %v1062_v55  ;;  %v1079_v12 = vadd.f32 %v1075_v57, %v1063_v56  ;;  %v1093_v18 = vmul.f32 %v1089_v51, %v1085_v43  ;;  %v1147_v28 = vld [vmem:[%s2584_s20 + $0x3a8] sm:$0xff]  ;;  %v1148_v57 = vld [vmem:[%s2584_s20 + $0x3b0] sm:$0xff] }
 0x11d   : > { %v1080_v10 = vadd.f32 %v1076_v16, %v1064_v63  ;;  %v1081_v27 = vadd.f32 %v1077_v24, %v1065_v6  ;;  %v1105_v17 = vrot.slane %v3054_v19, %v2804_v0  ;;  %v1121_v33 = vrot.slane %v3054_v19, %v2932_v13  ;;  %v1131_v19 = vld [vmem:[%s2584_s20 + $0x388] sm:$0xff]  ;;  %v1149_v63 = vld [vmem:[%s2584_s20 + $0x3b8] sm:$0xff] }
 0x11e   : > { %v1137_v30 = vrot.slane %v3127_v20, %v2593_v2  ;;  %v1094_v8 = vadd.f32 %v1090_v26, %v1078_v11  ;;  %v1095_v52 = vadd.f32 %v1091_v1, %v1079_v12  ;;  %v1153_v62 = vrot.slane %v3127_v20, %v2596_v3 }
 0x11f   : > { %v1096_v15 = vadd.f32 %v1092_v21, %v1080_v10  ;;  %v1097_v31 = vadd.f32 %v1093_v18, %v1081_v27  ;;  %v1106_v41 = vmul.f32 %v1105_v17, %v1098_v9  ;;  %v1107_v7 = vmul.f32 %v1105_v17, %v1099_v39  ;;  %v1162_v10 = vld [vmem:[%s2584_s20 + $0x3c0] sm:$0xff]  ;;  %v1163_v27 = vld [vmem:[%s2584_s20 + $0x3c8] sm:$0xff] }
 0x120   : > { %v1108_v59 = vmul.f32 %v1105_v17, %v1100_v23  ;;  %v1109_v61 = vmul.f32 %v1105_v17, %v1101_v37  ;;  %v1122_v51 = vmul.f32 %v1121_v33, %v1114_v25  ;;  %v1123_v35 = vmul.f32 %v1121_v33, %v1115_v47  ;;  %v1164_v17 = vld [vmem:[%s2584_s20 + $0x3d0] sm:$0xff]  ;;  %v1165_v25 = vld [vmem:[%s2584_s20 + $0x3d8] sm:$0xff] }
 0x121   : > { %v1124_v60 = vmul.f32 %v1121_v33, %v1116_v14  ;;  %v1110_v29 = vadd.f32 %v1106_v41, %v1094_v8  ;;  %v1111_v48 = vadd.f32 %v1107_v7, %v1095_v52  ;;  %v1125_v53 = vmul.f32 %v1121_v33, %v1117_v45  ;;  %v1178_v33 = vld [vmem:[%s2584_s20 + $0x3e0] sm:$0xff]  ;;  %v1180_v8 = vld [vmem:[%s2584_s20 + $0x3f0] sm:$0xff]  ;;  %v1181_v41 = vld [vmem:[%s2584_s20 + $0x3f8] sm:$0xff] }
 0x122   : > { %v1112_v32 = vadd.f32 %v1108_v59, %v1096_v15  ;;  %v1113_v16 = vadd.f32 %v1109_v61, %v1097_v31  ;;  %v1138_v43 = vmul.f32 %v1137_v30, %v1130_v46  ;;  %v1139_v55 = vmul.f32 %v1137_v30, %v1131_v19  ;;  %v1194_v61 = vld [vmem:[%s2584_s20 + $0x400] sm:$0xff] }
 0x123   : > { %v1140_v56 = vmul.f32 %v1137_v30, %v1132_v49  ;;  %v1126_v24 = vadd.f32 %v1122_v51, %v1110_v29  ;;  %v1127_v6 = vadd.f32 %v1123_v35, %v1111_v48  ;;  %v1141_v1 = vmul.f32 %v1137_v30, %v1133_v58  ;;  %v1179_v30 = vld [vmem:[%s2584_s20 + $0x3e8] sm:$0xff]  ;;  %v1196_v35 = vld [vmem:[%s2584_s20 + $0x410] sm:$0xff] }
 0x124   : > { %v1128_v26 = vadd.f32 %v1124_v60, %v1112_v32  ;;  %v1129_v21 = vadd.f32 %v1125_v53, %v1113_v16  ;;  %v1154_v9 = vmul.f32 %v1153_v62, %v1146_v54  ;;  %v1155_v11 = vmul.f32 %v1153_v62, %v1147_v28  ;;  %v1195_v51 = vld [vmem:[%s2584_s20 + $0x408] sm:$0xff]  ;;  %v1210_v28 = vld [vmem:[%s2584_s20 + $0x420] sm:$0xff]  ;;  %v1212_v16 = vld [vmem:[%s2584_s20 + $0x430] sm:$0xff] }
 0x125   : > { %v1156_v12 = vmul.f32 %v1153_v62, %v1148_v57  ;;  %v1142_v18 = vadd.f32 %v1138_v43, %v1126_v24  ;;  %v1143_v39 = vadd.f32 %v1139_v55, %v1127_v6  ;;  %v1157_v37 = vmul.f32 %v1153_v62, %v1149_v63  ;;  %v1211_v57 = vld [vmem:[%s2584_s20 + $0x428] sm:$0xff] }
 0x126   : > { %v1144_v23 = vadd.f32 %v1140_v56, %v1128_v26  ;;  %v1145_v47 = vadd.f32 %v1141_v1, %v1129_v21  ;;  %v1169_v14 = vrot.slane %v3127_v20, %v2599_v4  ;;  %v1185_v52 = vrot.slane %v3127_v20, %v2602_v5  ;;  %v1197_v21 = vld [vmem:[%s2584_s20 + $0x418] sm:$0xff] }
 0x127   : > { %v1201_v15 = vrot.slane %v3127_v20, %v2738_v44  ;;  %v1158_v45 = vadd.f32 %v1154_v9, %v1142_v18  ;;  %v1159_v62 = vadd.f32 %v1155_v11, %v1143_v39  ;;  %v1217_v7 = vrot.slane %v3127_v20, %v2741_v22 }
 0x128   : > { %v1160_v31 = vadd.f32 %v1156_v12, %v1144_v23  ;;  %v1161_v59 = vadd.f32 %v1157_v37, %v1145_v47  ;;  %v1170_v46 = vmul.f32 %v1169_v14, %v1162_v10  ;;  %v1171_v19 = vmul.f32 %v1169_v14, %v1163_v27  ;;  %v1226_v23 = vld [vmem:[%s2584_s20 + $0x440] sm:$0xff]  ;;  %v1227_v37 = vld [vmem:[%s2584_s20 + $0x448] sm:$0xff]  ;;  %v1228_v27 = vld [vmem:[%s2584_s20 + $0x450] sm:$0xff] }
 0x129   : > { %v1172_v49 = vmul.f32 %v1169_v14, %v1164_v17  ;;  %v1173_v60 = vmul.f32 %v1169_v14, %v1165_v25  ;;  %v1186_v58 = vmul.f32 %v1185_v52, %v1178_v33  ;;  %v1187_v29 = vmul.f32 %v1185_v52, %v1179_v30  ;;  %v1242_v47 = vld [vmem:[%s2584_s20 + $0x460] sm:$0xff]  ;;  %v1243_v14 = vld [vmem:[%s2584_s20 + $0x468] sm:$0xff]  ;;  %v1244_v33 = vld [vmem:[%s2584_s20 + $0x470] sm:$0xff] }
 0x12a   : > { %v1188_v48 = vmul.f32 %v1185_v52, %v1180_v8  ;;  %v1174_v32 = vadd.f32 %v1170_v46, %v1158_v45  ;;  %v1175_v53 = vadd.f32 %v1171_v19, %v1159_v62  ;;  %v1189_v43 = vmul.f32 %v1185_v52, %v1181_v41 }
 0x12b   : > { %v1176_v54 = vadd.f32 %v1172_v49, %v1160_v31  ;;  %v1202_v55 = vmul.f32 %v1201_v15, %v1194_v61  ;;  %v1203_v56 = vmul.f32 %v1201_v15, %v1195_v51  ;;  %v1204_v63 = vmul.f32 %v1201_v15, %v1196_v35  ;;  %v1213_v31 = vld [vmem:[%s2584_s20 + $0x438] sm:$0xff] }
 0x12c   : > { %v1177_v24 = vadd.f32 %v1173_v60, %v1161_v59  ;;  %v1190_v6 = vadd.f32 %v1186_v58, %v1174_v32  ;;  %v1191_v26 = vadd.f32 %v1187_v29, %v1175_v53  ;;  %v1218_v9 = vmul.f32 %v1217_v7, %v1210_v28  ;;  %v1229_v58 = vld [vmem:[%s2584_s20 + $0x458] sm:$0xff]  ;;  %v1258_v53 = vld [vmem:[%s2624_s29 + $0x20] sm:$0xff] }
 0x12d   : > { %v1192_v1 = vadd.f32 %v1188_v48, %v1176_v54  ;;  %v1219_v11 = vmul.f32 %v1217_v7, %v1211_v57  ;;  %v1220_v12 = vmul.f32 %v1217_v7, %v1212_v16  ;;  %v1205_v17 = vmul.f32 %v1201_v15, %v1197_v21  ;;  %v1259_v54 = vld [vmem:[%s2624_s29 + $0x28] sm:$0xff]  ;;  %v1260_v28 = vld [vmem:[%s2624_s29 + $0x30] sm:$0xff] }
 0x12e   : > { %v1206_v10 = vadd.f32 %v1202_v55, %v1190_v6  ;;  %v1207_v18 = vadd.f32 %v1203_v56, %v1191_v26  ;;  %v1233_v25 = vrot.slane %v3127_v20, %v2804_v0  ;;  %v1249_v30 = vrot.slane %v3127_v20, %v2932_v13 }
 0x12f   : > { %v1208_v39 = vadd.f32 %v1204_v63, %v1192_v1  ;;  %v1193_v8 = vadd.f32 %v1189_v43, %v1177_v24  ;;  %v1221_v60 = vmul.f32 %v1217_v7, %v1213_v31  ;;  %v1245_v63 = vld [vmem:[%s2584_s20 + $0x478] sm:$0xff] }
 0x130   : > { %v1222_v52 = vadd.f32 %v1218_v9, %v1206_v10  ;;  %v1223_v45 = vadd.f32 %v1219_v11, %v1207_v18  ;;  %v1234_v41 = vmul.f32 %v1233_v25, %v1226_v23  ;;  %v1235_v59 = vmul.f32 %v1233_v25, %v1227_v37 }
 0x131   : > { %v1224_v62 = vadd.f32 %v1220_v12, %v1208_v39  ;;  %v1236_v15 = vmul.f32 %v1233_v25, %v1228_v27  ;;  %v1250_v46 = vmul.f32 %v1249_v30, %v1242_v47  ;;  %v1251_v19 = vmul.f32 %v1249_v30, %v1243_v14 }
 0x132   : > { %v1252_v49 = vmul.f32 %v1249_v30, %v1244_v33  ;;  %v1238_v61 = vadd.f32 %v1234_v41, %v1222_v52  ;;  %v1239_v51 = vadd.f32 %v1235_v59, %v1223_v45  ;;  %v1209_v20 = vadd.f32 %v1205_v17, %v1193_v8 }
 0x133   : > { %v1240_v35 = vadd.f32 %v1236_v15, %v1224_v62  ;;  %v1237_v56 = vmul.f32 %v1233_v25, %v1229_v58  ;;  %v1253_v9 = vmul.f32 %v1249_v30, %v1245_v63 }
 0x134   : > { %v1254_v29 = vadd.f32 %v1250_v46, %v1238_v61  ;;  %v1255_v48 = vadd.f32 %v1251_v19, %v1239_v51  ;;  %v1225_v55 = vadd.f32 %v1221_v60, %v1209_v20 }
 0x135   : > { %v1256_v32 = vadd.f32 %v1252_v49, %v1240_v35 }
 0x136   : > { %v1262_v57 = vmul.f32 30.0, %v1254_v29  ;;  %v1263_v16 = vmul.f32 30.0, %v1255_v48  ;;  %v1241_v21 = vadd.f32 %v1237_v56, %v1225_v55 }
 0x137   : > { %v1264_v43 = vmul.f32 30.0, %v1256_v32 }
 0x138   : > { %v3210_v24 = vadd.f32 %v1262_v57, %v1258_v53  ;;  %v3212_v6 = vadd.f32 %v1263_v16, %v1259_v54  ;;  %v1257_v17 = vadd.f32 %v1253_v9, %v1241_v21 }
 0x139   : > { %v3214_v26 = vadd.f32 %v1264_v43, %v1260_v28 }
 0x13a   : > { %v1270_v7 = vand.u32 2147483647, %v3210_v24  ;;  %v1273_v1 = vand.u32 2139095040, %v3210_v24  ;;  %v1374_v11 = vand.u32 2147483647, %v3212_v6  ;;  %v1377_v12 = vand.u32 2139095040, %v3212_v6 }
 0x13b   : > { %v1481_v37 = vand.u32 2139095040, %v3214_v26  ;;  %v1478_v52 = vand.u32 2147483647, %v3214_v26  ;;  %v3226_v62 = vmul.f32 30.0, %v1257_v17  ;;  %vm1272_vm1 = vcmp.lt.s32.totalorder %v3210_v24, 0 }
 0x13c   : > { %v1274_v10 = vshrl.u32 %v1273_v1, 23  ;;  %v1277_v18 = vand.u32 8388607, %v1270_v7  ;;  %v1378_v39 = vshrl.u32 %v1377_v12, 23  ;;  %v1381_v23 = vand.u32 8388607, %v1374_v11 }
 0x13d   : > { %v1482_v47 = vshrl.u32 %v1481_v37, 23  ;;  %v3234_v61 = vand.u32 8388607, %v1478_v52  ;;  %vm3350_vm3 = vcmp.le.f32.partialorder %v1270_v7, 0.7853982 }
 0x13e   : > { %v2066_v27 = vadd.s32 4294967169, %v1274_v10  ;;  %v2070_v25 = vadd.s32 4294967169, %v1378_v39  ;;  %v1278_v14 = vor.u32 8388608, %v1277_v18  ;;  %v1382_v30 = vor.u32 8388608, %v1381_v23 }
 0x13f   : > { %v2074_v45 = vadd.s32 4294967169, %v1482_v47 }
 0x140   : > { %v1280_v33 = vadd.s32 1, %v2066_v27  ;;  %v1384_v8 = vadd.s32 1, %v2070_v25  ;;  %v3228_v15 = vshll.u32 %v1278_v14, 8  ;;  %v3230_v49 = vshll.u32 %v1382_v30, 8 }
 0x141   : > { %v3236_v51 = vadd.s32 1, %v2074_v45 }
 0x142   : > { %vm1281_vm4 = vcmp.gt.s32.totalorder %v1280_v33, 0  ;;  %vm1385_vm5 = vcmp.gt.s32.totalorder %v1384_v8, 0 }
 0x143   : > { %v1282_v31 = vsel %vm1281_vm4, %v1280_v33, 0  ;;  %v1386_v46 = vsel %vm1385_vm5, %v1384_v8, 0  ;;  %vm1489_vm10 = vcmp.gt.s32.totalorder %v3236_v51, 0 }
 0x144   : > { %v1283_v41 = vshrl.u32 %v1282_v31, 5  ;;  %v1284_v59 = vand.u32 31, %v1282_v31  ;;  %v1388_v19 = vand.u32 31, %v1386_v46  ;;  %v3243_v32 = vshrl.u32 %v1386_v46, 5 }
 0x146   : > { %v1285_v35 = vsub.s32 32, %v1284_v59  ;;  %v1287_v20 = vshll.u32 %v2379_v34, %v1284_v59  ;;  %v1290_v60 = vshll.u32 %v2380_v36, %v1284_v59  ;;  %v1293_v58 = vshll.u32 %v2381_v38, %v1284_v59 }
 0x147   : > { %v1296_v29 = vshll.u32 %v2382_v40, %v1284_v59  ;;  %v1299_v48 = vshll.u32 %v2383_v42, %v1284_v59  ;;  %vm1302_vm6 = vcmp.lt.s32.totalorder %v1283_v41, 1  ;;  %vm1303_vm7 = vcmp.lt.s32.totalorder %v1283_v41, 2 }
 0x148   : > { %v1286_v53 = vshrl.u32 %v2379_v34, %v1285_v35  ;;  %v1288_v54 = vshrl.u32 %v2380_v36, %v1285_v35  ;;  %v1291_v28 = vshrl.u32 %v2381_v38, %v1285_v35  ;;  %v1294_v57 = vshrl.u32 %v2382_v40, %v1285_v35 }
 0x149   : > { %v1297_v16 = vshrl.u32 %v2383_v42, %v1285_v35  ;;  %v1300_v43 = vshrl.u32 %v2384_v50, %v1285_v35  ;;  %vm1305_vm8 = vcmp.lt.s32.totalorder %v1283_v41, 4  ;;  %v1389_v1 = vsub.s32 32, %v1388_v19 }
 0x14a   : > { %v1289_v55 = vor.u32 %v1288_v54, %v1287_v20  ;;  %v1292_v56 = vor.u32 %v1291_v28, %v1290_v60  ;;  %v1295_v63 = vor.u32 %v1294_v57, %v1293_v58  ;;  %vm1304_vm9 = vcmp.lt.s32.totalorder %v1283_v41, 3 }
 0x14b   : > { %v1298_v21 = vor.u32 %v1297_v16, %v1296_v29  ;;  %v1301_v9 = vor.u32 %v1300_v43, %v1299_v48  ;;  %v1391_v12 = vshll.u32 %v2379_v34, %v1388_v19  ;;  %v1394_v25 = vshll.u32 %v2380_v36, %v1388_v19 }
 0x14c   : > { %v1306_v10 = vsel %vm1302_vm6, %v1286_v53, %v1289_v55  ;;  %v1307_v18 = vsel %vm1305_vm8, %v1295_v63, 2102212464  ;;  %v1310_v39 = vsel %vm1302_vm6, %v1289_v55, %v1292_v56  ;;  %v1314_v23 = vsel %vm1302_vm6, %v1292_v56, %v1295_v63 }
 0x14d   : > { %v1308_v37 = vsel %vm1304_vm9, %v1292_v56, %v1307_v18  ;;  %v1311_v27 = vsel %vm1305_vm8, %v1298_v21, 920167782  ;;  %v1315_v17 = vsel %vm1305_vm8, %v1301_v9, 1326507024  ;;  %v1390_v33 = vshrl.u32 %v2379_v34, %v1389_v1 }
 0x14e   : > { %v1312_v47 = vsel %vm1304_vm9, %v1295_v63, %v1311_v27  ;;  %v1316_v14 = vsel %vm1304_vm9, %v1298_v21, %v1315_v17  ;;  %v1392_v30 = vshrl.u32 %v2380_v36, %v1389_v1  ;;  %v1309_v8 = vsel %vm1303_vm7, %v1306_v10, %v1308_v37  ;;  %v1261_v10 = vld [vmem:[%s2624_s29 + $0x38] sm:$0xff] }
 0x14f   : > { %v1313_v45 = vsel %vm1303_vm7, %v1310_v39, %v1312_v47  ;;  %v1317_v31 = vsel %vm1303_vm7, %v1314_v23, %v1316_v14  ;;  %v1395_v59 = vshrl.u32 %v2381_v38, %v1389_v1  ;;  %v1397_v48 = vshll.u32 %v2381_v38, %v1388_v19 }
 0x150   : > { %v3264_v46 = vmul.u32.u64.low %v3228_v15, %v1317_v31  ;;  %v3265_v35 = vmul.u32.u64.high %v3228_v15, %v1317_v31, %v3264_v46  ;;  %v3268_v20 = vmul.u32.u64.low %v3228_v15, %v1313_v45  ;;  %v3269_v60 = vmul.u32.u64.high %v3228_v15, %v1313_v45, %v3268_v20 }
 0x151   : > { %v1393_v58 = vor.u32 %v1392_v30, %v1391_v12  ;;  %v1396_v29 = vor.u32 %v1395_v59, %v1394_v25  ;;  %v1398_v53 = vshrl.u32 %v2382_v40, %v1389_v1  ;;  %v1400_v41 = vshll.u32 %v2382_v40, %v1388_v19 }
 0x152   : > { %v1401_v54 = vshrl.u32 %v2383_v42, %v1389_v1  ;;  %v1403_v28 = vshll.u32 %v2383_v42, %v1388_v19  ;;  %v1404_v57 = vshrl.u32 %v2384_v50, %v1389_v1  ;;  %v1325_v16 = vmul.u32 %v3228_v15, %v1309_v8 }
 0x153   : > { %v1399_v43 = vor.u32 %v1398_v53, %v1397_v48  ;;  %vm1406_vm11 = vcmp.lt.s32.totalorder %v3243_v32, 1  ;;  %vm1407_vm12 = vcmp.lt.s32.totalorder %v3243_v32, 2  ;;  %vm1327_vm13 = vc.u32 %v3265_v35, %v3268_v20 }
 0x154   : > { %v1328_v55 = vadd.s32 1, %v3269_v60  ;;  %v1402_v56 = vor.u32 %v1401_v54, %v1400_v41  ;;  %vm1408_vm14 = vcmp.lt.s32.totalorder %v3243_v32, 3  ;;  %v1405_v63 = vor.u32 %v1404_v57, %v1403_v28 }
 0x155   : > { %vm1409_vm15 = vcmp.lt.s32.totalorder %v3243_v32, 4  ;;  %v1410_v19 = vsel %vm1406_vm11, %v1390_v33, %v1393_v58  ;;  %v1414_v1 = vsel %vm1406_vm11, %v1393_v58, %v1396_v29  ;;  %v1418_v12 = vsel %vm1406_vm11, %v1396_v29, %v1399_v43 }
 0x156   : > { %v1329_v15 = vsel %vm1327_vm13, %v1328_v55, %v3269_v60  ;;  %v1411_v21 = vsel %vm1409_vm15, %v1399_v43, 2102212464  ;;  %v1415_v9 = vsel %vm1409_vm15, %v1402_v56, 920167782  ;;  %v1419_v37 = vsel %vm1409_vm15, %v1405_v63, 1326507024 }
 0x157   : > { %v1330_v18 = vadd.s32 %v1329_v15, %v1325_v16  ;;  %v1412_v39 = vsel %vm1408_vm14, %v1396_v29, %v1411_v21  ;;  %v1416_v23 = vsel %vm1408_vm14, %v1399_v43, %v1415_v9  ;;  %v1420_v25 = vsel %vm1408_vm14, %v1402_v56, %v1419_v37 }
 0x158   : > { %v1413_v27 = vsel %vm1407_vm12, %v1410_v19, %v1412_v39  ;;  %v1417_v17 = vsel %vm1407_vm12, %v1414_v1, %v1416_v23  ;;  %v1490_v47 = vsel %vm1489_vm10, %v3236_v51, 0  ;;  %v1421_v33 = vsel %vm1407_vm12, %v1418_v12, %v1420_v25 }
 0x159   : > { %v1331_v14 = vadd.s32 536870912, %v1330_v18  ;;  %v3304_v30 = vmul.u32.u64.low %v3230_v49, %v1417_v17  ;;  %v3305_v8 = vmul.u32.u64.high %v3230_v49, %v1417_v17, %v3304_v30  ;;  %v3309_v45 = vadd.f32 %v3226_v62, %v1261_v10 }
 0x15a   : > { %v3312_v31 = vmul.u32.u64.low %v3230_v49, %v1421_v33  ;;  %v3313_v59 = vmul.u32.u64.high %v3230_v49, %v1421_v33, %v3312_v31  ;;  %v1486_v60 = vor.u32 8388608, %v3234_v61  ;;  %v1492_v51 = vand.u32 31, %v1490_v47 }
 0x15b   : > { %v1332_v46 = vshrl.u32 %v1331_v14, 30  ;;  %v1429_v58 = vmul.u32 %v3230_v49, %v1413_v27  ;;  %v1432_v29 = vadd.s32 1, %v3305_v8  ;;  %v1582_v62 = vand.u32 2147483647, %v3309_v45 }
 0x15c   : > { %v1493_v48 = vsub.s32 32, %v1492_v51  ;;  %vm1431_vm0 = vc.u32 %v3313_v59, %v3304_v30  ;;  %v1585_v53 = vand.u32 2139095040, %v3309_v45  ;;  %v3326_v54 = vshrl.u32 %v1490_v47, 5 }
 0x15d   : > { %v1333_v32 = vshll.u32 %v1332_v46, 30  ;;  %v1433_v61 = vsel %vm1431_vm0, %v1432_v29, %v3305_v8  ;;  %v3328_v49 = vshll.u32 %v1486_v60, 8  ;;  %v1495_v57 = vshll.u32 %v2379_v34, %v1492_v51 }
 0x15e   : > { %v1434_v28 = vadd.s32 %v1433_v61, %v1429_v58  ;;  %v1496_v16 = vshrl.u32 %v2380_v36, %v1493_v48  ;;  %v1498_v43 = vshll.u32 %v2380_v36, %v1492_v51  ;;  %v1499_v56 = vshrl.u32 %v2381_v38, %v1493_v48 }
 0x15f   : > { %v3323_v41 = vsub.s32 %v1330_v18, %v1333_v32  ;;  %v1501_v63 = vshll.u32 %v2381_v38, %v1492_v51  ;;  %v1502_v19 = vshrl.u32 %v2382_v40, %v1493_v48  ;;  %v1326_v1 = vadd.s32 %v3268_v20, %v3265_v35 }
 0x160   : > { %v1435_v15 = vadd.s32 536870912, %v1434_v28  ;;  %v1504_v21 = vshll.u32 %v2382_v40, %v1492_v51  ;;  %v1586_v9 = vshrl.u32 %v1585_v53, 23  ;;  %v1356_v10 = vsub.s32 4, %v1332_v46 }
 0x161   : > { %v1336_v55 = vsub.s32 0, %v3323_v41  ;;  %v1505_v18 = vshrl.u32 %v2383_v42, %v1493_v48  ;;  %vm1513_vm2 = vcmp.lt.s32.totalorder %v3326_v54, 4  ;;  %v1494_v23 = vshrl.u32 %v2379_v34, %v1493_v48 }
 0x162   : > { %v3343_v39 = vshrl.u32 %v1435_v15, 30  ;;  %v1507_v37 = vshll.u32 %v2383_v42, %v1492_v51  ;;  %v1508_v27 = vshrl.u32 %v2384_v50, %v1493_v48  ;;  %v1497_v17 = vor.u32 %v1496_v16, %v1495_v57 }
 0x163   : > { %v2067_v12 = vmin.u32 %v1336_v55, %v3323_v41  ;;  %v1500_v25 = vor.u32 %v1499_v56, %v1498_v43  ;;  %v1503_v47 = vor.u32 %v1502_v19, %v1501_v63  ;;  %v1506_v33 = vor.u32 %v1505_v18, %v1504_v21 }
 0x164   : > { %v1437_v14 = vshll.u32 %v3343_v39, 30  ;;  %vm1510_vm4 = vcmp.lt.s32.totalorder %v3326_v54, 1  ;;  %vm1512_vm5 = vcmp.lt.s32.totalorder %v3326_v54, 3  ;;  %v1509_v31 = vor.u32 %v1508_v27, %v1507_v37 }
 0x165   : > { %v1338_v20 = vclz %v2067_v12  ;;  %v1515_v60 = vsel %vm1513_vm2, %v1503_v47, 2102212464  ;;  %v2078_v7 = vadd.s32 4294967169, %v1586_v9  ;;  %v1357_v51 = vsel %vm1272_vm1, %v1356_v10, %v1332_v46 }
 0x166   : > { %v3361_v58 = vsub.s32 %v1434_v28, %v1437_v14  ;;  %vm1511_vm6 = vcmp.lt.s32.totalorder %v3326_v54, 2  ;;  %v1519_v32 = vsel %vm1513_vm2, %v1506_v33, 920167782  ;;  %v1514_v29 = vsel %vm1510_vm4, %v1494_v23, %v1497_v17 }
 0x167   : > { %v2068_v8 = vadd.s32 4294967294, %v1338_v20  ;;  %v1518_v48 = vsel %vm1510_vm4, %v1497_v17, %v1500_v25  ;;  %v1520_v53 = vsel %vm1512_vm5, %v1503_v47, %v1519_v32  ;;  %v1516_v28 = vsel %vm1512_vm5, %v1500_v25, %v1515_v60 }
 0x168   : > { %v1440_v46 = vsub.s32 0, %v3361_v58  ;;  %v1522_v57 = vsel %vm1510_vm4, %v1500_v25, %v1503_v47  ;;  %v1523_v56 = vsel %vm1513_vm2, %v1509_v31, 1326507024  ;;  %v1521_v19 = vsel %vm1511_vm6, %v1518_v48, %v1520_v53 }
 0x169   : > { %vm2069_vm7 = vcmp.lt.s32.totalorder %v2068_v8, 0  ;;  %v1524_v15 = vsel %vm1512_vm5, %v1506_v33, %v1523_v56  ;;  %v3387_v21 = vand.u32 8388607, %v1582_v62  ;;  %v1592_v10 = vadd.s32 1, %v2078_v7 }
 0x16a   : > { %v1341_v61 = vsel %vm2069_vm7, 0, %v2068_v8  ;;  %v2071_v63 = vmin.u32 %v1440_v46, %v3361_v58  ;;  %v1359_v18 = vsel %vm3350_vm3, 0, %v1357_v51  ;;  %v1517_v37 = vsel %vm1511_vm6, %v1514_v29, %v1516_v28 }
 0x16b   : > { %v1342_v16 = vsub.s32 32, %v1341_v61  ;;  %v1343_v43 = vshll.u32 %v3323_v41, %v1341_v61  ;;  %v1346_v55 = vsub.s32 4294967266, %v1341_v61  ;;  %v1525_v41 = vsel %vm1511_vm6, %v1522_v57, %v1524_v15 }
 0x16c   : > { %v1442_v23 = vclz %v2071_v63  ;;  %v3396_v17 = vmul.u32.u64.low %v3328_v49, %v1525_v41  ;;  %v3397_v25 = vmul.u32.u64.high %v3328_v49, %v1525_v41, %v3396_v17  ;;  %vm1593_vm8 = vcmp.gt.s32.totalorder %v1592_v10, 0 }
 0x16d   : > { %v1344_v9 = vshrl.u32 %v1326_v1, %v1342_v16  ;;  %v1347_v12 = vadd.s32 127, %v1346_v55  ;;  %v3400_v1 = vmul.u32.u64.low %v3328_v49, %v1521_v19  ;;  %v3401_v14 = vmul.u32.u64.high %v3328_v49, %v1521_v19, %v3400_v1 }
 0x16e   : > { %v2072_v47 = vadd.s32 4294967294, %v1442_v23  ;;  %v1590_v31 = vor.u32 8388608, %v3387_v21  ;;  %v1594_v60 = vsel %vm1593_vm8, %v1592_v10, 0  ;;  %v3405_v54 = vadd.s32 3, %v1359_v18 }
 0x16f   : > { %v1345_v27 = vor.u32 %v1344_v9, %v1343_v43  ;;  %v1348_v20 = vshll.u32 %v1347_v12, 23  ;;  %v1430_v7 = vadd.s32 %v3304_v30, %v3313_v59  ;;  %v1596_v51 = vand.u32 31, %v1594_v60 }
 0x170   : > { %vm2073_vm9 = vcmp.lt.s32.totalorder %v2072_v47, 0  ;;  %v1533_v48 = vmul.u32 %v3328_v49, %v1517_v37  ;;  %vm1535_vm10 = vc.u32 %v3397_v25, %v3400_v1  ;;  %vm1376_vm11 = vcmp.lt.s32.totalorder %v3212_v6, 0 }
 0x171   : > { %v1349_v33 = vor.u32 4788187, %v1348_v20  ;;  %v1352_v8 = vcvt.s32.f32 %v1345_v27  ;;  %v1445_v29 = vsel %vm2073_vm9, 0, %v2072_v47  ;;  %v1536_v28 = vadd.s32 1, %v3401_v14 }
 0x172   : > { %v1446_v53 = vsub.s32 32, %v1445_v29  ;;  %v1447_v61 = vshll.u32 %v3361_v58, %v1445_v29  ;;  %v1450_v46 = vsub.s32 4294967266, %v1445_v29  ;;  %v1460_v30 = vsub.s32 4, %v3343_v39 }
 0x173   : > { %v1350_v32 = vand.u32 2147483647, %v1349_v33  ;;  %v3416_v59 = vshrl.u32 %v1594_v60, 5  ;;  %v1597_v16 = vsub.s32 32, %v1596_v51  ;;  %v1537_v49 = vsel %vm1535_vm10, %v1536_v28, %v3401_v14 }
 0x174   : > { %v1448_v43 = vshrl.u32 %v1430_v7, %v1446_v53  ;;  %v1451_v55 = vadd.s32 127, %v1450_v46  ;;  %v1599_v56 = vshll.u32 %v2379_v34, %v1596_v51  ;;  %v1538_v19 = vadd.s32 %v1537_v49, %v1533_v48 }
 0x175   : > { %v1353_v57 = vmul.f32 %v1352_v8, %v1350_v32  ;;  %v1600_v15 = vshrl.u32 %v2380_v36, %v1597_v16  ;;  %v1602_v58 = vshll.u32 %v2380_v36, %v1596_v51  ;;  %vm3424_vm12 = vcmp.le.f32.partialorder %v1374_v11, 0.7853982 }
 0x176   : > { %v1449_v9 = vor.u32 %v1448_v43, %v1447_v61  ;;  %v1452_v12 = vshll.u32 %v1451_v55, 23  ;;  %v1603_v41 = vshrl.u32 %v2381_v38, %v1597_v16  ;;  %v1605_v10 = vshll.u32 %v2381_v38, %v1596_v51 }
 0x177   : > { %v1354_v63 = vxor.u32 2147483648, %v1353_v57  ;;  %v1539_v23 = vadd.s32 536870912, %v1538_v19  ;;  %v1606_v37 = vshrl.u32 %v2382_v40, %v1597_v16  ;;  %v1608_v36 = vshll.u32 %v2382_v40, %v1596_v51 }
 0x178   : > { %v1453_v27 = vor.u32 4788187, %v1452_v12  ;;  %v1456_v20 = vcvt.s32.f32 %v1449_v9  ;;  %v1601_v17 = vor.u32 %v1600_v15, %v1599_v56  ;;  %v1604_v14 = vor.u32 %v1603_v41, %v1602_v58 }
 0x179   : > { %v1355_v18 = vsel %vm1272_vm1, %v1354_v63, %v1353_v57  ;;  %v3437_v47 = vshrl.u32 %v1539_v23, 30  ;;  %v1609_v38 = vshrl.u32 %v2383_v42, %v1597_v16  ;;  %v1611_v8 = vshll.u32 %v2383_v42, %v1596_v51 }
 0x17a   : > { %v1358_v11 = vsel %vm3350_vm3, %v3210_v24, %v1355_v18  ;;  %v1454_v33 = vand.u32 2147483647, %v1453_v27  ;;  %v1612_v60 = vshrl.u32 %v2384_v50, %v1597_v16  ;;  %v1461_v40 = vsel %vm1376_vm11, %v1460_v30, %v3343_v39 }
 0x17b   : > { %2203 = vcosq.f32 %v1358_v11  ;;  %v1541_v35 = vshll.u32 %v3437_v47, 30  ;;  %v1610_v7 = vor.u32 %v1609_v38, %v1608_v36  ;;  %vm1614_vm13 = vcmp.lt.s32.totalorder %v3416_v59, 1 }
 0x17c   : > { %2205 = vsinq.f32 %v1358_v11  ;;  %v1457_v32 = vmul.f32 %v1456_v20, %v1454_v33  ;;  %v1598_v29 = vshrl.u32 %v2379_v34, %v1597_v16  ;;  %v1607_v48 = vor.u32 %v1606_v37, %v1605_v10 }
 0x17d   : > { %v3448_v53 = vshll.u32 %v1590_v31, 8  ;;  %v3450_v61 = vsub.s32 %v1538_v19, %v1541_v35  ;;  %v1613_v42 = vor.u32 %v1612_v60, %v1611_v8  ;;  %vm1616_vm14 = vcmp.lt.s32.totalorder %v3416_v59, 3 }
 0x17e   : > { %vm1617_vm15 = vcmp.lt.s32.totalorder %v3416_v59, 4  ;;  %v1458_v50 = vxor.u32 2147483648, %v1457_v32  ;;  %vm1615_vm0 = vcmp.lt.s32.totalorder %v3416_v59, 2  ;;  %v1622_v51 = vsel %vm1614_vm13, %v1601_v17, %v1604_v14 }
 0x17f   : > { %v1619_v39 = vsel %vm1617_vm15, %v1607_v48, 2102212464  ;;  %v1364_v34 = vand.u32 3, %v3405_v54  ;;  %v1463_v31 = vsel %vm3424_vm12, 0, %v1461_v40  ;;  %v1544_v46 = vsub.s32 0, %v3450_v61 }
 0x180   : > { %v1623_v28 = vsel %vm1617_vm15, %v1610_v7, 920167782  ;;  %v1459_v57 = vsel %vm1376_vm11, %v1458_v50, %v1457_v32  ;;  %v1618_v30 = vsel %vm1614_vm13, %v1598_v29, %v1601_v17  ;;  %v1620_v16 = vsel %vm1616_vm14, %v1604_v14, %v1619_v39  ;;  %v1686_v29 = vld [vmem:[%s2584_s20 + $0x480] sm:$0xf] }
 0x181   : > { %v1624_v54 = vsel %vm1616_vm14, %v1607_v48, %v1623_v28  ;;  %v1462_v43 = vsel %vm3424_vm12, %v3212_v6, %v1459_v57  ;;  %v2075_v55 = vmin.u32 %v1544_v46, %v3450_v61  ;;  %v1626_v56 = vsel %vm1614_vm13, %v1604_v14, %v1607_v48  ;;  %v1706_v46 = vld [vmem:[%s2584_s20 + $0x48c] sm:$0xf] }
 0x182   : > { %v1625_v49 = vsel %vm1615_vm0, %v1622_v51, %v1624_v54  ;;  %2207 = vcosq.f32 %v1462_v43  ;;  %v1627_v63 = vsel %vm1617_vm15, %v1613_v42, 1326507024  ;;  %vm1362_vm1 = vweird.f32 %v3210_v24 }
 0x183   : > { %v3484_v19 = vmul.u32.u64.low %v3448_v53, %v1625_v49  ;;  %v3485_v15 = vmul.u32.u64.high %v3448_v53, %v1625_v49, %v3484_v19  ;;  %2209 = vsinq.f32 %v1462_v43  ;;  %v1546_v58 = vclz %v2075_v55  ;;  %v1713_v49 = vld [vmem:[%s2584_s20 + $0x490] sm:$0xf] }
 0x184   : > { %v1467_v21 = vadd.s32 3, %v1463_v31  ;;  %v1628_v9 = vsel %vm1616_vm14, %v1610_v7, %v1627_v63  ;;  %vm1365_vm2 = vcmp.lt.s32.totalorder %v1364_v34, 2  ;;  %v1621_v41 = vsel %vm1615_vm0, %v1618_v30, %v1620_v16 }
 0x185   : > { %v2076_v12 = vadd.s32 4294967294, %v1546_v58  ;;  %v1629_v10 = vsel %vm1615_vm0, %v1626_v56, %v1628_v9  ;;  %vm1366_vm3 = vcmp.eq.s32.totalorder %v1364_v34, 0  ;;  %vm1369_vm4 = vcmp.eq.s32.totalorder %v1364_v34, 2  ;;  %v1699_v34 = vld [vmem:[%s2584_s20 + $0x488] sm:$0xf] }
 0x186   : > { %v3496_v23 = vmul.u32.u64.low %v3448_v53, %v1629_v10  ;;  %v3497_v37 = vmul.u32.u64.high %v3448_v53, %v1629_v10, %v3496_v23  ;;  %v1534_v27 = vadd.s32 %v3400_v1, %v3397_v25  ;;  %v1640_v20 = vadd.s32 1, %v3485_v15 }
 0x187   : > { %vm2077_vm5 = vcmp.lt.s32.totalorder %v2076_v12, 0  ;;  %v1468_v14 = vand.u32 3, %v1467_v21  ;;  %v1637_v38 = vmul.u32 %v3448_v53, %v1621_v41  ;;  %vm1466_vm6 = vweird.f32 %v3212_v6 }
 0x188   : > { %v2204_v18 = vpop.eup %2203  ;;  %v1549_v59 = vsel %vm2077_vm5, 0, %v2076_v12  ;;  %vm1639_vm7 = vc.u32 %v3497_v37, %v3484_v19  ;;  %vm1480_vm10 = vcmp.lt.s32.totalorder %v3214_v26, 0  ;;  %vm3542_vm12 = vcmp.le.f32.partialorder %v1478_v52, 0.7853982 }
 0x189   : > { %v2206_v36 = vpop.eup %2205  ;;  %v1370_v11 = vxor.u32 2147483648, %v2204_v18  ;;  %v1550_v8 = vsub.s32 32, %v1549_v59  ;;  %v1551_v60 = vshll.u32 %v3450_v61, %v1549_v59  ;;  %v1554_v40 = vsub.s32 4294967266, %v1549_v59  ;;  %v1692_v61 = vld [vmem:[%s2584_s20 + $0x484] sm:$0xf] }
 0x18a   : > { %v1367_v17 = vxor.u32 2147483648, %v2206_v36  ;;  %v1641_v32 = vsel %vm1639_vm7, %v1640_v20, %v3485_v15  ;;  %vm1469_vm8 = vcmp.lt.s32.totalorder %v1468_v14, 2  ;;  %vm1473_vm9 = vcmp.eq.s32.totalorder %v1468_v14, 2 }
 0x18b   : > { %v1371_v33 = vsel %vm1369_vm4, %v1370_v11, %v2206_v36  ;;  %v1552_v1 = vshrl.u32 %v1534_v27, %v1550_v8  ;;  %v1555_v7 = vadd.s32 127, %v1554_v40  ;;  %v1642_v53 = vadd.s32 %v1641_v32, %v1637_v38  ;;  %v1720_v36 = vld [vmem:[%s2584_s20 + $0x494] sm:$0xf]  ;;  %v1727_v40 = vld [vmem:[%s2584_s20 + $0x498] sm:$0xf] }
 0x18c   : > { %v1368_v35 = vsel %vm1366_vm3, %v2204_v18, %v1367_v17  ;;  %vm1470_vm11 = vcmp.eq.s32.totalorder %v1468_v14, 0  ;;  %v1564_v8 = vsub.s32 4, %v3437_v47  ;;  %v1734_v32 = vld [vmem:[%s2584_s20 + $0x49c] sm:$0xf]  ;;  %vm3597_vm3 = vcmp.le.f32.partialorder %v1582_v62, 0.7853982 }
 0x18d   : > { %v1372_v25 = vsel %vm1365_vm2, %v1368_v35, %v1371_v33  ;;  %v1553_v42 = vor.u32 %v1552_v1, %v1551_v60  ;;  %v1556_v50 = vshll.u32 %v1555_v7, 23  ;;  %v1643_v31 = vadd.s32 536870912, %v1642_v53 }
 0x18e   : > { %v3513_v48 = vsel %vm1362_vm1, nan, %v1372_v25  ;;  %v1565_v6 = vsel %vm1480_vm10, %v1564_v8, %v3437_v47  ;;  %vm1570_vm1 = vweird.f32 %v3214_v26  ;;  %vm1584_vm2 = vcmp.lt.s32.totalorder %v3309_v45, 0 }
 0x18f   : > { %v1690_v39 = vrot.slane %v3513_v48, %v2593_v2  ;;  %v1696_v51 = vrot.slane %v3513_v48, %v2596_v3  ;;  %v1703_v24 = vrot.slane %v3513_v48, %v2599_v4  ;;  %v1710_v28 = vrot.slane %v3513_v48, %v2602_v5  ;;  %v2208_v30 = vpop.eup %2207 }
 0x190   : > { %v1717_v57 = vrot.slane %v3513_v48, %v2738_v44  ;;  %v1557_v16 = vor.u32 4788187, %v1556_v50  ;;  %v1560_v54 = vcvt.s32.f32 %v1553_v42  ;;  %v2210_v56 = vpop.eup %2209  ;;  %v1474_v63 = vxor.u32 2147483648, %v2208_v30 }
 0x191   : > { %v1691_v43 = vmul.f32 %v1690_v39, %v1686_v29  ;;  %v1697_v55 = vmul.f32 %v1696_v51, %v1692_v61  ;;  %v3530_v15 = vshrl.u32 %v1643_v31, 30  ;;  %v1704_v58 = vmul.f32 %v1703_v24, %v1699_v34  ;;  %v1741_v51 = vld [vmem:[%s2584_s20 + $0x4a0] sm:$0xf] }
 0x192   : > { %v1471_v21 = vxor.u32 2147483648, %v2210_v56  ;;  %v1558_v9 = vand.u32 2147483647, %v1557_v16  ;;  %v1711_v41 = vmul.f32 %v1710_v28, %v1706_v46  ;;  %v1475_v10 = vsel %vm1473_vm9, %v1474_v63, %v2210_v56  ;;  %v1748_v46 = vld [vmem:[%s2584_s20 + $0x4a4] sm:$0xf] }
 0x193   : > { %v1698_v12 = vadd.f32 %v1697_v55, %v1691_v43  ;;  %v1645_v18 = vshll.u32 %v3530_v15, 30  ;;  %v1718_v23 = vmul.f32 %v1717_v57, %v1713_v49  ;;  %v1724_v11 = vrot.slane %v3513_v48, %v2741_v22 }
 0x194   : > { %v1472_v27 = vsel %vm1470_vm11, %v2208_v30, %v1471_v21  ;;  %v1561_v20 = vmul.f32 %v1560_v54, %v1558_v9  ;;  %v1731_v59 = vrot.slane %v3513_v48, %v2804_v0  ;;  %v1738_v52 = vrot.slane %v3513_v48, %v2932_v13  ;;  %v1755_v54 = vld [vmem:[%s2584_s20 + $0x4a8] sm:$0xf] }
 0x195   : > { %v1705_v17 = vadd.f32 %v1704_v58, %v1698_v12  ;;  %v1476_v38 = vsel %vm1469_vm8, %v1472_v27, %v1475_v10  ;;  %v1646_v60 = vsub.s32 %v1642_v53, %v1645_v18  ;;  %v1725_v7 = vmul.f32 %v1724_v11, %v1720_v36  ;;  %v1762_v58 = vld [vmem:[%s2584_s20 + $0x4ac] sm:$0xf]  ;;  %v1769_v36 = vld [vmem:[%s2584_s20 + $0x4b0] sm:$0xf] }
 0x196   : > { %v3550_v35 = vsel %vm1466_vm6, nan, %v1476_v38  ;;  %v1562_v25 = vxor.u32 2147483648, %v1561_v20  ;;  %v1732_v53 = vmul.f32 %v1731_v59, %v1727_v40  ;;  %v1739_v34 = vmul.f32 %v1738_v52, %v1734_v32  ;;  %v1776_v59 = vld [vmem:[%s2584_s20 + $0x4b4] sm:$0xf] }
 0x197   : > { %v1712_v1 = vadd.f32 %v1711_v41, %v1705_v17  ;;  %v1648_v14 = vsub.s32 0, %v1646_v60  ;;  %v1745_v42 = vrot.slane %v3550_v35, %v2593_v2  ;;  %v1752_v31 = vrot.slane %v3550_v35, %v2596_v3 }
 0x198   : > { %v1563_v29 = vsel %vm1480_vm10, %v1562_v25, %v1561_v20  ;;  %v1567_v47 = vsel %vm3542_vm12, 0, %v1565_v6  ;;  %v1759_v30 = vrot.slane %v3550_v35, %v2599_v4  ;;  %v1766_v49 = vrot.slane %v3550_v35, %v2602_v5 }
 0x199   : > { %v1719_v61 = vadd.f32 %v1718_v23, %v1712_v1  ;;  %v1566_v50 = vsel %vm3542_vm12, %v3214_v26, %v1563_v29  ;;  %v2079_v39 = vmin.u32 %v1648_v14, %v1646_v60  ;;  %v1746_v57 = vmul.f32 %v1745_v42, %v1741_v51 }
 0x19a   : > { %2211 = vcosq.f32 %v1566_v50  ;;  %v1753_v55 = vmul.f32 %v1752_v31, %v1748_v46  ;;  %v1571_v56 = vadd.s32 3, %v1567_v47  ;;  %v1638_v63 = vadd.s32 %v3484_v19, %v3497_v37 }
 0x19b   : > { %v1726_v48 = vadd.f32 %v1725_v7, %v1719_v61  ;;  %2213 = vsinq.f32 %v1566_v50  ;;  %v1650_v24 = vclz %v2079_v39  ;;  %v1760_v12 = vmul.f32 %v1759_v30, %v1755_v54  ;;  %v1790_v61 = vld [vmem:[%s2584_s20 + $0x4bc] sm:$0xf]  ;;  %v1804_v54 = vld [vmem:[%s2584_s20 + $0x4c4] sm:$0xf] }
 0x19c   : > { %v1773_v41 = vrot.slane %v3550_v35, %v2738_v44  ;;  %v1767_v27 = vmul.f32 %v1766_v49, %v1762_v58  ;;  %v1780_v20 = vrot.slane %v3550_v35, %v2741_v22  ;;  %v1572_v19 = vand.u32 3, %v1571_v56 }
 0x19d   : > { %v1733_v28 = vadd.f32 %v1732_v53, %v1726_v48  ;;  %v2080_v16 = vadd.s32 4294967294, %v1650_v24  ;;  %v1787_v8 = vrot.slane %v3550_v35, %v2804_v0  ;;  %v1794_v14 = vrot.slane %v3550_v35, %v2932_v13 }
 0x19e   : > { %v1774_v33 = vmul.f32 %v1773_v41, %v1769_v36  ;;  %v1781_v7 = vmul.f32 %v1780_v20, %v1776_v59  ;;  %vm1577_vm14 = vcmp.eq.s32.totalorder %v1572_v19, 2  ;;  %vm1574_vm15 = vcmp.eq.s32.totalorder %v1572_v19, 0 }
 0x19f   : > { %v1740_v43 = vadd.f32 %v1739_v34, %v1733_v28  ;;  %vm2081_vm13 = vcmp.lt.s32.totalorder %v2080_v16, 0  ;;  %vm1573_vm0 = vcmp.lt.s32.totalorder %v1572_v19, 2  ;;  %v1795_v35 = vmul.f32 %v1794_v14, %v1790_v61 }
 0x1a0   : > { %v1653_v21 = vsel %vm2081_vm13, 0, %v2080_v16  ;;  %v1668_v46 = vsub.s32 4, %v3530_v15  ;;  %vm1674_vm7 = vweird.f32 %v3309_v45 }
 0x1a1   : > { %v1747_v9 = vadd.f32 %v1746_v57, %v1740_v43  ;;  %v1654_v10 = vsub.s32 32, %v1653_v21  ;;  %v1655_v18 = vshll.u32 %v1646_v60, %v1653_v21  ;;  %v1658_v23 = vsub.s32 4294967266, %v1653_v21  ;;  %v1783_v60 = vld [vmem:[%s2584_s20 + $0x4b8] sm:$0xf]  ;;  %v1797_v57 = vld [vmem:[%s2584_s20 + $0x4c0] sm:$0xf] }
 0x1a2   : > { %v1788_v50 = vmul.f32 %v1787_v8, %v1783_v60  ;;  %v1669_v58 = vsel %vm1584_vm2, %v1668_v46, %v3530_v15  ;;  %v1811_v21 = vld [vmem:[%s2584_s20 + $0x4c8] sm:$0xf] }
 0x1a3   : > { %v1754_v11 = vadd.f32 %v1753_v55, %v1747_v9  ;;  %v1656_v37 = vshrl.u32 %v1638_v63, %v1654_v10  ;;  %v1659_v17 = vadd.s32 127, %v1658_v23  ;;  %v1818_v10 = vld [vmem:[%s2584_s20 + $0x4cc] sm:$0xf]  ;;  %v1671_v15 = vsel %vm3597_vm3, 0, %v1669_v58 }
 0x1a5   : > { %v1761_v38 = vadd.f32 %v1760_v12, %v1754_v11  ;;  %v1657_v40 = vor.u32 %v1656_v37, %v1655_v18  ;;  %v1660_v25 = vshll.u32 %v1659_v17, 23  ;;  %v1825_v11 = vld [vmem:[%s2584_s20 + $0x4d0] sm:$0xf]  ;;  %v1675_v37 = vadd.s32 3, %v1671_v15  ;;  %v1909_v15 = vld [vmem:[%s2624_s29 + $0x40] sm:$0xf] }
 0x1a7   : > { %v1768_v1 = vadd.f32 %v1767_v27, %v1761_v38  ;;  %v2212_v32 = vpop.eup %2211  ;;  %v1661_v52 = vor.u32 4788187, %v1660_v25  ;;  %v1664_v29 = vcvt.s32.f32 %v1657_v40  ;;  %v1832_v38 = vld [vmem:[%s2584_s20 + $0x4d4] sm:$0xf]  ;;  %v1676_v25 = vand.u32 3, %v1675_v37 }
 0x1a8   : > { %v2214_v53 = vpop.eup %2213  ;;  %v1578_v42 = vxor.u32 2147483648, %v2212_v32 }
 0x1a9   : > { %v1775_v6 = vadd.f32 %v1774_v33, %v1768_v1  ;;  %v1575_v39 = vxor.u32 2147483648, %v2214_v53  ;;  %v1662_v51 = vand.u32 2147483647, %v1661_v52  ;;  %v1839_v1 = vld [vmem:[%s2584_s20 + $0x4d8] sm:$0xf]  ;;  %vm1681_vm4 = vcmp.eq.s32.totalorder %v1676_v25, 2 }
 0x1aa   : > { %v1579_v48 = vsel %vm1577_vm14, %v1578_v42, %v2214_v53  ;;  %vm1678_vm5 = vcmp.eq.s32.totalorder %v1676_v25, 0  ;;  %vm1677_vm6 = vcmp.lt.s32.totalorder %v1676_v25, 2 }
 0x1ab   : > { %v1782_v34 = vadd.f32 %v1781_v7, %v1775_v6  ;;  %v1576_v31 = vsel %vm1574_vm15, %v2212_v32, %v1575_v39  ;;  %v1665_v24 = vmul.f32 %v1664_v29, %v1662_v51  ;;  %v1846_v29 = vld [vmem:[%s2584_s20 + $0x4dc] sm:$0xf] }
 0x1ac   : > { %v1580_v47 = vsel %vm1573_vm0, %v1576_v31, %v1579_v48  ;;  %v1860_v31 = vld [vmem:[%s2584_s20 + $0x4e4] sm:$0xf] }
 0x1ad   : > { %v1789_v28 = vadd.f32 %v1788_v50, %v1782_v34  ;;  %v1581_v30 = vsel %vm1570_vm1, nan, %v1580_v47  ;;  %v1666_v26 = vxor.u32 2147483648, %v1665_v24 }
 0x1ae   : > { %v1801_v55 = vrot.slane %v1581_v30, %v2593_v2  ;;  %v1808_v49 = vrot.slane %v1581_v30, %v2596_v3  ;;  %v1815_v56 = vrot.slane %v1581_v30, %v2599_v4  ;;  %v1822_v41 = vrot.slane %v1581_v30, %v2602_v5 }
 0x1af   : > { %v1796_v43 = vadd.f32 %v1795_v35, %v1789_v28  ;;  %v1667_v63 = vsel %vm1584_vm2, %v1666_v26, %v1665_v24  ;;  %v1829_v36 = vrot.slane %v1581_v30, %v2738_v44  ;;  %v1836_v19 = vrot.slane %v1581_v30, %v2741_v22  ;;  %v1853_v35 = vld [vmem:[%s2584_s20 + $0x4e0] sm:$0xf]  ;;  %v1874_v26 = vld [vmem:[%s2584_s20 + $0x4ec] sm:$0xf] }
 0x1b0   : > { %v1670_v62 = vsel %vm3597_vm3, %v3309_v45, %v1667_v63  ;;  %v1802_v9 = vmul.f32 %v1801_v55, %v1797_v57  ;;  %v1809_v12 = vmul.f32 %v1808_v49, %v1804_v54  ;;  %v1816_v23 = vmul.f32 %v1815_v56, %v1811_v21  ;;  %v1867_v57 = vld [vmem:[%s2584_s20 + $0x4e8] sm:$0xf]  ;;  %v1881_v49 = vld [vmem:[%s2584_s20 + $0x4f0] sm:$0xf] }
 0x1b1   : > { %2215 = vcosq.f32 %v1670_v62  ;;  %v1823_v20 = vmul.f32 %v1822_v41, %v1818_v10  ;;  %v1830_v59 = vmul.f32 %v1829_v36, %v1825_v11  ;;  %v1837_v8 = vmul.f32 %v1836_v19, %v1832_v38  ;;  %v1902_v41 = vld [vmem:[%s2584_s20 + $0x4fc] sm:$0xf] }
 0x1b2   : > { %2217 = vsinq.f32 %v1670_v62  ;;  %v1803_v18 = vadd.f32 %v1802_v9, %v1796_v43  ;;  %v1843_v40 = vrot.slane %v1581_v30, %v2804_v0  ;;  %v1850_v32 = vrot.slane %v1581_v30, %v2932_v13 }
 0x1b4   : > { %v1810_v27 = vadd.f32 %v1809_v12, %v1803_v18  ;;  %v1844_v14 = vmul.f32 %v1843_v40, %v1839_v1  ;;  %v1851_v39 = vmul.f32 %v1850_v32, %v1846_v29 }
 0x1b6   : > { %v1817_v17 = vadd.f32 %v1816_v23, %v1810_v27 }
 0x1b8   : > { %v1824_v33 = vadd.f32 %v1823_v20, %v1817_v17 }
 0x1ba   : > { %v1831_v60 = vadd.f32 %v1830_v59, %v1824_v33 }
 0x1bc   : > { %v1838_v7 = vadd.f32 %v1837_v8, %v1831_v60 }
 0x1be   : > { %v2216_v52 = vpop.eup %2215  ;;  %v1845_v50 = vadd.f32 %v1844_v14, %v1838_v7 }
 0x1bf   : > { %v2218_v61 = vpop.eup %2217  ;;  %v1682_v53 = vxor.u32 2147483648, %v2216_v52 }
 0x1c0   : > { %v1679_v42 = vxor.u32 2147483648, %v2218_v61  ;;  %v1852_v24 = vadd.f32 %v1851_v39, %v1845_v50 }
 0x1c1   : > { %v1683_v6 = vsel %vm1681_vm4, %v1682_v53, %v2218_v61 }
 0x1c2   : > { %v1680_v51 = vsel %vm1678_vm5, %v2216_v52, %v1679_v42 }
 0x1c3   : > { %v1684_v48 = vsel %vm1677_vm6, %v1680_v51, %v1683_v6 }
 0x1c4   : > { %v1685_v34 = vsel %vm1674_vm7, nan, %v1684_v48 }
 0x1c5   : > { %v1857_v46 = vrot.slane %v1685_v34, %v2593_v2  ;;  %v1864_v47 = vrot.slane %v1685_v34, %v2596_v3  ;;  %v1871_v28 = vrot.slane %v1685_v34, %v2599_v4  ;;  %v1878_v16 = vrot.slane %v1685_v34, %v2602_v5  ;;  %v1888_v3 = vld [vmem:[%s2584_s20 + $0x4f4] sm:$0xf]  ;;  %v1895_v5 = vld [vmem:[%s2584_s20 + $0x4f8] sm:$0xf] }
 0x1c6   : > { %v1885_v55 = vrot.slane %v1685_v34, %v2738_v44  ;;  %v1892_v2 = vrot.slane %v1685_v34, %v2741_v22  ;;  %v1899_v21 = vrot.slane %v1685_v34, %v2804_v0  ;;  %v1906_v12 = vrot.slane %v1685_v34, %v2932_v13 }
 0x1c7   : > { %v1858_v45 = vmul.f32 %v1857_v46, %v1853_v35  ;;  %v1865_v30 = vmul.f32 %v1864_v47, %v1860_v31  ;;  %v1872_v43 = vmul.f32 %v1871_v28, %v1867_v57  ;;  %v1879_v63 = vmul.f32 %v1878_v16, %v1874_v26 }
 0x1c8   : > { %v1886_v58 = vmul.f32 %v1885_v55, %v1881_v49  ;;  %v1893_v9 = vmul.f32 %v1892_v2, %v1888_v3  ;;  %v1900_v10 = vmul.f32 %v1899_v21, %v1895_v5  ;;  %v1907_v22 = vmul.f32 %v1906_v12, %v1902_v41 }
 0x1c9   : > { %v1859_v54 = vadd.f32 %v1858_v45, %v1852_v24 }
 0x1cb   : > { %v1866_v56 = vadd.f32 %v1865_v30, %v1859_v54 }
 0x1cd   : > { %v1873_v4 = vadd.f32 %v1872_v43, %v1866_v56 }
 0x1cf   : > { %v1880_v62 = vadd.f32 %v1879_v63, %v1873_v4 }
 0x1d1   : > { %v1887_v44 = vadd.f32 %v1886_v58, %v1880_v62 }
 0x1d3   : > { %v1894_v18 = vadd.f32 %v1893_v9, %v1887_v44 }
 0x1d5   : > { %v1901_v23 = vadd.f32 %v1900_v10, %v1894_v18 }
 0x1d7   : > { %v1908_v36 = vadd.f32 %v1907_v22, %v1901_v23 }
 0x1d9   : > { %v1910_v0 = vmul.f32 30.0, %v1908_v36 }
 0x1db   : > { %v1911_v11 = vadd.f32 %v1910_v0, %v1909_v15 }
 0x1dd   : > { %1912 = vst [vmem:[%s260_s7] sm:$0xf] %v1911_v11 }
 0x1de   : > { %2316 = shalt.err (!%p2313_p9)
}
 0x1df   : > { %s2317_s25 = scalar_lea.hbm %s1925_s9, 64  ;;  %s2321_s8 = scalar_lea.hbm %s3680_s3, 128 }
 0x1e0   : > { %p2318_p12 = scmp.ne.s32.totalorder %s1925_s9, %s2317_s25  ;;  %p2322_p4 = scmp.lt.s32.totalorder %s1925_s9, %s3680_s3 }
 0x1e1   : > { %p2323_p1 = scmp.lt.s32.totalorder %s2321_s8, %s2317_s25 }
 0x1e2   : > { %p2319_p3 = pnand %p2318_p12, %p3717_p7 }
 0x1e3   : > { %p2324_p5 = por %p2323_p1, %p2322_p4 }
 0x1e4   : > { %p2320_p11 = pneg %p2319_p3 }
 0x1e6   : > { %p2325_p13 = pnand %p2324_p5, %p2320_p11 }
 0x1e8   : > { %2328 = shalt.err (!%p2325_p13)
}
 0x1e9   : > { %2128 = dma.vmem_to_hbm [thread:$0]  (%p3717_p7), %s1928_s5, 64, %s1925_s9, %s1914_s11  }
 0x1ea PF: > { %s1939_s20 = sand.u32 1, %s2359_s12   ;;  %p3718_p8 = scmp.ne.s32.totalorder %s3690_s24, 0 }
 0x1eb   : > { %p3719_p10 = scmp.ge.s32.totalorder %s2371_s15, 2  ;;  %s1940_s22 = scalar_lea.sflag [#allocation4], %s1939_s20 }
 0x1ed   : > { %p2141_p0 = pnand %p3719_p10, %p3718_p8 }
 0x1ef   : > { %p2142_p2 = pneg %p2141_p0 }
 0x1f1   : > { %2354 = dma.done.wait (%p2142_p2), %s1940_s22, 64  }
 0x1f2   : > { %2356 = vsyncadd (%p2142_p2), %s1940_s22, 4294967232  ;;  %p19_p6 = scmp.ge.s32.totalorder %s2431_s18, 4   ;;  %s3720_s12 = smov %s2363_s13 }
 0x1f3   : > { %s3721_s13 = smov %s2367_s14  ;;  %s3722_s14 = smov %s2443_s21 }
 0x1f4   : > { %s3723_s15 = smov %s2431_s18  ;;  %21 = sbr.rel (!%p19_p6) target bundleno = 9 (0x9), region = 101 }
 0x1f9   :  { %1945 = vsyncpa [#allocation3], 1 }
 0x1fa   :  { %1947 = vsyncpa [#allocation3 + $0x1], 1 }
 0x1fb   :  { %1948 = vsyncpa [#allocation6], 1 }
 0x1fc   :  { %1950 = vsyncpa [#allocation6 + $0x1], 1 }
 0x1fd   :  { %1951 = vsyncpa [#allocation4], 1 }
 0x1fe   :  { %1953 = vsyncpa [#allocation4 + $0x1], 1 }

</bundles_post_ra>
